<compile_context>
chip_gen: v6e
topology: v6e:2x2x1
jax: 0.10.0
libtpu: 0.0.40
codegen_flags: <defaults>
</compile_context>

<pallas_src>
import math
from functools import partial

import numpy as np
import jax
import jax.numpy as jnp
from jax import lax
from jax.experimental import pallas as pl
from jax.experimental.pallas import tpu as pltpu


_EPS = 1e-7
# clamping the logit at +/- log((1-eps)/eps) reproduces clip(p, eps, 1-eps)
_Z_CLIP = float(np.log((1.0 - _EPS) / _EPS))


# ------------------------------ Pallas kernel ------------------------------
def yolo_loss_kernel(tgt_ref, pred_ref, yt_ref, noobj_ref, bls_ref, gxy_ref,
                     out_ref, *, anchors_wh):
    """One grid step = `batch_block` images, everything lane-dense (Rhw,128)."""
    f32 = jnp.float32
    blk = pl.program_id(0)
    bblk, n_anchors, A, r_dim, lanes = pred_ref.shape
    C = A - 5
    n_t = tgt_ref.shape[1] // 4

    gx = gxy_ref[0]                       # (Rhw, 128) cell column index
    gy = gxy_ref[1]                       # (Rhw, 128) cell row index

    loss_tile = jnp.zeros((r_dim, lanes), f32)
    npos_tile = jnp.zeros((r_dim, lanes), f32)

    iou_unroll = True if n_t <= 8 else 4
    cls_unroll = True if C <= 8 else 4

    for bb in range(bblk):                # images in this block
        bg = blk * bblk + bb
        for a in range(n_anchors):        # anchors (static, usually 3)
            aw, ah = anchors_wh[a]        # truncated scaled anchors (constants)

            x_l = pred_ref[bb, a, 0].astype(f32)
            y_l = pred_ref[bb, a, 1].astype(f32)
            w_r = pred_ref[bb, a, 2].astype(f32)
            h_r = pred_ref[bb, a, 3].astype(f32)
            conf_l = pred_ref[bb, a, 4].astype(f32)

            # sigmoid via EUP reciprocal; feeds MSE + a 0.5-threshold mask
            xs = pl.reciprocal(1.0 + jnp.exp(-x_l), approx=True)
            ys = pl.reciprocal(1.0 + jnp.exp(-y_l), approx=True)

            # decoded prediction boxes (grid units)
            px = xs + gx
            py = ys + gy
            pw = jnp.exp(w_r) * aw
            ph = jnp.exp(h_r) * ah
            bx1 = px - 0.5 * pw
            bx2 = px + 0.5 * pw
            by1 = py - 0.5 * ph
            by2 = py + 0.5 * ph
            area_b = pw * ph

            # ---- get_ignore: division-free running max over (padded) targets.
            # score = inter - 0.5*union;  score > 0  <=>  IoU > 0.5 (union > 0);
            # zero-padded targets always give score <= 0.
            def iou_body(t, smax):
                base = 4 * t
                cx = tgt_ref[bg, base]
                cy = tgt_ref[bg, base + 1]
                cw = tgt_ref[bg, base + 2]
                ch = tgt_ref[bg, base + 3]
                ax1 = cx - 0.5 * cw
                ax2 = cx + 0.5 * cw
                ay1 = cy - 0.5 * ch
                ay2 = cy + 0.5 * ch
                iw = jnp.maximum(jnp.minimum(ax2, bx2) - jnp.maximum(ax1, bx1), 0.0)
                ih = jnp.maximum(jnp.minimum(ay2, by2) - jnp.maximum(ay1, by1), 0.0)
                inter = iw * ih
                union = cw * ch + area_b - inter
                return jnp.maximum(smax, inter - 0.5 * union)

            score = lax.fori_loop(0, n_t, iou_body,
                                  jnp.zeros((r_dim, lanes), f32),
                                  unroll=iou_unroll)

            noobj = jnp.where(score > 0.0, 0.0, noobj_ref[bb, a].astype(f32))

            obj = yt_ref[bb, a, 4].astype(f32)
            so = (2.0 - bls_ref[bb, a].astype(f32)) * obj

            coord = ((xs - yt_ref[bb, a, 0].astype(f32)) ** 2 +
                     (ys - yt_ref[bb, a, 1].astype(f32)) ** 2 +
                     (w_r - yt_ref[bb, a, 2].astype(f32)) ** 2 +
                     (h_r - yt_ref[bb, a, 3].astype(f32)) ** 2) * so

            # conf BCE from logits; ±Z clip keeps parity with clip(p,eps,1-eps)
            zc = jnp.clip(conf_l, -_Z_CLIP, _Z_CLIP)
            conf = (jnp.maximum(zc, 0.0) - zc * obj +
                    jnp.log(1.0 + jnp.exp(-jnp.abs(zc)))) * (obj + noobj)

            # class BCE streamed one plane at a time (no (C,Rhw,128) temp),
            # unclipped stable softplus form (finite for any logit).
            def cls_body(c, acc):
                z = pred_ref[bb, a, 5 + c].astype(f32)
                t = yt_ref[bb, a, 5 + c].astype(f32)
                return acc + (jnp.maximum(z, 0.0) - z * t +
                              jnp.log(1.0 + jnp.exp(-jnp.abs(z))))

            cls_sum = lax.fori_loop(0, C, cls_body,
                                    jnp.zeros((r_dim, lanes), f32),
                                    unroll=cls_unroll)

            loss_tile = loss_tile + coord + conf + cls_sum * obj
            npos_tile = npos_tile + obj

    # single lane-dense store: row 0 = loss partials, row 1 = num_pos partials
    loss_row = jnp.sum(loss_tile, axis=0, keepdims=True)
    npos_row = jnp.sum(npos_tile, axis=0, keepdims=True)
    out_ref[...] = jnp.concatenate([loss_row, npos_row], axis=0).reshape(1, 2, lanes)


# ------------------------------ wrapper / tuning ------------------------------
def _vmem_limit_bytes():
    cap = 64 * 1024 * 1024
    try:
        info = pltpu.get_tpu_info()
        c = getattr(info, "vmem_capacity_bytes", None)
        if c:
            cap = int(c)
    except Exception:
        pass
    # headroom for compiler scratch; ~40 MiB on v7x, ~80 MiB on v5e/v6e
    return int(min(cap * 0.65, 100 * 1024 * 1024))


def _choose_batch_block(bs, n_anchors, A, r_hw, pred_itemsize, tgt_itemsize,
                        vmem_budget_bytes):
    plane = r_hw * 128
    # double-buffered input footprint per image
    per_img = 2 * (n_anchors * A * plane * (pred_itemsize + tgt_itemsize)
                   + 2 * n_anchors * plane * tgt_itemsize)
    best = 1
    for bb in range(1, bs + 1):
        if bs % bb != 0:
            continue
        if bb * per_img > vmem_budget_bytes:
            continue
        nblk = bs // bb
        if bs >= 2 and nblk < 2:
            # keep >= 2 grid steps so "parallel" can shard across TCs (v7x)
            continue
        best = bb
    return best


@partial(jax.jit, static_argnames=("n_anchors", "num_classes", "in_h", "in_w",
                                   "anchors_wh", "batch_block", "vmem_limit"))
def _yolo_loss_call(x, yt_lane, noobj_lane, bls_lane, targets_grid, *,
                    n_anchors, num_classes, in_h, in_w, anchors_wh,
                    batch_block, vmem_limit):
    f32 = jnp.float32
    bs = x.shape[0]
    A = 5 + num_classes
    HW = in_h * in_w
    HWp = ((HW + 127) // 128) * 128
    Rhw = HWp // 128
    assert x.shape[1] == n_anchors * A
    assert bs % batch_block == 0
    nblk = bs // batch_block

    # natural (bs, nA, A, HW) order: no transpose, no dtype upcast in HBM.
    # When HW % 128 != 0 the pad is one fused copy; otherwise this is free.
    pred = x.reshape(bs, n_anchors, A, HW)
    if HWp != HW:
        pred = jnp.pad(pred, ((0, 0), (0, 0), (0, 0), (0, HWp - HW)))
    pred = pred.reshape(bs, n_anchors, A, Rhw, 128)

    # tiny gx/gy decode table (constant block index -> effectively one fetch)
    n_idx = jnp.arange(HWp, dtype=jnp.int32)
    gxy = jnp.stack([(n_idx % in_w).astype(f32),
                     (n_idx // in_w).astype(f32)], axis=0).reshape(2, Rhw, 128)

    T = targets_grid.shape[1]
    tgt_flat = targets_grid.astype(f32).reshape(bs, T * 4)

    kernel = partial(yolo_loss_kernel, anchors_wh=anchors_wh)

    out = pl.pallas_call(
        kernel,
        out_shape=jax.ShapeDtypeStruct((nblk, 2, 128), f32),
        grid_spec=pltpu.PrefetchScalarGridSpec(
            num_scalar_prefetch=0,
            grid=(nblk,),
            in_specs=[
                pl.BlockSpec(memory_space=pltpu.MemorySpace.SMEM),  # target boxes
                pl.BlockSpec((batch_block, n_anchors, A, Rhw, 128),
                             lambda i: (i, 0, 0, 0, 0)),            # pred
                pl.BlockSpec((batch_block, n_anchors, A, Rhw, 128),
                             lambda i: (i, 0, 0, 0, 0)),            # y_true (bf16)
                pl.BlockSpec((batch_block, n_anchors, Rhw, 128),
                             lambda i: (i, 0, 0, 0)),               # noobj (bf16)
                pl.BlockSpec((batch_block, n_anchors, Rhw, 128),
                             lambda i: (i, 0, 0, 0)),               # bls (bf16)
                pl.BlockSpec((2, Rhw, 128), lambda i: (0, 0, 0)),   # gx/gy table
            ],
            out_specs=pl.BlockSpec((1, 2, 128), lambda i: (i, 0, 0)),
        ),
        compiler_params=pltpu.CompilerParams(
            dimension_semantics=("parallel",),
            vmem_limit_bytes=vmem_limit),
    )(tgt_flat, pred, yt_lane, noobj_lane, bls_lane, gxy)

    loss = jnp.sum(out[:, 0, :])
    num_pos = jnp.maximum(jnp.sum(out[:, 1, :]), 1.0)
    return loss, num_pos


def yolo_loss_forward(x, y_true_lane, noobj_lane, bls_lane, targets_grid, *,
                      n_anchors, num_classes, in_h, in_w, scaled_anchors_t,
                      batch_block=None):
    bs = x.shape[0]
    A = 5 + num_classes
    Rhw = ((in_h * in_w + 127) // 128) * 128 // 128
    vmem_limit = _vmem_limit_bytes()
    if batch_block is None:
        batch_block = _choose_batch_block(
            bs, n_anchors, A, Rhw,
            np.dtype(x.dtype).itemsize, np.dtype(y_true_lane.dtype).itemsize,
            int(vmem_limit * 0.4))
    # .long() in the reference truncates the scaled anchors -> bake as constants
    anchors_wh = tuple((float(np.trunc(a_w)), float(np.trunc(a_h)))
                       for a_w, a_h in scaled_anchors_t)
    return _yolo_loss_call(x, y_true_lane, noobj_lane, bls_lane, targets_grid,
                           n_anchors=n_anchors, num_classes=num_classes,
                           in_h=in_h, in_w=in_w, anchors_wh=anchors_wh,
                           batch_block=int(batch_block),
                           vmem_limit=int(vmem_limit))


# ----------------------- host-side glue (get_target) -----------------------
def calculate_iou_wh_np(box_a, box_b):
    w_min = np.minimum(box_a[:, None, 0], box_b[None, :, 0])
    h_min = np.minimum(box_a[:, None, 1], box_b[None, :, 1])
    inter = w_min * h_min
    area_a = box_a[:, 0] * box_a[:, 1]
    area_b = box_b[:, 0] * box_b[:, 1]
    union = area_a[:, None] + area_b[None, :]
    return inter / (union - inter)


def get_target_np(targets, scaled_anchors, in_h, in_w, n_anchors, bbox_attrs):
    # TODO(synk): per-box scatter with a dynamic number of boxes per image has
    # no clean Pallas equivalent; kept as host-side target preparation
    # (mirrors YOLOLoss.get_target).
    bs = len(targets)
    noobj = np.ones((bs, n_anchors, in_h, in_w), np.float32)
    bls = np.zeros((bs, n_anchors, in_h, in_w), np.float32)
    y_true = np.zeros((bs, n_anchors, in_h, in_w, bbox_attrs), np.float32)
    anchors = np.asarray(scaled_anchors, np.float32)
    for b in range(bs):
        t = targets[b]
        if len(t) == 0:
            continue
        bt = np.zeros_like(t)
        bt[:, [0, 2]] = t[:, [0, 2]] * in_w
        bt[:, [1, 3]] = t[:, [1, 3]] * in_h
        bt[:, 4] = t[:, 4]
        best_ns = np.argmax(calculate_iou_wh_np(bt[:, 2:4], anchors), axis=-1)
        for ti, best_n in enumerate(best_ns):
            j = int(np.floor(bt[ti, 0]))
            i = int(np.floor(bt[ti, 1]))
            c = int(bt[ti, 4])
            noobj[b, best_n, i, j] = 0
            y_true[b, best_n, i, j, 0] = bt[ti, 0] - j
            y_true[b, best_n, i, j, 1] = bt[ti, 1] - i
            y_true[b, best_n, i, j, 2] = math.log(bt[ti, 2] / anchors[best_n, 0])
            y_true[b, best_n, i, j, 3] = math.log(bt[ti, 3] / anchors[best_n, 1])
            y_true[b, best_n, i, j, 4] = 1.0
            y_true[b, best_n, i, j, c + 5] = 1.0
            bls[b, best_n, i, j] = bt[ti, 2] * bt[ti, 3] / in_w / in_h
    return y_true, noobj, bls


def prepare_targets_lane(y_true, noobj_mask, box_loss_scale, *, n_anchors,
                         bbox_attrs, in_h, in_w, dtype=jnp.bfloat16):
    """Host-side pack of get_target outputs into the padded lane-dense
    (bs, nA, A, Rhw, 128) / (bs, nA, Rhw, 128) layout the kernel consumes."""
    bs = y_true.shape[0]
    HW = in_h * in_w
    HWp = ((HW + 127) // 128) * 128
    Rhw = HWp // 128
    pad = HWp - HW
    yt = np.transpose(y_true, (0, 1, 4, 2, 3)).reshape(bs, n_anchors, bbox_attrs, HW)
    no = noobj_mask.reshape(bs, n_anchors, HW)
    bl = box_loss_scale.reshape(bs, n_anchors, HW)
    if pad:
        yt = np.pad(yt, ((0, 0), (0, 0), (0, 0), (0, pad)))
        no = np.pad(no, ((0, 0), (0, 0), (0, pad)))
        bl = np.pad(bl, ((0, 0), (0, 0), (0, pad)))
    yt = yt.reshape(bs, n_anchors, bbox_attrs, Rhw, 128).astype(dtype)
    no = no.reshape(bs, n_anchors, Rhw, 128).astype(dtype)
    bl = bl.reshape(bs, n_anchors, Rhw, 128).astype(dtype)
    return jnp.asarray(yt), jnp.asarray(no), jnp.asarray(bl)


def pad_targets_to_grid_coords(targets_list, in_h, in_w, pad_to):
    bs = len(targets_list)
    out = np.zeros((bs, pad_to, 4), np.float32)   # zero boxes -> never ignored
    for b, t in enumerate(targets_list):
        nb = len(t)
        if nb == 0:
            continue
        out[b, :nb, 0] = t[:, 0] * in_w
        out[b, :nb, 1] = t[:, 1] * in_h
        out[b, :nb, 2] = t[:, 2] * in_w
        out[b, :nb, 3] = t[:, 3] * in_h
    return out


# ------------------- numpy reference (mirrors the torch code) -------------------
def yolo_loss_reference_np(x_np, y_true, noobj0, bls, targets_list,
                           scaled_anchors, n_anchors, num_classes, in_h, in_w):
    bs = x_np.shape[0]
    A = 5 + num_classes
    pred = x_np.reshape(bs, n_anchors, A, in_h, in_w).transpose(0, 1, 3, 4, 2)
    sig = lambda z: 1.0 / (1.0 + np.exp(-z))
    x = sig(pred[..., 0]); y = sig(pred[..., 1])
    w = pred[..., 2]; h = pred[..., 3]
    conf = sig(pred[..., 4]); pcls = sig(pred[..., 5:])

    jj, ii = np.meshgrid(np.arange(in_w, dtype=np.float32),
                         np.arange(in_h, dtype=np.float32))
    aw = np.trunc(np.asarray(scaled_anchors)[:, 0]).astype(np.float32)[None, :, None, None]
    ah = np.trunc(np.asarray(scaled_anchors)[:, 1]).astype(np.float32)[None, :, None, None]
    px = x + jj[None, None]
    py = y + ii[None, None]
    pw = np.exp(w) * aw
    ph = np.exp(h) * ah
    noobj = noobj0.copy()
    for b in range(bs):
        t = targets_list[b]
        if len(t) == 0:
            continue
        bt = np.zeros((len(t), 4), np.float32)
        bt[:, 0] = t[:, 0] * in_w; bt[:, 2] = t[:, 2] * in_w
        bt[:, 1] = t[:, 1] * in_h; bt[:, 3] = t[:, 3] * in_h
        pb = np.stack([px[b].ravel(), py[b].ravel(), pw[b].ravel(), ph[b].ravel()], -1)
        ax1 = bt[:, 0] - bt[:, 2] / 2; ax2 = bt[:, 0] + bt[:, 2] / 2
        ay1 = bt[:, 1] - bt[:, 3] / 2; ay2 = bt[:, 1] + bt[:, 3] / 2
        bx1 = pb[:, 0] - pb[:, 2] / 2; bx2 = pb[:, 0] + pb[:, 2] / 2
        by1 = pb[:, 1] - pb[:, 3] / 2; by2 = pb[:, 1] + pb[:, 3] / 2
        inter = (np.clip(np.minimum(ax2[:, None], bx2) - np.maximum(ax1[:, None], bx1), 0, None) *
                 np.clip(np.minimum(ay2[:, None], by2) - np.maximum(ay1[:, None], by1), 0, None))
        area_a = (ax2 - ax1) * (ay2 - ay1)
        area_b = (bx2 - bx1) * (by2 - by1)
        union = area_a[:, None] + area_b - inter
        iou_max = (inter / union).max(0).reshape(n_anchors, in_h, in_w)
        noobj[b][iou_max > 0.5] = 0

    obj = y_true[..., 4]
    scale = 2.0 - bls

    def bce(p, t):
        p = np.clip(p, 1e-7, 1.0 - 1e-7)
        return -t * np.log(p) - (1.0 - t) * np.log(1.0 - p)

    loss = (np.sum((x - y_true[..., 0]) ** 2 * scale * obj) +
            np.sum((y - y_true[..., 1]) ** 2 * scale * obj) +
            np.sum((w - y_true[..., 2]) ** 2 * scale * obj) +
            np.sum((h - y_true[..., 3]) ** 2 * scale * obj) +
            np.sum(bce(conf, obj) * obj) + np.sum(bce(conf, obj) * noobj) +
            np.sum(bce(pcls, y_true[..., 5:]) * obj[..., None]))
    num_pos = max(float(obj.sum()), 1.0)
    return float(loss), num_pos


if __name__ == "__main__":
    key = jax.random.PRNGKey(0)
    bs, num_classes, in_h, in_w = 2, 4, 16, 16
    A = 5 + num_classes
    n_anchors = 3
    l = 0
    input_shape = (128, 128)
    anchors = np.array([[10, 13], [16, 30], [33, 23], [30, 61], [62, 45],
                        [59, 119], [116, 90], [156, 198], [373, 326]], np.float32)
    anchors_mask = [[0, 1, 2], [3, 4, 5], [6, 7, 8]]
    stride_h = input_shape[0] / in_h
    stride_w = input_shape[1] / in_w
    scaled_anchors = (anchors[anchors_mask[l]] /
                      np.array([stride_w, stride_h], np.float32))
    scaled_anchors_t = tuple((float(a[0]), float(a[1])) for a in scaled_anchors)

    k1, k2 = jax.random.split(key)
    x_in = jax.random.normal(k1, (bs, n_anchors * A, in_h, in_w), jnp.float32)

    # synthetic per-image targets: (num_boxes, 5) with normalized x,y,w,h + class
    n_boxes = [3, 2]
    tgt_list = []
    kk = k2
    for b in range(bs):
        kk, ka, kb, kc = jax.random.split(kk, 4)
        xy = jax.random.uniform(ka, (n_boxes[b], 2), minval=0.05, maxval=0.95)
        wh = jax.random.uniform(kb, (n_boxes[b], 2), minval=0.05, maxval=0.3)
        cls = jax.random.randint(kc, (n_boxes[b], 1), 0, num_classes).astype(jnp.float32)
        tgt_list.append(np.asarray(jnp.concatenate([xy, wh, cls], -1), np.float32))

    # host-side ground-truth assignment (get_target) — data-dependent scatter
    y_true_np, noobj_np, bls_np = get_target_np(
        tgt_list, scaled_anchors, in_h, in_w, n_anchors, A)
    yt_lane, noobj_lane, bls_lane = prepare_targets_lane(
        y_true_np, noobj_np, bls_np, n_anchors=n_anchors, bbox_attrs=A,
        in_h=in_h, in_w=in_w)
    T = 8
    tgt_grid = jnp.asarray(pad_targets_to_grid_coords(tgt_list, in_h, in_w, pad_to=T))

    loss, num_pos = yolo_loss_forward(
        x_in, yt_lane, noobj_lane, bls_lane, tgt_grid,
        n_anchors=n_anchors, num_classes=num_classes, in_h=in_h, in_w=in_w,
        scaled_anchors_t=scaled_anchors_t)
    loss, num_pos = jax.block_until_ready((loss, num_pos))

    # sanity check against a numpy mirror of the PyTorch forward
    ref_loss, ref_npos = yolo_loss_reference_np(
        np.asarray(x_in, np.float32), y_true_np, noobj_np, bls_np, tgt_list,
        scaled_anchors, n_anchors, num_classes, in_h, in_w)

    loss_v, npos_v = float(loss), float(num_pos)
    assert np.isfinite(loss_v)
    assert abs(npos_v - ref_npos) < 1e-3, (npos_v, ref_npos)
    rel = abs(loss_v - ref_loss) / max(abs(ref_loss), 1.0)
    # tolerance covers bf16 target transport + approx-reciprocal sigmoids
    assert rel < 2e-2, (loss_v, ref_loss, rel)
    print("KERNEL_OK")
</pallas_src>

<mosaic_0001>
module attributes {stable_mosaic.version = 11 : i64} {
  func.func @yolo_loss_kernel(%arg0: i32, %arg1: memref<2x32xf32, #tpu.memory_space<smem>>, %arg2: memref<1x3x9x2x128xf32, #tpu.memory_space<vmem>>, %arg3: memref<1x3x9x2x128xbf16, #tpu.memory_space<vmem>>, %arg4: memref<1x3x2x128xbf16, #tpu.memory_space<vmem>>, %arg5: memref<1x3x2x128xbf16, #tpu.memory_space<vmem>>, %arg6: memref<2x2x128xf32, #tpu.memory_space<vmem>>, %arg7: memref<1x2x128xf32, #tpu.memory_space<vmem>>) attributes {dimension_semantics = [#tpu.dimension_semantics<parallel>], iteration_bounds = array<i64: 2>, scalar_prefetch = 0 : i64, scratch_operands = 0 : i64, tpu.core_type = #tpu.core_type<tc>, window_params = [{transform_indices = @transform_0, window_bounds = array<i64: 2, 32>}, {transform_indices = @transform_1, window_bounds = array<i64: 1, 3, 9, 2, 128>}, {transform_indices = @transform_2, window_bounds = array<i64: 1, 3, 9, 2, 128>}, {transform_indices = @transform_3, window_bounds = array<i64: 1, 3, 2, 128>}, {transform_indices = @transform_4, window_bounds = array<i64: 1, 3, 2, 128>}, {pipeline_mode = #tpu.pipeline_mode<synchronous>, transform_indices = @transform_5, window_bounds = array<i64: 2, 2, 128>}, {transform_indices = @transform_6, window_bounds = array<i64: 1, 2, 128>}]} {
    %c0 = arith.constant 0 : index
    %c0_0 = arith.constant 0 : index
    %c0_1 = arith.constant 0 : index
    %0 = vector.load %arg6[%c0, %c0_0, %c0_1] : memref<2x2x128xf32, #tpu.memory_space<vmem>>, vector<1x2x128xf32>
    %1 = vector.shape_cast %0 : vector<1x2x128xf32> to vector<2x128xf32>
    %c1 = arith.constant 1 : index
    %c0_2 = arith.constant 0 : index
    %c0_3 = arith.constant 0 : index
    %2 = vector.load %arg6[%c1, %c0_2, %c0_3] : memref<2x2x128xf32, #tpu.memory_space<vmem>>, vector<1x2x128xf32>
    %3 = vector.shape_cast %2 : vector<1x2x128xf32> to vector<2x128xf32>
    %cst = arith.constant 0.000000e+00 : f32
    %4 = vector.broadcast %cst : f32 to vector<2x128xf32>
    %cst_4 = arith.constant 0.000000e+00 : f32
    %5 = vector.broadcast %cst_4 : f32 to vector<2x128xf32>
    %c1_i32 = arith.constant 1 : i32
    %6 = arith.muli %arg0, %c1_i32 : i32
    %c0_i32 = arith.constant 0 : i32
    %7 = arith.addi %6, %c0_i32 : i32
    %c0_5 = arith.constant 0 : index
    %c0_6 = arith.constant 0 : index
    %c0_7 = arith.constant 0 : index
    %c0_8 = arith.constant 0 : index
    %c0_9 = arith.constant 0 : index
    %8 = vector.load %arg2[%c0_5, %c0_6, %c0_7, %c0_8, %c0_9] : memref<1x3x9x2x128xf32, #tpu.memory_space<vmem>>, vector<1x1x1x2x128xf32>
    %9 = vector.shape_cast %8 : vector<1x1x1x2x128xf32> to vector<2x128xf32>
    %c0_10 = arith.constant 0 : index
    %c0_11 = arith.constant 0 : index
    %c1_12 = arith.constant 1 : index
    %c0_13 = arith.constant 0 : index
    %c0_14 = arith.constant 0 : index
    %10 = vector.load %arg2[%c0_10, %c0_11, %c1_12, %c0_13, %c0_14] : memref<1x3x9x2x128xf32, #tpu.memory_space<vmem>>, vector<1x1x1x2x128xf32>
    %11 = vector.shape_cast %10 : vector<1x1x1x2x128xf32> to vector<2x128xf32>
    %c0_15 = arith.constant 0 : index
    %c0_16 = arith.constant 0 : index
    %c2 = arith.constant 2 : index
    %c0_17 = arith.constant 0 : index
    %c0_18 = arith.constant 0 : index
    %12 = vector.load %arg2[%c0_15, %c0_16, %c2, %c0_17, %c0_18] : memref<1x3x9x2x128xf32, #tpu.memory_space<vmem>>, vector<1x1x1x2x128xf32>
    %13 = vector.shape_cast %12 : vector<1x1x1x2x128xf32> to vector<2x128xf32>
    %c0_19 = arith.constant 0 : index
    %c0_20 = arith.constant 0 : index
    %c3 = arith.constant 3 : index
    %c0_21 = arith.constant 0 : index
    %c0_22 = arith.constant 0 : index
    %14 = vector.load %arg2[%c0_19, %c0_20, %c3, %c0_21, %c0_22] : memref<1x3x9x2x128xf32, #tpu.memory_space<vmem>>, vector<1x1x1x2x128xf32>
    %15 = vector.shape_cast %14 : vector<1x1x1x2x128xf32> to vector<2x128xf32>
    %c0_23 = arith.constant 0 : index
    %c0_24 = arith.constant 0 : index
    %c4 = arith.constant 4 : index
    %c0_25 = arith.constant 0 : index
    %c0_26 = arith.constant 0 : index
    %16 = vector.load %arg2[%c0_23, %c0_24, %c4, %c0_25, %c0_26] : memref<1x3x9x2x128xf32, #tpu.memory_space<vmem>>, vector<1x1x1x2x128xf32>
    %17 = vector.shape_cast %16 : vector<1x1x1x2x128xf32> to vector<2x128xf32>
    %cst_27 = arith.constant 0.000000e+00 : f32
    %18 = vector.broadcast %cst_27 : f32 to vector<2x128xf32>
    %19 = arith.subf %18, %9 : vector<2x128xf32>
    %20 = math.exp %19 : vector<2x128xf32>
    %cst_28 = arith.constant 1.000000e+00 : f32
    %21 = vector.broadcast %cst_28 : f32 to vector<2x128xf32>
    %22 = arith.addf %21, %20 : vector<2x128xf32>
    %23 = tpu.reciprocal %22 {approx = true} : vector<2x128xf32> -> vector<2x128xf32>
    %cst_29 = arith.constant 0.000000e+00 : f32
    %24 = vector.broadcast %cst_29 : f32 to vector<2x128xf32>
    %25 = arith.subf %24, %11 : vector<2x128xf32>
    %26 = math.exp %25 : vector<2x128xf32>
    %cst_30 = arith.constant 1.000000e+00 : f32
    %27 = vector.broadcast %cst_30 : f32 to vector<2x128xf32>
    %28 = arith.addf %27, %26 : vector<2x128xf32>
    %29 = tpu.reciprocal %28 {approx = true} : vector<2x128xf32> -> vector<2x128xf32>
    %30 = arith.addf %23, %1 : vector<2x128xf32>
    %31 = arith.addf %29, %3 : vector<2x128xf32>
    %32 = math.exp %13 : vector<2x128xf32>
    %cst_31 = arith.constant 1.000000e+00 : f32
    %33 = vector.broadcast %cst_31 : f32 to vector<2x128xf32>
    %34 = arith.mulf %32, %33 : vector<2x128xf32>
    %35 = math.exp %15 : vector<2x128xf32>
    %cst_32 = arith.constant 1.000000e+00 : f32
    %36 = vector.broadcast %cst_32 : f32 to vector<2x128xf32>
    %37 = arith.mulf %35, %36 : vector<2x128xf32>
    %cst_33 = arith.constant 5.000000e-01 : f32
    %38 = vector.broadcast %cst_33 : f32 to vector<2x128xf32>
    %39 = arith.mulf %38, %34 : vector<2x128xf32>
    %40 = arith.subf %30, %39 : vector<2x128xf32>
    %cst_34 = arith.constant 5.000000e-01 : f32
    %41 = vector.broadcast %cst_34 : f32 to vector<2x128xf32>
    %42 = arith.mulf %41, %34 : vector<2x128xf32>
    %43 = arith.addf %30, %42 : vector<2x128xf32>
    %cst_35 = arith.constant 5.000000e-01 : f32
    %44 = vector.broadcast %cst_35 : f32 to vector<2x128xf32>
    %45 = arith.mulf %44, %37 : vector<2x128xf32>
    %46 = arith.subf %31, %45 : vector<2x128xf32>
    %cst_36 = arith.constant 5.000000e-01 : f32
    %47 = vector.broadcast %cst_36 : f32 to vector<2x128xf32>
    %48 = arith.mulf %47, %37 : vector<2x128xf32>
    %49 = arith.addf %31, %48 : vector<2x128xf32>
    %50 = arith.mulf %34, %37 : vector<2x128xf32>
    %cst_37 = arith.constant 0.000000e+00 : f32
    %51 = vector.broadcast %cst_37 : f32 to vector<2x128xf32>
    %c0_i32_38 = arith.constant 0 : i32
    %c4_i32 = arith.constant 4 : i32
    %52 = arith.muli %c4_i32, %c0_i32_38 : i32
    %53 = arith.index_cast %7 : i32 to index
    %54 = arith.index_cast %52 : i32 to index
    %55 = memref.load %arg1[%53, %54] : memref<2x32xf32, #tpu.memory_space<smem>>
    %c1_i32_39 = arith.constant 1 : i32
    %56 = arith.addi %52, %c1_i32_39 : i32
    %57 = arith.index_cast %7 : i32 to index
    %58 = arith.index_cast %56 : i32 to index
    %59 = memref.load %arg1[%57, %58] : memref<2x32xf32, #tpu.memory_space<smem>>
    %c2_i32 = arith.constant 2 : i32
    %60 = arith.addi %52, %c2_i32 : i32
    %61 = arith.index_cast %7 : i32 to index
    %62 = arith.index_cast %60 : i32 to index
    %63 = memref.load %arg1[%61, %62] : memref<2x32xf32, #tpu.memory_space<smem>>
    %c3_i32 = arith.constant 3 : i32
    %64 = arith.addi %52, %c3_i32 : i32
    %65 = arith.index_cast %7 : i32 to index
    %66 = arith.index_cast %64 : i32 to index
    %67 = memref.load %arg1[%65, %66] : memref<2x32xf32, #tpu.memory_space<smem>>
    %cst_40 = arith.constant 5.000000e-01 : f32
    %68 = arith.mulf %cst_40, %63 : f32
    %69 = arith.subf %55, %68 : f32
    %cst_41 = arith.constant 5.000000e-01 : f32
    %70 = arith.mulf %cst_41, %63 : f32
    %71 = arith.addf %55, %70 : f32
    %cst_42 = arith.constant 5.000000e-01 : f32
    %72 = arith.mulf %cst_42, %67 : f32
    %73 = arith.subf %59, %72 : f32
    %cst_43 = arith.constant 5.000000e-01 : f32
    %74 = arith.mulf %cst_43, %67 : f32
    %75 = arith.addf %59, %74 : f32
    %76 = vector.broadcast %71 : f32 to vector<2x128xf32>
    %77 = arith.minimumf %76, %43 : vector<2x128xf32>
    %78 = vector.broadcast %69 : f32 to vector<2x128xf32>
    %79 = arith.maximumf %78, %40 : vector<2x128xf32>
    %80 = arith.subf %77, %79 : vector<2x128xf32>
    %cst_44 = arith.constant 0.000000e+00 : f32
    %81 = vector.broadcast %cst_44 : f32 to vector<2x128xf32>
    %82 = arith.maximumf %80, %81 : vector<2x128xf32>
    %83 = vector.broadcast %75 : f32 to vector<2x128xf32>
    %84 = arith.minimumf %83, %49 : vector<2x128xf32>
    %85 = vector.broadcast %73 : f32 to vector<2x128xf32>
    %86 = arith.maximumf %85, %46 : vector<2x128xf32>
    %87 = arith.subf %84, %86 : vector<2x128xf32>
    %cst_45 = arith.constant 0.000000e+00 : f32
    %88 = vector.broadcast %cst_45 : f32 to vector<2x128xf32>
    %89 = arith.maximumf %87, %88 : vector<2x128xf32>
    %90 = arith.mulf %82, %89 : vector<2x128xf32>
    %91 = arith.mulf %63, %67 : f32
    %92 = vector.broadcast %91 : f32 to vector<2x128xf32>
    %93 = arith.addf %92, %50 : vector<2x128xf32>
    %94 = arith.subf %93, %90 : vector<2x128xf32>
    %cst_46 = arith.constant 5.000000e-01 : f32
    %95 = vector.broadcast %cst_46 : f32 to vector<2x128xf32>
    %96 = arith.mulf %95, %94 : vector<2x128xf32>
    %97 = arith.subf %90, %96 : vector<2x128xf32>
    %98 = arith.maximumf %51, %97 : vector<2x128xf32>
    %c1_i32_47 = arith.constant 1 : i32
    %c4_i32_48 = arith.constant 4 : i32
    %99 = arith.muli %c4_i32_48, %c1_i32_47 : i32
    %100 = arith.index_cast %7 : i32 to index
    %101 = arith.index_cast %99 : i32 to index
    %102 = memref.load %arg1[%100, %101] : memref<2x32xf32, #tpu.memory_space<smem>>
    %c1_i32_49 = arith.constant 1 : i32
    %103 = arith.addi %99, %c1_i32_49 : i32
    %104 = arith.index_cast %7 : i32 to index
    %105 = arith.index_cast %103 : i32 to index
    %106 = memref.load %arg1[%104, %105] : memref<2x32xf32, #tpu.memory_space<smem>>
    %c2_i32_50 = arith.constant 2 : i32
    %107 = arith.addi %99, %c2_i32_50 : i32
    %108 = arith.index_cast %7 : i32 to index
    %109 = arith.index_cast %107 : i32 to index
    %110 = memref.load %arg1[%108, %109] : memref<2x32xf32, #tpu.memory_space<smem>>
    %c3_i32_51 = arith.constant 3 : i32
    %111 = arith.addi %99, %c3_i32_51 : i32
    %112 = arith.index_cast %7 : i32 to index
    %113 = arith.index_cast %111 : i32 to index
    %114 = memref.load %arg1[%112, %113] : memref<2x32xf32, #tpu.memory_space<smem>>
    %cst_52 = arith.constant 5.000000e-01 : f32
    %115 = arith.mulf %cst_52, %110 : f32
    %116 = arith.subf %102, %115 : f32
    %cst_53 = arith.constant 5.000000e-01 : f32
    %117 = arith.mulf %cst_53, %110 : f32
    %118 = arith.addf %102, %117 : f32
    %cst_54 = arith.constant 5.000000e-01 : f32
    %119 = arith.mulf %cst_54, %114 : f32
    %120 = arith.subf %106, %119 : f32
    %cst_55 = arith.constant 5.000000e-01 : f32
    %121 = arith.mulf %cst_55, %114 : f32
    %122 = arith.addf %106, %121 : f32
    %123 = vector.broadcast %118 : f32 to vector<2x128xf32>
    %124 = arith.minimumf %123, %43 : vector<2x128xf32>
    %125 = vector.broadcast %116 : f32 to vector<2x128xf32>
    %126 = arith.maximumf %125, %40 : vector<2x128xf32>
    %127 = arith.subf %124, %126 : vector<2x128xf32>
    %cst_56 = arith.constant 0.000000e+00 : f32
    %128 = vector.broadcast %cst_56 : f32 to vector<2x128xf32>
    %129 = arith.maximumf %127, %128 : vector<2x128xf32>
    %130 = vector.broadcast %122 : f32 to vector<2x128xf32>
    %131 = arith.minimumf %130, %49 : vector<2x128xf32>
    %132 = vector.broadcast %120 : f32 to vector<2x128xf32>
    %133 = arith.maximumf %132, %46 : vector<2x128xf32>
    %134 = arith.subf %131, %133 : vector<2x128xf32>
    %cst_57 = arith.constant 0.000000e+00 : f32
    %135 = vector.broadcast %cst_57 : f32 to vector<2x128xf32>
    %136 = arith.maximumf %134, %135 : vector<2x128xf32>
    %137 = arith.mulf %129, %136 : vector<2x128xf32>
    %138 = arith.mulf %110, %114 : f32
    %139 = vector.broadcast %138 : f32 to vector<2x128xf32>
    %140 = arith.addf %139, %50 : vector<2x128xf32>
    %141 = arith.subf %140, %137 : vector<2x128xf32>
    %cst_58 = arith.constant 5.000000e-01 : f32
    %142 = vector.broadcast %cst_58 : f32 to vector<2x128xf32>
    %143 = arith.mulf %142, %141 : vector<2x128xf32>
    %144 = arith.subf %137, %143 : vector<2x128xf32>
    %145 = arith.maximumf %98, %144 : vector<2x128xf32>
    %c2_i32_59 = arith.constant 2 : i32
    %c4_i32_60 = arith.constant 4 : i32
    %146 = arith.muli %c4_i32_60, %c2_i32_59 : i32
    %147 = arith.index_cast %7 : i32 to index
    %148 = arith.index_cast %146 : i32 to index
    %149 = memref.load %arg1[%147, %148] : memref<2x32xf32, #tpu.memory_space<smem>>
    %c1_i32_61 = arith.constant 1 : i32
    %150 = arith.addi %146, %c1_i32_61 : i32
    %151 = arith.index_cast %7 : i32 to index
    %152 = arith.index_cast %150 : i32 to index
    %153 = memref.load %arg1[%151, %152] : memref<2x32xf32, #tpu.memory_space<smem>>
    %c2_i32_62 = arith.constant 2 : i32
    %154 = arith.addi %146, %c2_i32_62 : i32
    %155 = arith.index_cast %7 : i32 to index
    %156 = arith.index_cast %154 : i32 to index
    %157 = memref.load %arg1[%155, %156] : memref<2x32xf32, #tpu.memory_space<smem>>
    %c3_i32_63 = arith.constant 3 : i32
    %158 = arith.addi %146, %c3_i32_63 : i32
    %159 = arith.index_cast %7 : i32 to index
    %160 = arith.index_cast %158 : i32 to index
    %161 = memref.load %arg1[%159, %160] : memref<2x32xf32, #tpu.memory_space<smem>>
    %cst_64 = arith.constant 5.000000e-01 : f32
    %162 = arith.mulf %cst_64, %157 : f32
    %163 = arith.subf %149, %162 : f32
    %cst_65 = arith.constant 5.000000e-01 : f32
    %164 = arith.mulf %cst_65, %157 : f32
    %165 = arith.addf %149, %164 : f32
    %cst_66 = arith.constant 5.000000e-01 : f32
    %166 = arith.mulf %cst_66, %161 : f32
    %167 = arith.subf %153, %166 : f32
    %cst_67 = arith.constant 5.000000e-01 : f32
    %168 = arith.mulf %cst_67, %161 : f32
    %169 = arith.addf %153, %168 : f32
    %170 = vector.broadcast %165 : f32 to vector<2x128xf32>
    %171 = arith.minimumf %170, %43 : vector<2x128xf32>
    %172 = vector.broadcast %163 : f32 to vector<2x128xf32>
    %173 = arith.maximumf %172, %40 : vector<2x128xf32>
    %174 = arith.subf %171, %173 : vector<2x128xf32>
    %cst_68 = arith.constant 0.000000e+00 : f32
    %175 = vector.broadcast %cst_68 : f32 to vector<2x128xf32>
    %176 = arith.maximumf %174, %175 : vector<2x128xf32>
    %177 = vector.broadcast %169 : f32 to vector<2x128xf32>
    %178 = arith.minimumf %177, %49 : vector<2x128xf32>
    %179 = vector.broadcast %167 : f32 to vector<2x128xf32>
    %180 = arith.maximumf %179, %46 : vector<2x128xf32>
    %181 = arith.subf %178, %180 : vector<2x128xf32>
    %cst_69 = arith.constant 0.000000e+00 : f32
    %182 = vector.broadcast %cst_69 : f32 to vector<2x128xf32>
    %183 = arith.maximumf %181, %182 : vector<2x128xf32>
    %184 = arith.mulf %176, %183 : vector<2x128xf32>
    %185 = arith.mulf %157, %161 : f32
    %186 = vector.broadcast %185 : f32 to vector<2x128xf32>
    %187 = arith.addf %186, %50 : vector<2x128xf32>
    %188 = arith.subf %187, %184 : vector<2x128xf32>
    %cst_70 = arith.constant 5.000000e-01 : f32
    %189 = vector.broadcast %cst_70 : f32 to vector<2x128xf32>
    %190 = arith.mulf %189, %188 : vector<2x128xf32>
    %191 = arith.subf %184, %190 : vector<2x128xf32>
    %192 = arith.maximumf %145, %191 : vector<2x128xf32>
    %c3_i32_71 = arith.constant 3 : i32
    %c4_i32_72 = arith.constant 4 : i32
    %193 = arith.muli %c4_i32_72, %c3_i32_71 : i32
    %194 = arith.index_cast %7 : i32 to index
    %195 = arith.index_cast %193 : i32 to index
    %196 = memref.load %arg1[%194, %195] : memref<2x32xf32, #tpu.memory_space<smem>>
    %c1_i32_73 = arith.constant 1 : i32
    %197 = arith.addi %193, %c1_i32_73 : i32
    %198 = arith.index_cast %7 : i32 to index
    %199 = arith.index_cast %197 : i32 to index
    %200 = memref.load %arg1[%198, %199] : memref<2x32xf32, #tpu.memory_space<smem>>
    %c2_i32_74 = arith.constant 2 : i32
    %201 = arith.addi %193, %c2_i32_74 : i32
    %202 = arith.index_cast %7 : i32 to index
    %203 = arith.index_cast %201 : i32 to index
    %204 = memref.load %arg1[%202, %203] : memref<2x32xf32, #tpu.memory_space<smem>>
    %c3_i32_75 = arith.constant 3 : i32
    %205 = arith.addi %193, %c3_i32_75 : i32
    %206 = arith.index_cast %7 : i32 to index
    %207 = arith.index_cast %205 : i32 to index
    %208 = memref.load %arg1[%206, %207] : memref<2x32xf32, #tpu.memory_space<smem>>
    %cst_76 = arith.constant 5.000000e-01 : f32
    %209 = arith.mulf %cst_76, %204 : f32
    %210 = arith.subf %196, %209 : f32
    %cst_77 = arith.constant 5.000000e-01 : f32
    %211 = arith.mulf %cst_77, %204 : f32
    %212 = arith.addf %196, %211 : f32
    %cst_78 = arith.constant 5.000000e-01 : f32
    %213 = arith.mulf %cst_78, %208 : f32
    %214 = arith.subf %200, %213 : f32
    %cst_79 = arith.constant 5.000000e-01 : f32
    %215 = arith.mulf %cst_79, %208 : f32
    %216 = arith.addf %200, %215 : f32
    %217 = vector.broadcast %212 : f32 to vector<2x128xf32>
    %218 = arith.minimumf %217, %43 : vector<2x128xf32>
    %219 = vector.broadcast %210 : f32 to vector<2x128xf32>
    %220 = arith.maximumf %219, %40 : vector<2x128xf32>
    %221 = arith.subf %218, %220 : vector<2x128xf32>
    %cst_80 = arith.constant 0.000000e+00 : f32
    %222 = vector.broadcast %cst_80 : f32 to vector<2x128xf32>
    %223 = arith.maximumf %221, %222 : vector<2x128xf32>
    %224 = vector.broadcast %216 : f32 to vector<2x128xf32>
    %225 = arith.minimumf %224, %49 : vector<2x128xf32>
    %226 = vector.broadcast %214 : f32 to vector<2x128xf32>
    %227 = arith.maximumf %226, %46 : vector<2x128xf32>
    %228 = arith.subf %225, %227 : vector<2x128xf32>
    %cst_81 = arith.constant 0.000000e+00 : f32
    %229 = vector.broadcast %cst_81 : f32 to vector<2x128xf32>
    %230 = arith.maximumf %228, %229 : vector<2x128xf32>
    %231 = arith.mulf %223, %230 : vector<2x128xf32>
    %232 = arith.mulf %204, %208 : f32
    %233 = vector.broadcast %232 : f32 to vector<2x128xf32>
    %234 = arith.addf %233, %50 : vector<2x128xf32>
    %235 = arith.subf %234, %231 : vector<2x128xf32>
    %cst_82 = arith.constant 5.000000e-01 : f32
    %236 = vector.broadcast %cst_82 : f32 to vector<2x128xf32>
    %237 = arith.mulf %236, %235 : vector<2x128xf32>
    %238 = arith.subf %231, %237 : vector<2x128xf32>
    %239 = arith.maximumf %192, %238 : vector<2x128xf32>
    %c4_i32_83 = arith.constant 4 : i32
    %c4_i32_84 = arith.constant 4 : i32
    %240 = arith.muli %c4_i32_84, %c4_i32_83 : i32
    %241 = arith.index_cast %7 : i32 to index
    %242 = arith.index_cast %240 : i32 to index
    %243 = memref.load %arg1[%241, %242] : memref<2x32xf32, #tpu.memory_space<smem>>
    %c1_i32_85 = arith.constant 1 : i32
    %244 = arith.addi %240, %c1_i32_85 : i32
    %245 = arith.index_cast %7 : i32 to index
    %246 = arith.index_cast %244 : i32 to index
    %247 = memref.load %arg1[%245, %246] : memref<2x32xf32, #tpu.memory_space<smem>>
    %c2_i32_86 = arith.constant 2 : i32
    %248 = arith.addi %240, %c2_i32_86 : i32
    %249 = arith.index_cast %7 : i32 to index
    %250 = arith.index_cast %248 : i32 to index
    %251 = memref.load %arg1[%249, %250] : memref<2x32xf32, #tpu.memory_space<smem>>
    %c3_i32_87 = arith.constant 3 : i32
    %252 = arith.addi %240, %c3_i32_87 : i32
    %253 = arith.index_cast %7 : i32 to index
    %254 = arith.index_cast %252 : i32 to index
    %255 = memref.load %arg1[%253, %254] : memref<2x32xf32, #tpu.memory_space<smem>>
    %cst_88 = arith.constant 5.000000e-01 : f32
    %256 = arith.mulf %cst_88, %251 : f32
    %257 = arith.subf %243, %256 : f32
    %cst_89 = arith.constant 5.000000e-01 : f32
    %258 = arith.mulf %cst_89, %251 : f32
    %259 = arith.addf %243, %258 : f32
    %cst_90 = arith.constant 5.000000e-01 : f32
    %260 = arith.mulf %cst_90, %255 : f32
    %261 = arith.subf %247, %260 : f32
    %cst_91 = arith.constant 5.000000e-01 : f32
    %262 = arith.mulf %cst_91, %255 : f32
    %263 = arith.addf %247, %262 : f32
    %264 = vector.broadcast %259 : f32 to vector<2x128xf32>
    %265 = arith.minimumf %264, %43 : vector<2x128xf32>
    %266 = vector.broadcast %257 : f32 to vector<2x128xf32>
    %267 = arith.maximumf %266, %40 : vector<2x128xf32>
    %268 = arith.subf %265, %267 : vector<2x128xf32>
    %cst_92 = arith.constant 0.000000e+00 : f32
    %269 = vector.broadcast %cst_92 : f32 to vector<2x128xf32>
    %270 = arith.maximumf %268, %269 : vector<2x128xf32>
    %271 = vector.broadcast %263 : f32 to vector<2x128xf32>
    %272 = arith.minimumf %271, %49 : vector<2x128xf32>
    %273 = vector.broadcast %261 : f32 to vector<2x128xf32>
    %274 = arith.maximumf %273, %46 : vector<2x128xf32>
    %275 = arith.subf %272, %274 : vector<2x128xf32>
    %cst_93 = arith.constant 0.000000e+00 : f32
    %276 = vector.broadcast %cst_93 : f32 to vector<2x128xf32>
    %277 = arith.maximumf %275, %276 : vector<2x128xf32>
    %278 = arith.mulf %270, %277 : vector<2x128xf32>
    %279 = arith.mulf %251, %255 : f32
    %280 = vector.broadcast %279 : f32 to vector<2x128xf32>
    %281 = arith.addf %280, %50 : vector<2x128xf32>
    %282 = arith.subf %281, %278 : vector<2x128xf32>
    %cst_94 = arith.constant 5.000000e-01 : f32
    %283 = vector.broadcast %cst_94 : f32 to vector<2x128xf32>
    %284 = arith.mulf %283, %282 : vector<2x128xf32>
    %285 = arith.subf %278, %284 : vector<2x128xf32>
    %286 = arith.maximumf %239, %285 : vector<2x128xf32>
    %c5_i32 = arith.constant 5 : i32
    %c4_i32_95 = arith.constant 4 : i32
    %287 = arith.muli %c4_i32_95, %c5_i32 : i32
    %288 = arith.index_cast %7 : i32 to index
    %289 = arith.index_cast %287 : i32 to index
    %290 = memref.load %arg1[%288, %289] : memref<2x32xf32, #tpu.memory_space<smem>>
    %c1_i32_96 = arith.constant 1 : i32
    %291 = arith.addi %287, %c1_i32_96 : i32
    %292 = arith.index_cast %7 : i32 to index
    %293 = arith.index_cast %291 : i32 to index
    %294 = memref.load %arg1[%292, %293] : memref<2x32xf32, #tpu.memory_space<smem>>
    %c2_i32_97 = arith.constant 2 : i32
    %295 = arith.addi %287, %c2_i32_97 : i32
    %296 = arith.index_cast %7 : i32 to index
    %297 = arith.index_cast %295 : i32 to index
    %298 = memref.load %arg1[%296, %297] : memref<2x32xf32, #tpu.memory_space<smem>>
    %c3_i32_98 = arith.constant 3 : i32
    %299 = arith.addi %287, %c3_i32_98 : i32
    %300 = arith.index_cast %7 : i32 to index
    %301 = arith.index_cast %299 : i32 to index
    %302 = memref.load %arg1[%300, %301] : memref<2x32xf32, #tpu.memory_space<smem>>
    %cst_99 = arith.constant 5.000000e-01 : f32
    %303 = arith.mulf %cst_99, %298 : f32
    %304 = arith.subf %290, %303 : f32
    %cst_100 = arith.constant 5.000000e-01 : f32
    %305 = arith.mulf %cst_100, %298 : f32
    %306 = arith.addf %290, %305 : f32
    %cst_101 = arith.constant 5.000000e-01 : f32
    %307 = arith.mulf %cst_101, %302 : f32
    %308 = arith.subf %294, %307 : f32
    %cst_102 = arith.constant 5.000000e-01 : f32
    %309 = arith.mulf %cst_102, %302 : f32
    %310 = arith.addf %294, %309 : f32
    %311 = vector.broadcast %306 : f32 to vector<2x128xf32>
    %312 = arith.minimumf %311, %43 : vector<2x128xf32>
    %313 = vector.broadcast %304 : f32 to vector<2x128xf32>
    %314 = arith.maximumf %313, %40 : vector<2x128xf32>
    %315 = arith.subf %312, %314 : vector<2x128xf32>
    %cst_103 = arith.constant 0.000000e+00 : f32
    %316 = vector.broadcast %cst_103 : f32 to vector<2x128xf32>
    %317 = arith.maximumf %315, %316 : vector<2x128xf32>
    %318 = vector.broadcast %310 : f32 to vector<2x128xf32>
    %319 = arith.minimumf %318, %49 : vector<2x128xf32>
    %320 = vector.broadcast %308 : f32 to vector<2x128xf32>
    %321 = arith.maximumf %320, %46 : vector<2x128xf32>
    %322 = arith.subf %319, %321 : vector<2x128xf32>
    %cst_104 = arith.constant 0.000000e+00 : f32
    %323 = vector.broadcast %cst_104 : f32 to vector<2x128xf32>
    %324 = arith.maximumf %322, %323 : vector<2x128xf32>
    %325 = arith.mulf %317, %324 : vector<2x128xf32>
    %326 = arith.mulf %298, %302 : f32
    %327 = vector.broadcast %326 : f32 to vector<2x128xf32>
    %328 = arith.addf %327, %50 : vector<2x128xf32>
    %329 = arith.subf %328, %325 : vector<2x128xf32>
    %cst_105 = arith.constant 5.000000e-01 : f32
    %330 = vector.broadcast %cst_105 : f32 to vector<2x128xf32>
    %331 = arith.mulf %330, %329 : vector<2x128xf32>
    %332 = arith.subf %325, %331 : vector<2x128xf32>
    %333 = arith.maximumf %286, %332 : vector<2x128xf32>
    %c6_i32 = arith.constant 6 : i32
    %c4_i32_106 = arith.constant 4 : i32
    %334 = arith.muli %c4_i32_106, %c6_i32 : i32
    %335 = arith.index_cast %7 : i32 to index
    %336 = arith.index_cast %334 : i32 to index
    %337 = memref.load %arg1[%335, %336] : memref<2x32xf32, #tpu.memory_space<smem>>
    %c1_i32_107 = arith.constant 1 : i32
    %338 = arith.addi %334, %c1_i32_107 : i32
    %339 = arith.index_cast %7 : i32 to index
    %340 = arith.index_cast %338 : i32 to index
    %341 = memref.load %arg1[%339, %340] : memref<2x32xf32, #tpu.memory_space<smem>>
    %c2_i32_108 = arith.constant 2 : i32
    %342 = arith.addi %334, %c2_i32_108 : i32
    %343 = arith.index_cast %7 : i32 to index
    %344 = arith.index_cast %342 : i32 to index
    %345 = memref.load %arg1[%343, %344] : memref<2x32xf32, #tpu.memory_space<smem>>
    %c3_i32_109 = arith.constant 3 : i32
    %346 = arith.addi %334, %c3_i32_109 : i32
    %347 = arith.index_cast %7 : i32 to index
    %348 = arith.index_cast %346 : i32 to index
    %349 = memref.load %arg1[%347, %348] : memref<2x32xf32, #tpu.memory_space<smem>>
    %cst_110 = arith.constant 5.000000e-01 : f32
    %350 = arith.mulf %cst_110, %345 : f32
    %351 = arith.subf %337, %350 : f32
    %cst_111 = arith.constant 5.000000e-01 : f32
    %352 = arith.mulf %cst_111, %345 : f32
    %353 = arith.addf %337, %352 : f32
    %cst_112 = arith.constant 5.000000e-01 : f32
    %354 = arith.mulf %cst_112, %349 : f32
    %355 = arith.subf %341, %354 : f32
    %cst_113 = arith.constant 5.000000e-01 : f32
    %356 = arith.mulf %cst_113, %349 : f32
    %357 = arith.addf %341, %356 : f32
    %358 = vector.broadcast %353 : f32 to vector<2x128xf32>
    %359 = arith.minimumf %358, %43 : vector<2x128xf32>
    %360 = vector.broadcast %351 : f32 to vector<2x128xf32>
    %361 = arith.maximumf %360, %40 : vector<2x128xf32>
    %362 = arith.subf %359, %361 : vector<2x128xf32>
    %cst_114 = arith.constant 0.000000e+00 : f32
    %363 = vector.broadcast %cst_114 : f32 to vector<2x128xf32>
    %364 = arith.maximumf %362, %363 : vector<2x128xf32>
    %365 = vector.broadcast %357 : f32 to vector<2x128xf32>
    %366 = arith.minimumf %365, %49 : vector<2x128xf32>
    %367 = vector.broadcast %355 : f32 to vector<2x128xf32>
    %368 = arith.maximumf %367, %46 : vector<2x128xf32>
    %369 = arith.subf %366, %368 : vector<2x128xf32>
    %cst_115 = arith.constant 0.000000e+00 : f32
    %370 = vector.broadcast %cst_115 : f32 to vector<2x128xf32>
    %371 = arith.maximumf %369, %370 : vector<2x128xf32>
    %372 = arith.mulf %364, %371 : vector<2x128xf32>
    %373 = arith.mulf %345, %349 : f32
    %374 = vector.broadcast %373 : f32 to vector<2x128xf32>
    %375 = arith.addf %374, %50 : vector<2x128xf32>
    %376 = arith.subf %375, %372 : vector<2x128xf32>
    %cst_116 = arith.constant 5.000000e-01 : f32
    %377 = vector.broadcast %cst_116 : f32 to vector<2x128xf32>
    %378 = arith.mulf %377, %376 : vector<2x128xf32>
    %379 = arith.subf %372, %378 : vector<2x128xf32>
    %380 = arith.maximumf %333, %379 : vector<2x128xf32>
    %c7_i32 = arith.constant 7 : i32
    %c4_i32_117 = arith.constant 4 : i32
    %381 = arith.muli %c4_i32_117, %c7_i32 : i32
    %382 = arith.index_cast %7 : i32 to index
    %383 = arith.index_cast %381 : i32 to index
    %384 = memref.load %arg1[%382, %383] : memref<2x32xf32, #tpu.memory_space<smem>>
    %c1_i32_118 = arith.constant 1 : i32
    %385 = arith.addi %381, %c1_i32_118 : i32
    %386 = arith.index_cast %7 : i32 to index
    %387 = arith.index_cast %385 : i32 to index
    %388 = memref.load %arg1[%386, %387] : memref<2x32xf32, #tpu.memory_space<smem>>
    %c2_i32_119 = arith.constant 2 : i32
    %389 = arith.addi %381, %c2_i32_119 : i32
    %390 = arith.index_cast %7 : i32 to index
    %391 = arith.index_cast %389 : i32 to index
    %392 = memref.load %arg1[%390, %391] : memref<2x32xf32, #tpu.memory_space<smem>>
    %c3_i32_120 = arith.constant 3 : i32
    %393 = arith.addi %381, %c3_i32_120 : i32
    %394 = arith.index_cast %7 : i32 to index
    %395 = arith.index_cast %393 : i32 to index
    %396 = memref.load %arg1[%394, %395] : memref<2x32xf32, #tpu.memory_space<smem>>
    %cst_121 = arith.constant 5.000000e-01 : f32
    %397 = arith.mulf %cst_121, %392 : f32
    %398 = arith.subf %384, %397 : f32
    %cst_122 = arith.constant 5.000000e-01 : f32
    %399 = arith.mulf %cst_122, %392 : f32
    %400 = arith.addf %384, %399 : f32
    %cst_123 = arith.constant 5.000000e-01 : f32
    %401 = arith.mulf %cst_123, %396 : f32
    %402 = arith.subf %388, %401 : f32
    %cst_124 = arith.constant 5.000000e-01 : f32
    %403 = arith.mulf %cst_124, %396 : f32
    %404 = arith.addf %388, %403 : f32
    %405 = vector.broadcast %400 : f32 to vector<2x128xf32>
    %406 = arith.minimumf %405, %43 : vector<2x128xf32>
    %407 = vector.broadcast %398 : f32 to vector<2x128xf32>
    %408 = arith.maximumf %407, %40 : vector<2x128xf32>
    %409 = arith.subf %406, %408 : vector<2x128xf32>
    %cst_125 = arith.constant 0.000000e+00 : f32
    %410 = vector.broadcast %cst_125 : f32 to vector<2x128xf32>
    %411 = arith.maximumf %409, %410 : vector<2x128xf32>
    %412 = vector.broadcast %404 : f32 to vector<2x128xf32>
    %413 = arith.minimumf %412, %49 : vector<2x128xf32>
    %414 = vector.broadcast %402 : f32 to vector<2x128xf32>
    %415 = arith.maximumf %414, %46 : vector<2x128xf32>
    %416 = arith.subf %413, %415 : vector<2x128xf32>
    %cst_126 = arith.constant 0.000000e+00 : f32
    %417 = vector.broadcast %cst_126 : f32 to vector<2x128xf32>
    %418 = arith.maximumf %416, %417 : vector<2x128xf32>
    %419 = arith.mulf %411, %418 : vector<2x128xf32>
    %420 = arith.mulf %392, %396 : f32
    %421 = vector.broadcast %420 : f32 to vector<2x128xf32>
    %422 = arith.addf %421, %50 : vector<2x128xf32>
    %423 = arith.subf %422, %419 : vector<2x128xf32>
    %cst_127 = arith.constant 5.000000e-01 : f32
    %424 = vector.broadcast %cst_127 : f32 to vector<2x128xf32>
    %425 = arith.mulf %424, %423 : vector<2x128xf32>
    %426 = arith.subf %419, %425 : vector<2x128xf32>
    %427 = arith.maximumf %380, %426 : vector<2x128xf32>
    %c8_i32 = arith.constant 8 : i32
    %cst_128 = arith.constant 0.000000e+00 : f32
    %428 = vector.broadcast %cst_128 : f32 to vector<2x128xf32>
    %429 = arith.cmpf ogt, %427, %428 : vector<2x128xf32>
    %c0_129 = arith.constant 0 : index
    %c0_130 = arith.constant 0 : index
    %c0_131 = arith.constant 0 : index
    %c0_132 = arith.constant 0 : index
    %430 = vector.load %arg4[%c0_129, %c0_130, %c0_131, %c0_132] : memref<1x3x2x128xbf16, #tpu.memory_space<vmem>>, vector<1x1x2x128xbf16>
    %431 = vector.shape_cast %430 : vector<1x1x2x128xbf16> to vector<2x128xbf16>
    %432 = arith.extf %431 : vector<2x128xbf16> to vector<2x128xf32>
    %cst_133 = arith.constant 0.000000e+00 : f32
    %433 = vector.broadcast %cst_133 : f32 to vector<2x128xf32>
    %434 = arith.select %429, %433, %432 : vector<2x128xi1>, vector<2x128xf32>
    %c0_134 = arith.constant 0 : index
    %c0_135 = arith.constant 0 : index
    %c4_136 = arith.constant 4 : index
    %c0_137 = arith.constant 0 : index
    %c0_138 = arith.constant 0 : index
    %435 = vector.load %arg3[%c0_134, %c0_135, %c4_136, %c0_137, %c0_138] : memref<1x3x9x2x128xbf16, #tpu.memory_space<vmem>>, vector<1x1x1x2x128xbf16>
    %436 = vector.shape_cast %435 : vector<1x1x1x2x128xbf16> to vector<2x128xbf16>
    %437 = arith.extf %436 : vector<2x128xbf16> to vector<2x128xf32>
    %c0_139 = arith.constant 0 : index
    %c0_140 = arith.constant 0 : index
    %c0_141 = arith.constant 0 : index
    %c0_142 = arith.constant 0 : index
    %438 = vector.load %arg5[%c0_139, %c0_140, %c0_141, %c0_142] : memref<1x3x2x128xbf16, #tpu.memory_space<vmem>>, vector<1x1x2x128xbf16>
    %439 = vector.shape_cast %438 : vector<1x1x2x128xbf16> to vector<2x128xbf16>
    %440 = arith.extf %439 : vector<2x128xbf16> to vector<2x128xf32>
    %cst_143 = arith.constant 2.000000e+00 : f32
    %441 = vector.broadcast %cst_143 : f32 to vector<2x128xf32>
    %442 = arith.subf %441, %440 : vector<2x128xf32>
    %443 = arith.mulf %442, %437 : vector<2x128xf32>
    %c0_144 = arith.constant 0 : index
    %c0_145 = arith.constant 0 : index
    %c0_146 = arith.constant 0 : index
    %c0_147 = arith.constant 0 : index
    %c0_148 = arith.constant 0 : index
    %444 = vector.load %arg3[%c0_144, %c0_145, %c0_146, %c0_147, %c0_148] : memref<1x3x9x2x128xbf16, #tpu.memory_space<vmem>>, vector<1x1x1x2x128xbf16>
    %445 = vector.shape_cast %444 : vector<1x1x1x2x128xbf16> to vector<2x128xbf16>
    %446 = arith.extf %445 : vector<2x128xbf16> to vector<2x128xf32>
    %447 = arith.subf %23, %446 : vector<2x128xf32>
    %448 = arith.mulf %447, %447 : vector<2x128xf32>
    %c0_149 = arith.constant 0 : index
    %c0_150 = arith.constant 0 : index
    %c1_151 = arith.constant 1 : index
    %c0_152 = arith.constant 0 : index
    %c0_153 = arith.constant 0 : index
    %449 = vector.load %arg3[%c0_149, %c0_150, %c1_151, %c0_152, %c0_153] : memref<1x3x9x2x128xbf16, #tpu.memory_space<vmem>>, vector<1x1x1x2x128xbf16>
    %450 = vector.shape_cast %449 : vector<1x1x1x2x128xbf16> to vector<2x128xbf16>
    %451 = arith.extf %450 : vector<2x128xbf16> to vector<2x128xf32>
    %452 = arith.subf %29, %451 : vector<2x128xf32>
    %453 = arith.mulf %452, %452 : vector<2x128xf32>
    %454 = arith.addf %448, %453 : vector<2x128xf32>
    %c0_154 = arith.constant 0 : index
    %c0_155 = arith.constant 0 : index
    %c2_156 = arith.constant 2 : index
    %c0_157 = arith.constant 0 : index
    %c0_158 = arith.constant 0 : index
    %455 = vector.load %arg3[%c0_154, %c0_155, %c2_156, %c0_157, %c0_158] : memref<1x3x9x2x128xbf16, #tpu.memory_space<vmem>>, vector<1x1x1x2x128xbf16>
    %456 = vector.shape_cast %455 : vector<1x1x1x2x128xbf16> to vector<2x128xbf16>
    %457 = arith.extf %456 : vector<2x128xbf16> to vector<2x128xf32>
    %458 = arith.subf %13, %457 : vector<2x128xf32>
    %459 = arith.mulf %458, %458 : vector<2x128xf32>
    %460 = arith.addf %454, %459 : vector<2x128xf32>
    %c0_159 = arith.constant 0 : index
    %c0_160 = arith.constant 0 : index
    %c3_161 = arith.constant 3 : index
    %c0_162 = arith.constant 0 : index
    %c0_163 = arith.constant 0 : index
    %461 = vector.load %arg3[%c0_159, %c0_160, %c3_161, %c0_162, %c0_163] : memref<1x3x9x2x128xbf16, #tpu.memory_space<vmem>>, vector<1x1x1x2x128xbf16>
    %462 = vector.shape_cast %461 : vector<1x1x1x2x128xbf16> to vector<2x128xbf16>
    %463 = arith.extf %462 : vector<2x128xbf16> to vector<2x128xf32>
    %464 = arith.subf %15, %463 : vector<2x128xf32>
    %465 = arith.mulf %464, %464 : vector<2x128xf32>
    %466 = arith.addf %460, %465 : vector<2x128xf32>
    %467 = arith.mulf %466, %443 : vector<2x128xf32>
    %cst_164 = arith.constant -16.1180954 : f32
    %cst_165 = arith.constant 16.1180954 : f32
    %468 = vector.broadcast %cst_164 : f32 to vector<2x128xf32>
    %469 = arith.maximumf %468, %17 : vector<2x128xf32>
    %470 = vector.broadcast %cst_165 : f32 to vector<2x128xf32>
    %471 = arith.minimumf %470, %469 : vector<2x128xf32>
    %cst_166 = arith.constant 0.000000e+00 : f32
    %472 = vector.broadcast %cst_166 : f32 to vector<2x128xf32>
    %473 = arith.maximumf %471, %472 : vector<2x128xf32>
    %474 = arith.mulf %471, %437 : vector<2x128xf32>
    %475 = arith.subf %473, %474 : vector<2x128xf32>
    %476 = math.absf %471 : vector<2x128xf32>
    %cst_167 = arith.constant 0.000000e+00 : f32
    %477 = vector.broadcast %cst_167 : f32 to vector<2x128xf32>
    %478 = arith.subf %477, %476 : vector<2x128xf32>
    %479 = math.exp %478 : vector<2x128xf32>
    %cst_168 = arith.constant 1.000000e+00 : f32
    %480 = vector.broadcast %cst_168 : f32 to vector<2x128xf32>
    %481 = arith.addf %480, %479 : vector<2x128xf32>
    %482 = math.log %481 : vector<2x128xf32>
    %483 = arith.addf %475, %482 : vector<2x128xf32>
    %484 = arith.addf %437, %434 : vector<2x128xf32>
    %485 = arith.mulf %483, %484 : vector<2x128xf32>
    %cst_169 = arith.constant 0.000000e+00 : f32
    %486 = vector.broadcast %cst_169 : f32 to vector<2x128xf32>
    %c0_i32_170 = arith.constant 0 : i32
    %c5_i32_171 = arith.constant 5 : i32
    %487 = arith.addi %c5_i32_171, %c0_i32_170 : i32
    %c0_172 = arith.constant 0 : index
    %c0_173 = arith.constant 0 : index
    %488 = arith.index_cast %487 : i32 to index
    %c0_174 = arith.constant 0 : index
    %c0_175 = arith.constant 0 : index
    %489 = vector.load %arg2[%c0_172, %c0_173, %488, %c0_174, %c0_175] : memref<1x3x9x2x128xf32, #tpu.memory_space<vmem>>, vector<1x1x1x2x128xf32>
    %490 = vector.shape_cast %489 : vector<1x1x1x2x128xf32> to vector<2x128xf32>
    %c5_i32_176 = arith.constant 5 : i32
    %491 = arith.addi %c5_i32_176, %c0_i32_170 : i32
    %c0_177 = arith.constant 0 : index
    %c0_178 = arith.constant 0 : index
    %492 = arith.index_cast %491 : i32 to index
    %c0_179 = arith.constant 0 : index
    %c0_180 = arith.constant 0 : index
    %493 = vector.load %arg3[%c0_177, %c0_178, %492, %c0_179, %c0_180] : memref<1x3x9x2x128xbf16, #tpu.memory_space<vmem>>, vector<1x1x1x2x128xbf16>
    %494 = vector.shape_cast %493 : vector<1x1x1x2x128xbf16> to vector<2x128xbf16>
    %495 = arith.extf %494 : vector<2x128xbf16> to vector<2x128xf32>
    %cst_181 = arith.constant 0.000000e+00 : f32
    %496 = vector.broadcast %cst_181 : f32 to vector<2x128xf32>
    %497 = arith.maximumf %490, %496 : vector<2x128xf32>
    %498 = arith.mulf %490, %495 : vector<2x128xf32>
    %499 = arith.subf %497, %498 : vector<2x128xf32>
    %500 = math.absf %490 : vector<2x128xf32>
    %cst_182 = arith.constant 0.000000e+00 : f32
    %501 = vector.broadcast %cst_182 : f32 to vector<2x128xf32>
    %502 = arith.subf %501, %500 : vector<2x128xf32>
    %503 = math.exp %502 : vector<2x128xf32>
    %cst_183 = arith.constant 1.000000e+00 : f32
    %504 = vector.broadcast %cst_183 : f32 to vector<2x128xf32>
    %505 = arith.addf %504, %503 : vector<2x128xf32>
    %506 = math.log %505 : vector<2x128xf32>
    %507 = arith.addf %499, %506 : vector<2x128xf32>
    %508 = arith.addf %486, %507 : vector<2x128xf32>
    %c1_i32_184 = arith.constant 1 : i32
    %c5_i32_185 = arith.constant 5 : i32
    %509 = arith.addi %c5_i32_185, %c1_i32_184 : i32
    %c0_186 = arith.constant 0 : index
    %c0_187 = arith.constant 0 : index
    %510 = arith.index_cast %509 : i32 to index
    %c0_188 = arith.constant 0 : index
    %c0_189 = arith.constant 0 : index
    %511 = vector.load %arg2[%c0_186, %c0_187, %510, %c0_188, %c0_189] : memref<1x3x9x2x128xf32, #tpu.memory_space<vmem>>, vector<1x1x1x2x128xf32>
    %512 = vector.shape_cast %511 : vector<1x1x1x2x128xf32> to vector<2x128xf32>
    %c5_i32_190 = arith.constant 5 : i32
    %513 = arith.addi %c5_i32_190, %c1_i32_184 : i32
    %c0_191 = arith.constant 0 : index
    %c0_192 = arith.constant 0 : index
    %514 = arith.index_cast %513 : i32 to index
    %c0_193 = arith.constant 0 : index
    %c0_194 = arith.constant 0 : index
    %515 = vector.load %arg3[%c0_191, %c0_192, %514, %c0_193, %c0_194] : memref<1x3x9x2x128xbf16, #tpu.memory_space<vmem>>, vector<1x1x1x2x128xbf16>
    %516 = vector.shape_cast %515 : vector<1x1x1x2x128xbf16> to vector<2x128xbf16>
    %517 = arith.extf %516 : vector<2x128xbf16> to vector<2x128xf32>
    %cst_195 = arith.constant 0.000000e+00 : f32
    %518 = vector.broadcast %cst_195 : f32 to vector<2x128xf32>
    %519 = arith.maximumf %512, %518 : vector<2x128xf32>
    %520 = arith.mulf %512, %517 : vector<2x128xf32>
    %521 = arith.subf %519, %520 : vector<2x128xf32>
    %522 = math.absf %512 : vector<2x128xf32>
    %cst_196 = arith.constant 0.000000e+00 : f32
    %523 = vector.broadcast %cst_196 : f32 to vector<2x128xf32>
    %524 = arith.subf %523, %522 : vector<2x128xf32>
    %525 = math.exp %524 : vector<2x128xf32>
    %cst_197 = arith.constant 1.000000e+00 : f32
    %526 = vector.broadcast %cst_197 : f32 to vector<2x128xf32>
    %527 = arith.addf %526, %525 : vector<2x128xf32>
    %528 = math.log %527 : vector<2x128xf32>
    %529 = arith.addf %521, %528 : vector<2x128xf32>
    %530 = arith.addf %508, %529 : vector<2x128xf32>
    %c2_i32_198 = arith.constant 2 : i32
    %c5_i32_199 = arith.constant 5 : i32
    %531 = arith.addi %c5_i32_199, %c2_i32_198 : i32
    %c0_200 = arith.constant 0 : index
    %c0_201 = arith.constant 0 : index
    %532 = arith.index_cast %531 : i32 to index
    %c0_202 = arith.constant 0 : index
    %c0_203 = arith.constant 0 : index
    %533 = vector.load %arg2[%c0_200, %c0_201, %532, %c0_202, %c0_203] : memref<1x3x9x2x128xf32, #tpu.memory_space<vmem>>, vector<1x1x1x2x128xf32>
    %534 = vector.shape_cast %533 : vector<1x1x1x2x128xf32> to vector<2x128xf32>
    %c5_i32_204 = arith.constant 5 : i32
    %535 = arith.addi %c5_i32_204, %c2_i32_198 : i32
    %c0_205 = arith.constant 0 : index
    %c0_206 = arith.constant 0 : index
    %536 = arith.index_cast %535 : i32 to index
    %c0_207 = arith.constant 0 : index
    %c0_208 = arith.constant 0 : index
    %537 = vector.load %arg3[%c0_205, %c0_206, %536, %c0_207, %c0_208] : memref<1x3x9x2x128xbf16, #tpu.memory_space<vmem>>, vector<1x1x1x2x128xbf16>
    %538 = vector.shape_cast %537 : vector<1x1x1x2x128xbf16> to vector<2x128xbf16>
    %539 = arith.extf %538 : vector<2x128xbf16> to vector<2x128xf32>
    %cst_209 = arith.constant 0.000000e+00 : f32
    %540 = vector.broadcast %cst_209 : f32 to vector<2x128xf32>
    %541 = arith.maximumf %534, %540 : vector<2x128xf32>
    %542 = arith.mulf %534, %539 : vector<2x128xf32>
    %543 = arith.subf %541, %542 : vector<2x128xf32>
    %544 = math.absf %534 : vector<2x128xf32>
    %cst_210 = arith.constant 0.000000e+00 : f32
    %545 = vector.broadcast %cst_210 : f32 to vector<2x128xf32>
    %546 = arith.subf %545, %544 : vector<2x128xf32>
    %547 = math.exp %546 : vector<2x128xf32>
    %cst_211 = arith.constant 1.000000e+00 : f32
    %548 = vector.broadcast %cst_211 : f32 to vector<2x128xf32>
    %549 = arith.addf %548, %547 : vector<2x128xf32>
    %550 = math.log %549 : vector<2x128xf32>
    %551 = arith.addf %543, %550 : vector<2x128xf32>
    %552 = arith.addf %530, %551 : vector<2x128xf32>
    %c3_i32_212 = arith.constant 3 : i32
    %c5_i32_213 = arith.constant 5 : i32
    %553 = arith.addi %c5_i32_213, %c3_i32_212 : i32
    %c0_214 = arith.constant 0 : index
    %c0_215 = arith.constant 0 : index
    %554 = arith.index_cast %553 : i32 to index
    %c0_216 = arith.constant 0 : index
    %c0_217 = arith.constant 0 : index
    %555 = vector.load %arg2[%c0_214, %c0_215, %554, %c0_216, %c0_217] : memref<1x3x9x2x128xf32, #tpu.memory_space<vmem>>, vector<1x1x1x2x128xf32>
    %556 = vector.shape_cast %555 : vector<1x1x1x2x128xf32> to vector<2x128xf32>
    %c5_i32_218 = arith.constant 5 : i32
    %557 = arith.addi %c5_i32_218, %c3_i32_212 : i32
    %c0_219 = arith.constant 0 : index
    %c0_220 = arith.constant 0 : index
    %558 = arith.index_cast %557 : i32 to index
    %c0_221 = arith.constant 0 : index
    %c0_222 = arith.constant 0 : index
    %559 = vector.load %arg3[%c0_219, %c0_220, %558, %c0_221, %c0_222] : memref<1x3x9x2x128xbf16, #tpu.memory_space<vmem>>, vector<1x1x1x2x128xbf16>
    %560 = vector.shape_cast %559 : vector<1x1x1x2x128xbf16> to vector<2x128xbf16>
    %561 = arith.extf %560 : vector<2x128xbf16> to vector<2x128xf32>
    %cst_223 = arith.constant 0.000000e+00 : f32
    %562 = vector.broadcast %cst_223 : f32 to vector<2x128xf32>
    %563 = arith.maximumf %556, %562 : vector<2x128xf32>
    %564 = arith.mulf %556, %561 : vector<2x128xf32>
    %565 = arith.subf %563, %564 : vector<2x128xf32>
    %566 = math.absf %556 : vector<2x128xf32>
    %cst_224 = arith.constant 0.000000e+00 : f32
    %567 = vector.broadcast %cst_224 : f32 to vector<2x128xf32>
    %568 = arith.subf %567, %566 : vector<2x128xf32>
    %569 = math.exp %568 : vector<2x128xf32>
    %cst_225 = arith.constant 1.000000e+00 : f32
    %570 = vector.broadcast %cst_225 : f32 to vector<2x128xf32>
    %571 = arith.addf %570, %569 : vector<2x128xf32>
    %572 = math.log %571 : vector<2x128xf32>
    %573 = arith.addf %565, %572 : vector<2x128xf32>
    %574 = arith.addf %552, %573 : vector<2x128xf32>
    %c4_i32_226 = arith.constant 4 : i32
    %575 = arith.addf %4, %467 : vector<2x128xf32>
    %576 = arith.addf %575, %485 : vector<2x128xf32>
    %577 = arith.mulf %574, %437 : vector<2x128xf32>
    %578 = arith.addf %576, %577 : vector<2x128xf32>
    %579 = arith.addf %5, %437 : vector<2x128xf32>
    %c0_227 = arith.constant 0 : index
    %c1_228 = arith.constant 1 : index
    %c0_229 = arith.constant 0 : index
    %c0_230 = arith.constant 0 : index
    %c0_231 = arith.constant 0 : index
    %580 = vector.load %arg2[%c0_227, %c1_228, %c0_229, %c0_230, %c0_231] : memref<1x3x9x2x128xf32, #tpu.memory_space<vmem>>, vector<1x1x1x2x128xf32>
    %581 = vector.shape_cast %580 : vector<1x1x1x2x128xf32> to vector<2x128xf32>
    %c0_232 = arith.constant 0 : index
    %c1_233 = arith.constant 1 : index
    %c1_234 = arith.constant 1 : index
    %c0_235 = arith.constant 0 : index
    %c0_236 = arith.constant 0 : index
    %582 = vector.load %arg2[%c0_232, %c1_233, %c1_234, %c0_235, %c0_236] : memref<1x3x9x2x128xf32, #tpu.memory_space<vmem>>, vector<1x1x1x2x128xf32>
    %583 = vector.shape_cast %582 : vector<1x1x1x2x128xf32> to vector<2x128xf32>
    %c0_237 = arith.constant 0 : index
    %c1_238 = arith.constant 1 : index
    %c2_239 = arith.constant 2 : index
    %c0_240 = arith.constant 0 : index
    %c0_241 = arith.constant 0 : index
    %584 = vector.load %arg2[%c0_237, %c1_238, %c2_239, %c0_240, %c0_241] : memref<1x3x9x2x128xf32, #tpu.memory_space<vmem>>, vector<1x1x1x2x128xf32>
    %585 = vector.shape_cast %584 : vector<1x1x1x2x128xf32> to vector<2x128xf32>
    %c0_242 = arith.constant 0 : index
    %c1_243 = arith.constant 1 : index
    %c3_244 = arith.constant 3 : index
    %c0_245 = arith.constant 0 : index
    %c0_246 = arith.constant 0 : index
    %586 = vector.load %arg2[%c0_242, %c1_243, %c3_244, %c0_245, %c0_246] : memref<1x3x9x2x128xf32, #tpu.memory_space<vmem>>, vector<1x1x1x2x128xf32>
    %587 = vector.shape_cast %586 : vector<1x1x1x2x128xf32> to vector<2x128xf32>
    %c0_247 = arith.constant 0 : index
    %c1_248 = arith.constant 1 : index
    %c4_249 = arith.constant 4 : index
    %c0_250 = arith.constant 0 : index
    %c0_251 = arith.constant 0 : index
    %588 = vector.load %arg2[%c0_247, %c1_248, %c4_249, %c0_250, %c0_251] : memref<1x3x9x2x128xf32, #tpu.memory_space<vmem>>, vector<1x1x1x2x128xf32>
    %589 = vector.shape_cast %588 : vector<1x1x1x2x128xf32> to vector<2x128xf32>
    %cst_252 = arith.constant 0.000000e+00 : f32
    %590 = vector.broadcast %cst_252 : f32 to vector<2x128xf32>
    %591 = arith.subf %590, %581 : vector<2x128xf32>
    %592 = math.exp %591 : vector<2x128xf32>
    %cst_253 = arith.constant 1.000000e+00 : f32
    %593 = vector.broadcast %cst_253 : f32 to vector<2x128xf32>
    %594 = arith.addf %593, %592 : vector<2x128xf32>
    %595 = tpu.reciprocal %594 {approx = true} : vector<2x128xf32> -> vector<2x128xf32>
    %cst_254 = arith.constant 0.000000e+00 : f32
    %596 = vector.broadcast %cst_254 : f32 to vector<2x128xf32>
    %597 = arith.subf %596, %583 : vector<2x128xf32>
    %598 = math.exp %597 : vector<2x128xf32>
    %cst_255 = arith.constant 1.000000e+00 : f32
    %599 = vector.broadcast %cst_255 : f32 to vector<2x128xf32>
    %600 = arith.addf %599, %598 : vector<2x128xf32>
    %601 = tpu.reciprocal %600 {approx = true} : vector<2x128xf32> -> vector<2x128xf32>
    %602 = arith.addf %595, %1 : vector<2x128xf32>
    %603 = arith.addf %601, %3 : vector<2x128xf32>
    %604 = math.exp %585 : vector<2x128xf32>
    %cst_256 = arith.constant 2.000000e+00 : f32
    %605 = vector.broadcast %cst_256 : f32 to vector<2x128xf32>
    %606 = arith.mulf %604, %605 : vector<2x128xf32>
    %607 = math.exp %587 : vector<2x128xf32>
    %cst_257 = arith.constant 3.000000e+00 : f32
    %608 = vector.broadcast %cst_257 : f32 to vector<2x128xf32>
    %609 = arith.mulf %607, %608 : vector<2x128xf32>
    %cst_258 = arith.constant 5.000000e-01 : f32
    %610 = vector.broadcast %cst_258 : f32 to vector<2x128xf32>
    %611 = arith.mulf %610, %606 : vector<2x128xf32>
    %612 = arith.subf %602, %611 : vector<2x128xf32>
    %cst_259 = arith.constant 5.000000e-01 : f32
    %613 = vector.broadcast %cst_259 : f32 to vector<2x128xf32>
    %614 = arith.mulf %613, %606 : vector<2x128xf32>
    %615 = arith.addf %602, %614 : vector<2x128xf32>
    %cst_260 = arith.constant 5.000000e-01 : f32
    %616 = vector.broadcast %cst_260 : f32 to vector<2x128xf32>
    %617 = arith.mulf %616, %609 : vector<2x128xf32>
    %618 = arith.subf %603, %617 : vector<2x128xf32>
    %cst_261 = arith.constant 5.000000e-01 : f32
    %619 = vector.broadcast %cst_261 : f32 to vector<2x128xf32>
    %620 = arith.mulf %619, %609 : vector<2x128xf32>
    %621 = arith.addf %603, %620 : vector<2x128xf32>
    %622 = arith.mulf %606, %609 : vector<2x128xf32>
    %cst_262 = arith.constant 0.000000e+00 : f32
    %623 = vector.broadcast %cst_262 : f32 to vector<2x128xf32>
    %c0_i32_263 = arith.constant 0 : i32
    %c4_i32_264 = arith.constant 4 : i32
    %624 = arith.muli %c4_i32_264, %c0_i32_263 : i32
    %625 = arith.index_cast %7 : i32 to index
    %626 = arith.index_cast %624 : i32 to index
    %627 = memref.load %arg1[%625, %626] : memref<2x32xf32, #tpu.memory_space<smem>>
    %c1_i32_265 = arith.constant 1 : i32
    %628 = arith.addi %624, %c1_i32_265 : i32
    %629 = arith.index_cast %7 : i32 to index
    %630 = arith.index_cast %628 : i32 to index
    %631 = memref.load %arg1[%629, %630] : memref<2x32xf32, #tpu.memory_space<smem>>
    %c2_i32_266 = arith.constant 2 : i32
    %632 = arith.addi %624, %c2_i32_266 : i32
    %633 = arith.index_cast %7 : i32 to index
    %634 = arith.index_cast %632 : i32 to index
    %635 = memref.load %arg1[%633, %634] : memref<2x32xf32, #tpu.memory_space<smem>>
    %c3_i32_267 = arith.constant 3 : i32
    %636 = arith.addi %624, %c3_i32_267 : i32
    %637 = arith.index_cast %7 : i32 to index
    %638 = arith.index_cast %636 : i32 to index
    %639 = memref.load %arg1[%637, %638] : memref<2x32xf32, #tpu.memory_space<smem>>
    %cst_268 = arith.constant 5.000000e-01 : f32
    %640 = arith.mulf %cst_268, %635 : f32
    %641 = arith.subf %627, %640 : f32
    %cst_269 = arith.constant 5.000000e-01 : f32
    %642 = arith.mulf %cst_269, %635 : f32
    %643 = arith.addf %627, %642 : f32
    %cst_270 = arith.constant 5.000000e-01 : f32
    %644 = arith.mulf %cst_270, %639 : f32
    %645 = arith.subf %631, %644 : f32
    %cst_271 = arith.constant 5.000000e-01 : f32
    %646 = arith.mulf %cst_271, %639 : f32
    %647 = arith.addf %631, %646 : f32
    %648 = vector.broadcast %643 : f32 to vector<2x128xf32>
    %649 = arith.minimumf %648, %615 : vector<2x128xf32>
    %650 = vector.broadcast %641 : f32 to vector<2x128xf32>
    %651 = arith.maximumf %650, %612 : vector<2x128xf32>
    %652 = arith.subf %649, %651 : vector<2x128xf32>
    %cst_272 = arith.constant 0.000000e+00 : f32
    %653 = vector.broadcast %cst_272 : f32 to vector<2x128xf32>
    %654 = arith.maximumf %652, %653 : vector<2x128xf32>
    %655 = vector.broadcast %647 : f32 to vector<2x128xf32>
    %656 = arith.minimumf %655, %621 : vector<2x128xf32>
    %657 = vector.broadcast %645 : f32 to vector<2x128xf32>
    %658 = arith.maximumf %657, %618 : vector<2x128xf32>
    %659 = arith.subf %656, %658 : vector<2x128xf32>
    %cst_273 = arith.constant 0.000000e+00 : f32
    %660 = vector.broadcast %cst_273 : f32 to vector<2x128xf32>
    %661 = arith.maximumf %659, %660 : vector<2x128xf32>
    %662 = arith.mulf %654, %661 : vector<2x128xf32>
    %663 = arith.mulf %635, %639 : f32
    %664 = vector.broadcast %663 : f32 to vector<2x128xf32>
    %665 = arith.addf %664, %622 : vector<2x128xf32>
    %666 = arith.subf %665, %662 : vector<2x128xf32>
    %cst_274 = arith.constant 5.000000e-01 : f32
    %667 = vector.broadcast %cst_274 : f32 to vector<2x128xf32>
    %668 = arith.mulf %667, %666 : vector<2x128xf32>
    %669 = arith.subf %662, %668 : vector<2x128xf32>
    %670 = arith.maximumf %623, %669 : vector<2x128xf32>
    %c1_i32_275 = arith.constant 1 : i32
    %c4_i32_276 = arith.constant 4 : i32
    %671 = arith.muli %c4_i32_276, %c1_i32_275 : i32
    %672 = arith.index_cast %7 : i32 to index
    %673 = arith.index_cast %671 : i32 to index
    %674 = memref.load %arg1[%672, %673] : memref<2x32xf32, #tpu.memory_space<smem>>
    %c1_i32_277 = arith.constant 1 : i32
    %675 = arith.addi %671, %c1_i32_277 : i32
    %676 = arith.index_cast %7 : i32 to index
    %677 = arith.index_cast %675 : i32 to index
    %678 = memref.load %arg1[%676, %677] : memref<2x32xf32, #tpu.memory_space<smem>>
    %c2_i32_278 = arith.constant 2 : i32
    %679 = arith.addi %671, %c2_i32_278 : i32
    %680 = arith.index_cast %7 : i32 to index
    %681 = arith.index_cast %679 : i32 to index
    %682 = memref.load %arg1[%680, %681] : memref<2x32xf32, #tpu.memory_space<smem>>
    %c3_i32_279 = arith.constant 3 : i32
    %683 = arith.addi %671, %c3_i32_279 : i32
    %684 = arith.index_cast %7 : i32 to index
    %685 = arith.index_cast %683 : i32 to index
    %686 = memref.load %arg1[%684, %685] : memref<2x32xf32, #tpu.memory_space<smem>>
    %cst_280 = arith.constant 5.000000e-01 : f32
    %687 = arith.mulf %cst_280, %682 : f32
    %688 = arith.subf %674, %687 : f32
    %cst_281 = arith.constant 5.000000e-01 : f32
    %689 = arith.mulf %cst_281, %682 : f32
    %690 = arith.addf %674, %689 : f32
    %cst_282 = arith.constant 5.000000e-01 : f32
    %691 = arith.mulf %cst_282, %686 : f32
    %692 = arith.subf %678, %691 : f32
    %cst_283 = arith.constant 5.000000e-01 : f32
    %693 = arith.mulf %cst_283, %686 : f32
    %694 = arith.addf %678, %693 : f32
    %695 = vector.broadcast %690 : f32 to vector<2x128xf32>
    %696 = arith.minimumf %695, %615 : vector<2x128xf32>
    %697 = vector.broadcast %688 : f32 to vector<2x128xf32>
    %698 = arith.maximumf %697, %612 : vector<2x128xf32>
    %699 = arith.subf %696, %698 : vector<2x128xf32>
    %cst_284 = arith.constant 0.000000e+00 : f32
    %700 = vector.broadcast %cst_284 : f32 to vector<2x128xf32>
    %701 = arith.maximumf %699, %700 : vector<2x128xf32>
    %702 = vector.broadcast %694 : f32 to vector<2x128xf32>
    %703 = arith.minimumf %702, %621 : vector<2x128xf32>
    %704 = vector.broadcast %692 : f32 to vector<2x128xf32>
    %705 = arith.maximumf %704, %618 : vector<2x128xf32>
    %706 = arith.subf %703, %705 : vector<2x128xf32>
    %cst_285 = arith.constant 0.000000e+00 : f32
    %707 = vector.broadcast %cst_285 : f32 to vector<2x128xf32>
    %708 = arith.maximumf %706, %707 : vector<2x128xf32>
    %709 = arith.mulf %701, %708 : vector<2x128xf32>
    %710 = arith.mulf %682, %686 : f32
    %711 = vector.broadcast %710 : f32 to vector<2x128xf32>
    %712 = arith.addf %711, %622 : vector<2x128xf32>
    %713 = arith.subf %712, %709 : vector<2x128xf32>
    %cst_286 = arith.constant 5.000000e-01 : f32
    %714 = vector.broadcast %cst_286 : f32 to vector<2x128xf32>
    %715 = arith.mulf %714, %713 : vector<2x128xf32>
    %716 = arith.subf %709, %715 : vector<2x128xf32>
    %717 = arith.maximumf %670, %716 : vector<2x128xf32>
    %c2_i32_287 = arith.constant 2 : i32
    %c4_i32_288 = arith.constant 4 : i32
    %718 = arith.muli %c4_i32_288, %c2_i32_287 : i32
    %719 = arith.index_cast %7 : i32 to index
    %720 = arith.index_cast %718 : i32 to index
    %721 = memref.load %arg1[%719, %720] : memref<2x32xf32, #tpu.memory_space<smem>>
    %c1_i32_289 = arith.constant 1 : i32
    %722 = arith.addi %718, %c1_i32_289 : i32
    %723 = arith.index_cast %7 : i32 to index
    %724 = arith.index_cast %722 : i32 to index
    %725 = memref.load %arg1[%723, %724] : memref<2x32xf32, #tpu.memory_space<smem>>
    %c2_i32_290 = arith.constant 2 : i32
    %726 = arith.addi %718, %c2_i32_290 : i32
    %727 = arith.index_cast %7 : i32 to index
    %728 = arith.index_cast %726 : i32 to index
    %729 = memref.load %arg1[%727, %728] : memref<2x32xf32, #tpu.memory_space<smem>>
    %c3_i32_291 = arith.constant 3 : i32
    %730 = arith.addi %718, %c3_i32_291 : i32
    %731 = arith.index_cast %7 : i32 to index
    %732 = arith.index_cast %730 : i32 to index
    %733 = memref.load %arg1[%731, %732] : memref<2x32xf32, #tpu.memory_space<smem>>
    %cst_292 = arith.constant 5.000000e-01 : f32
    %734 = arith.mulf %cst_292, %729 : f32
    %735 = arith.subf %721, %734 : f32
    %cst_293 = arith.constant 5.000000e-01 : f32
    %736 = arith.mulf %cst_293, %729 : f32
    %737 = arith.addf %721, %736 : f32
    %cst_294 = arith.constant 5.000000e-01 : f32
    %738 = arith.mulf %cst_294, %733 : f32
    %739 = arith.subf %725, %738 : f32
    %cst_295 = arith.constant 5.000000e-01 : f32
    %740 = arith.mulf %cst_295, %733 : f32
    %741 = arith.addf %725, %740 : f32
    %742 = vector.broadcast %737 : f32 to vector<2x128xf32>
    %743 = arith.minimumf %742, %615 : vector<2x128xf32>
    %744 = vector.broadcast %735 : f32 to vector<2x128xf32>
    %745 = arith.maximumf %744, %612 : vector<2x128xf32>
    %746 = arith.subf %743, %745 : vector<2x128xf32>
    %cst_296 = arith.constant 0.000000e+00 : f32
    %747 = vector.broadcast %cst_296 : f32 to vector<2x128xf32>
    %748 = arith.maximumf %746, %747 : vector<2x128xf32>
    %749 = vector.broadcast %741 : f32 to vector<2x128xf32>
    %750 = arith.minimumf %749, %621 : vector<2x128xf32>
    %751 = vector.broadcast %739 : f32 to vector<2x128xf32>
    %752 = arith.maximumf %751, %618 : vector<2x128xf32>
    %753 = arith.subf %750, %752 : vector<2x128xf32>
    %cst_297 = arith.constant 0.000000e+00 : f32
    %754 = vector.broadcast %cst_297 : f32 to vector<2x128xf32>
    %755 = arith.maximumf %753, %754 : vector<2x128xf32>
    %756 = arith.mulf %748, %755 : vector<2x128xf32>
    %757 = arith.mulf %729, %733 : f32
    %758 = vector.broadcast %757 : f32 to vector<2x128xf32>
    %759 = arith.addf %758, %622 : vector<2x128xf32>
    %760 = arith.subf %759, %756 : vector<2x128xf32>
    %cst_298 = arith.constant 5.000000e-01 : f32
    %761 = vector.broadcast %cst_298 : f32 to vector<2x128xf32>
    %762 = arith.mulf %761, %760 : vector<2x128xf32>
    %763 = arith.subf %756, %762 : vector<2x128xf32>
    %764 = arith.maximumf %717, %763 : vector<2x128xf32>
    %c3_i32_299 = arith.constant 3 : i32
    %c4_i32_300 = arith.constant 4 : i32
    %765 = arith.muli %c4_i32_300, %c3_i32_299 : i32
    %766 = arith.index_cast %7 : i32 to index
    %767 = arith.index_cast %765 : i32 to index
    %768 = memref.load %arg1[%766, %767] : memref<2x32xf32, #tpu.memory_space<smem>>
    %c1_i32_301 = arith.constant 1 : i32
    %769 = arith.addi %765, %c1_i32_301 : i32
    %770 = arith.index_cast %7 : i32 to index
    %771 = arith.index_cast %769 : i32 to index
    %772 = memref.load %arg1[%770, %771] : memref<2x32xf32, #tpu.memory_space<smem>>
    %c2_i32_302 = arith.constant 2 : i32
    %773 = arith.addi %765, %c2_i32_302 : i32
    %774 = arith.index_cast %7 : i32 to index
    %775 = arith.index_cast %773 : i32 to index
    %776 = memref.load %arg1[%774, %775] : memref<2x32xf32, #tpu.memory_space<smem>>
    %c3_i32_303 = arith.constant 3 : i32
    %777 = arith.addi %765, %c3_i32_303 : i32
    %778 = arith.index_cast %7 : i32 to index
    %779 = arith.index_cast %777 : i32 to index
    %780 = memref.load %arg1[%778, %779] : memref<2x32xf32, #tpu.memory_space<smem>>
    %cst_304 = arith.constant 5.000000e-01 : f32
    %781 = arith.mulf %cst_304, %776 : f32
    %782 = arith.subf %768, %781 : f32
    %cst_305 = arith.constant 5.000000e-01 : f32
    %783 = arith.mulf %cst_305, %776 : f32
    %784 = arith.addf %768, %783 : f32
    %cst_306 = arith.constant 5.000000e-01 : f32
    %785 = arith.mulf %cst_306, %780 : f32
    %786 = arith.subf %772, %785 : f32
    %cst_307 = arith.constant 5.000000e-01 : f32
    %787 = arith.mulf %cst_307, %780 : f32
    %788 = arith.addf %772, %787 : f32
    %789 = vector.broadcast %784 : f32 to vector<2x128xf32>
    %790 = arith.minimumf %789, %615 : vector<2x128xf32>
    %791 = vector.broadcast %782 : f32 to vector<2x128xf32>
    %792 = arith.maximumf %791, %612 : vector<2x128xf32>
    %793 = arith.subf %790, %792 : vector<2x128xf32>
    %cst_308 = arith.constant 0.000000e+00 : f32
    %794 = vector.broadcast %cst_308 : f32 to vector<2x128xf32>
    %795 = arith.maximumf %793, %794 : vector<2x128xf32>
    %796 = vector.broadcast %788 : f32 to vector<2x128xf32>
    %797 = arith.minimumf %796, %621 : vector<2x128xf32>
    %798 = vector.broadcast %786 : f32 to vector<2x128xf32>
    %799 = arith.maximumf %798, %618 : vector<2x128xf32>
    %800 = arith.subf %797, %799 : vector<2x128xf32>
    %cst_309 = arith.constant 0.000000e+00 : f32
    %801 = vector.broadcast %cst_309 : f32 to vector<2x128xf32>
    %802 = arith.maximumf %800, %801 : vector<2x128xf32>
    %803 = arith.mulf %795, %802 : vector<2x128xf32>
    %804 = arith.mulf %776, %780 : f32
    %805 = vector.broadcast %804 : f32 to vector<2x128xf32>
    %806 = arith.addf %805, %622 : vector<2x128xf32>
    %807 = arith.subf %806, %803 : vector<2x128xf32>
    %cst_310 = arith.constant 5.000000e-01 : f32
    %808 = vector.broadcast %cst_310 : f32 to vector<2x128xf32>
    %809 = arith.mulf %808, %807 : vector<2x128xf32>
    %810 = arith.subf %803, %809 : vector<2x128xf32>
    %811 = arith.maximumf %764, %810 : vector<2x128xf32>
    %c4_i32_311 = arith.constant 4 : i32
    %c4_i32_312 = arith.constant 4 : i32
    %812 = arith.muli %c4_i32_312, %c4_i32_311 : i32
    %813 = arith.index_cast %7 : i32 to index
    %814 = arith.index_cast %812 : i32 to index
    %815 = memref.load %arg1[%813, %814] : memref<2x32xf32, #tpu.memory_space<smem>>
    %c1_i32_313 = arith.constant 1 : i32
    %816 = arith.addi %812, %c1_i32_313 : i32
    %817 = arith.index_cast %7 : i32 to index
    %818 = arith.index_cast %816 : i32 to index
    %819 = memref.load %arg1[%817, %818] : memref<2x32xf32, #tpu.memory_space<smem>>
    %c2_i32_314 = arith.constant 2 : i32
    %820 = arith.addi %812, %c2_i32_314 : i32
    %821 = arith.index_cast %7 : i32 to index
    %822 = arith.index_cast %820 : i32 to index
    %823 = memref.load %arg1[%821, %822] : memref<2x32xf32, #tpu.memory_space<smem>>
    %c3_i32_315 = arith.constant 3 : i32
    %824 = arith.addi %812, %c3_i32_315 : i32
    %825 = arith.index_cast %7 : i32 to index
    %826 = arith.index_cast %824 : i32 to index
    %827 = memref.load %arg1[%825, %826] : memref<2x32xf32, #tpu.memory_space<smem>>
    %cst_316 = arith.constant 5.000000e-01 : f32
    %828 = arith.mulf %cst_316, %823 : f32
    %829 = arith.subf %815, %828 : f32
    %cst_317 = arith.constant 5.000000e-01 : f32
    %830 = arith.mulf %cst_317, %823 : f32
    %831 = arith.addf %815, %830 : f32
    %cst_318 = arith.constant 5.000000e-01 : f32
    %832 = arith.mulf %cst_318, %827 : f32
    %833 = arith.subf %819, %832 : f32
    %cst_319 = arith.constant 5.000000e-01 : f32
    %834 = arith.mulf %cst_319, %827 : f32
    %835 = arith.addf %819, %834 : f32
    %836 = vector.broadcast %831 : f32 to vector<2x128xf32>
    %837 = arith.minimumf %836, %615 : vector<2x128xf32>
    %838 = vector.broadcast %829 : f32 to vector<2x128xf32>
    %839 = arith.maximumf %838, %612 : vector<2x128xf32>
    %840 = arith.subf %837, %839 : vector<2x128xf32>
    %cst_320 = arith.constant 0.000000e+00 : f32
    %841 = vector.broadcast %cst_320 : f32 to vector<2x128xf32>
    %842 = arith.maximumf %840, %841 : vector<2x128xf32>
    %843 = vector.broadcast %835 : f32 to vector<2x128xf32>
    %844 = arith.minimumf %843, %621 : vector<2x128xf32>
    %845 = vector.broadcast %833 : f32 to vector<2x128xf32>
    %846 = arith.maximumf %845, %618 : vector<2x128xf32>
    %847 = arith.subf %844, %846 : vector<2x128xf32>
    %cst_321 = arith.constant 0.000000e+00 : f32
    %848 = vector.broadcast %cst_321 : f32 to vector<2x128xf32>
    %849 = arith.maximumf %847, %848 : vector<2x128xf32>
    %850 = arith.mulf %842, %849 : vector<2x128xf32>
    %851 = arith.mulf %823, %827 : f32
    %852 = vector.broadcast %851 : f32 to vector<2x128xf32>
    %853 = arith.addf %852, %622 : vector<2x128xf32>
    %854 = arith.subf %853, %850 : vector<2x128xf32>
    %cst_322 = arith.constant 5.000000e-01 : f32
    %855 = vector.broadcast %cst_322 : f32 to vector<2x128xf32>
    %856 = arith.mulf %855, %854 : vector<2x128xf32>
    %857 = arith.subf %850, %856 : vector<2x128xf32>
    %858 = arith.maximumf %811, %857 : vector<2x128xf32>
    %c5_i32_323 = arith.constant 5 : i32
    %c4_i32_324 = arith.constant 4 : i32
    %859 = arith.muli %c4_i32_324, %c5_i32_323 : i32
    %860 = arith.index_cast %7 : i32 to index
    %861 = arith.index_cast %859 : i32 to index
    %862 = memref.load %arg1[%860, %861] : memref<2x32xf32, #tpu.memory_space<smem>>
    %c1_i32_325 = arith.constant 1 : i32
    %863 = arith.addi %859, %c1_i32_325 : i32
    %864 = arith.index_cast %7 : i32 to index
    %865 = arith.index_cast %863 : i32 to index
    %866 = memref.load %arg1[%864, %865] : memref<2x32xf32, #tpu.memory_space<smem>>
    %c2_i32_326 = arith.constant 2 : i32
    %867 = arith.addi %859, %c2_i32_326 : i32
    %868 = arith.index_cast %7 : i32 to index
    %869 = arith.index_cast %867 : i32 to index
    %870 = memref.load %arg1[%868, %869] : memref<2x32xf32, #tpu.memory_space<smem>>
    %c3_i32_327 = arith.constant 3 : i32
    %871 = arith.addi %859, %c3_i32_327 : i32
    %872 = arith.index_cast %7 : i32 to index
    %873 = arith.index_cast %871 : i32 to index
    %874 = memref.load %arg1[%872, %873] : memref<2x32xf32, #tpu.memory_space<smem>>
    %cst_328 = arith.constant 5.000000e-01 : f32
    %875 = arith.mulf %cst_328, %870 : f32
    %876 = arith.subf %862, %875 : f32
    %cst_329 = arith.constant 5.000000e-01 : f32
    %877 = arith.mulf %cst_329, %870 : f32
    %878 = arith.addf %862, %877 : f32
    %cst_330 = arith.constant 5.000000e-01 : f32
    %879 = arith.mulf %cst_330, %874 : f32
    %880 = arith.subf %866, %879 : f32
    %cst_331 = arith.constant 5.000000e-01 : f32
    %881 = arith.mulf %cst_331, %874 : f32
    %882 = arith.addf %866, %881 : f32
    %883 = vector.broadcast %878 : f32 to vector<2x128xf32>
    %884 = arith.minimumf %883, %615 : vector<2x128xf32>
    %885 = vector.broadcast %876 : f32 to vector<2x128xf32>
    %886 = arith.maximumf %885, %612 : vector<2x128xf32>
    %887 = arith.subf %884, %886 : vector<2x128xf32>
    %cst_332 = arith.constant 0.000000e+00 : f32
    %888 = vector.broadcast %cst_332 : f32 to vector<2x128xf32>
    %889 = arith.maximumf %887, %888 : vector<2x128xf32>
    %890 = vector.broadcast %882 : f32 to vector<2x128xf32>
    %891 = arith.minimumf %890, %621 : vector<2x128xf32>
    %892 = vector.broadcast %880 : f32 to vector<2x128xf32>
    %893 = arith.maximumf %892, %618 : vector<2x128xf32>
    %894 = arith.subf %891, %893 : vector<2x128xf32>
    %cst_333 = arith.constant 0.000000e+00 : f32
    %895 = vector.broadcast %cst_333 : f32 to vector<2x128xf32>
    %896 = arith.maximumf %894, %895 : vector<2x128xf32>
    %897 = arith.mulf %889, %896 : vector<2x128xf32>
    %898 = arith.mulf %870, %874 : f32
    %899 = vector.broadcast %898 : f32 to vector<2x128xf32>
    %900 = arith.addf %899, %622 : vector<2x128xf32>
    %901 = arith.subf %900, %897 : vector<2x128xf32>
    %cst_334 = arith.constant 5.000000e-01 : f32
    %902 = vector.broadcast %cst_334 : f32 to vector<2x128xf32>
    %903 = arith.mulf %902, %901 : vector<2x128xf32>
    %904 = arith.subf %897, %903 : vector<2x128xf32>
    %905 = arith.maximumf %858, %904 : vector<2x128xf32>
    %c6_i32_335 = arith.constant 6 : i32
    %c4_i32_336 = arith.constant 4 : i32
    %906 = arith.muli %c4_i32_336, %c6_i32_335 : i32
    %907 = arith.index_cast %7 : i32 to index
    %908 = arith.index_cast %906 : i32 to index
    %909 = memref.load %arg1[%907, %908] : memref<2x32xf32, #tpu.memory_space<smem>>
    %c1_i32_337 = arith.constant 1 : i32
    %910 = arith.addi %906, %c1_i32_337 : i32
    %911 = arith.index_cast %7 : i32 to index
    %912 = arith.index_cast %910 : i32 to index
    %913 = memref.load %arg1[%911, %912] : memref<2x32xf32, #tpu.memory_space<smem>>
    %c2_i32_338 = arith.constant 2 : i32
    %914 = arith.addi %906, %c2_i32_338 : i32
    %915 = arith.index_cast %7 : i32 to index
    %916 = arith.index_cast %914 : i32 to index
    %917 = memref.load %arg1[%915, %916] : memref<2x32xf32, #tpu.memory_space<smem>>
    %c3_i32_339 = arith.constant 3 : i32
    %918 = arith.addi %906, %c3_i32_339 : i32
    %919 = arith.index_cast %7 : i32 to index
    %920 = arith.index_cast %918 : i32 to index
    %921 = memref.load %arg1[%919, %920] : memref<2x32xf32, #tpu.memory_space<smem>>
    %cst_340 = arith.constant 5.000000e-01 : f32
    %922 = arith.mulf %cst_340, %917 : f32
    %923 = arith.subf %909, %922 : f32
    %cst_341 = arith.constant 5.000000e-01 : f32
    %924 = arith.mulf %cst_341, %917 : f32
    %925 = arith.addf %909, %924 : f32
    %cst_342 = arith.constant 5.000000e-01 : f32
    %926 = arith.mulf %cst_342, %921 : f32
    %927 = arith.subf %913, %926 : f32
    %cst_343 = arith.constant 5.000000e-01 : f32
    %928 = arith.mulf %cst_343, %921 : f32
    %929 = arith.addf %913, %928 : f32
    %930 = vector.broadcast %925 : f32 to vector<2x128xf32>
    %931 = arith.minimumf %930, %615 : vector<2x128xf32>
    %932 = vector.broadcast %923 : f32 to vector<2x128xf32>
    %933 = arith.maximumf %932, %612 : vector<2x128xf32>
    %934 = arith.subf %931, %933 : vector<2x128xf32>
    %cst_344 = arith.constant 0.000000e+00 : f32
    %935 = vector.broadcast %cst_344 : f32 to vector<2x128xf32>
    %936 = arith.maximumf %934, %935 : vector<2x128xf32>
    %937 = vector.broadcast %929 : f32 to vector<2x128xf32>
    %938 = arith.minimumf %937, %621 : vector<2x128xf32>
    %939 = vector.broadcast %927 : f32 to vector<2x128xf32>
    %940 = arith.maximumf %939, %618 : vector<2x128xf32>
    %941 = arith.subf %938, %940 : vector<2x128xf32>
    %cst_345 = arith.constant 0.000000e+00 : f32
    %942 = vector.broadcast %cst_345 : f32 to vector<2x128xf32>
    %943 = arith.maximumf %941, %942 : vector<2x128xf32>
    %944 = arith.mulf %936, %943 : vector<2x128xf32>
    %945 = arith.mulf %917, %921 : f32
    %946 = vector.broadcast %945 : f32 to vector<2x128xf32>
    %947 = arith.addf %946, %622 : vector<2x128xf32>
    %948 = arith.subf %947, %944 : vector<2x128xf32>
    %cst_346 = arith.constant 5.000000e-01 : f32
    %949 = vector.broadcast %cst_346 : f32 to vector<2x128xf32>
    %950 = arith.mulf %949, %948 : vector<2x128xf32>
    %951 = arith.subf %944, %950 : vector<2x128xf32>
    %952 = arith.maximumf %905, %951 : vector<2x128xf32>
    %c7_i32_347 = arith.constant 7 : i32
    %c4_i32_348 = arith.constant 4 : i32
    %953 = arith.muli %c4_i32_348, %c7_i32_347 : i32
    %954 = arith.index_cast %7 : i32 to index
    %955 = arith.index_cast %953 : i32 to index
    %956 = memref.load %arg1[%954, %955] : memref<2x32xf32, #tpu.memory_space<smem>>
    %c1_i32_349 = arith.constant 1 : i32
    %957 = arith.addi %953, %c1_i32_349 : i32
    %958 = arith.index_cast %7 : i32 to index
    %959 = arith.index_cast %957 : i32 to index
    %960 = memref.load %arg1[%958, %959] : memref<2x32xf32, #tpu.memory_space<smem>>
    %c2_i32_350 = arith.constant 2 : i32
    %961 = arith.addi %953, %c2_i32_350 : i32
    %962 = arith.index_cast %7 : i32 to index
    %963 = arith.index_cast %961 : i32 to index
    %964 = memref.load %arg1[%962, %963] : memref<2x32xf32, #tpu.memory_space<smem>>
    %c3_i32_351 = arith.constant 3 : i32
    %965 = arith.addi %953, %c3_i32_351 : i32
    %966 = arith.index_cast %7 : i32 to index
    %967 = arith.index_cast %965 : i32 to index
    %968 = memref.load %arg1[%966, %967] : memref<2x32xf32, #tpu.memory_space<smem>>
    %cst_352 = arith.constant 5.000000e-01 : f32
    %969 = arith.mulf %cst_352, %964 : f32
    %970 = arith.subf %956, %969 : f32
    %cst_353 = arith.constant 5.000000e-01 : f32
    %971 = arith.mulf %cst_353, %964 : f32
    %972 = arith.addf %956, %971 : f32
    %cst_354 = arith.constant 5.000000e-01 : f32
    %973 = arith.mulf %cst_354, %968 : f32
    %974 = arith.subf %960, %973 : f32
    %cst_355 = arith.constant 5.000000e-01 : f32
    %975 = arith.mulf %cst_355, %968 : f32
    %976 = arith.addf %960, %975 : f32
    %977 = vector.broadcast %972 : f32 to vector<2x128xf32>
    %978 = arith.minimumf %977, %615 : vector<2x128xf32>
    %979 = vector.broadcast %970 : f32 to vector<2x128xf32>
    %980 = arith.maximumf %979, %612 : vector<2x128xf32>
    %981 = arith.subf %978, %980 : vector<2x128xf32>
    %cst_356 = arith.constant 0.000000e+00 : f32
    %982 = vector.broadcast %cst_356 : f32 to vector<2x128xf32>
    %983 = arith.maximumf %981, %982 : vector<2x128xf32>
    %984 = vector.broadcast %976 : f32 to vector<2x128xf32>
    %985 = arith.minimumf %984, %621 : vector<2x128xf32>
    %986 = vector.broadcast %974 : f32 to vector<2x128xf32>
    %987 = arith.maximumf %986, %618 : vector<2x128xf32>
    %988 = arith.subf %985, %987 : vector<2x128xf32>
    %cst_357 = arith.constant 0.000000e+00 : f32
    %989 = vector.broadcast %cst_357 : f32 to vector<2x128xf32>
    %990 = arith.maximumf %988, %989 : vector<2x128xf32>
    %991 = arith.mulf %983, %990 : vector<2x128xf32>
    %992 = arith.mulf %964, %968 : f32
    %993 = vector.broadcast %992 : f32 to vector<2x128xf32>
    %994 = arith.addf %993, %622 : vector<2x128xf32>
    %995 = arith.subf %994, %991 : vector<2x128xf32>
    %cst_358 = arith.constant 5.000000e-01 : f32
    %996 = vector.broadcast %cst_358 : f32 to vector<2x128xf32>
    %997 = arith.mulf %996, %995 : vector<2x128xf32>
    %998 = arith.subf %991, %997 : vector<2x128xf32>
    %999 = arith.maximumf %952, %998 : vector<2x128xf32>
    %c8_i32_359 = arith.constant 8 : i32
    %cst_360 = arith.constant 0.000000e+00 : f32
    %1000 = vector.broadcast %cst_360 : f32 to vector<2x128xf32>
    %1001 = arith.cmpf ogt, %999, %1000 : vector<2x128xf32>
    %c0_361 = arith.constant 0 : index
    %c1_362 = arith.constant 1 : index
    %c0_363 = arith.constant 0 : index
    %c0_364 = arith.constant 0 : index
    %1002 = vector.load %arg4[%c0_361, %c1_362, %c0_363, %c0_364] : memref<1x3x2x128xbf16, #tpu.memory_space<vmem>>, vector<1x1x2x128xbf16>
    %1003 = vector.shape_cast %1002 : vector<1x1x2x128xbf16> to vector<2x128xbf16>
    %1004 = arith.extf %1003 : vector<2x128xbf16> to vector<2x128xf32>
    %cst_365 = arith.constant 0.000000e+00 : f32
    %1005 = vector.broadcast %cst_365 : f32 to vector<2x128xf32>
    %1006 = arith.select %1001, %1005, %1004 : vector<2x128xi1>, vector<2x128xf32>
    %c0_366 = arith.constant 0 : index
    %c1_367 = arith.constant 1 : index
    %c4_368 = arith.constant 4 : index
    %c0_369 = arith.constant 0 : index
    %c0_370 = arith.constant 0 : index
    %1007 = vector.load %arg3[%c0_366, %c1_367, %c4_368, %c0_369, %c0_370] : memref<1x3x9x2x128xbf16, #tpu.memory_space<vmem>>, vector<1x1x1x2x128xbf16>
    %1008 = vector.shape_cast %1007 : vector<1x1x1x2x128xbf16> to vector<2x128xbf16>
    %1009 = arith.extf %1008 : vector<2x128xbf16> to vector<2x128xf32>
    %c0_371 = arith.constant 0 : index
    %c1_372 = arith.constant 1 : index
    %c0_373 = arith.constant 0 : index
    %c0_374 = arith.constant 0 : index
    %1010 = vector.load %arg5[%c0_371, %c1_372, %c0_373, %c0_374] : memref<1x3x2x128xbf16, #tpu.memory_space<vmem>>, vector<1x1x2x128xbf16>
    %1011 = vector.shape_cast %1010 : vector<1x1x2x128xbf16> to vector<2x128xbf16>
    %1012 = arith.extf %1011 : vector<2x128xbf16> to vector<2x128xf32>
    %cst_375 = arith.constant 2.000000e+00 : f32
    %1013 = vector.broadcast %cst_375 : f32 to vector<2x128xf32>
    %1014 = arith.subf %1013, %1012 : vector<2x128xf32>
    %1015 = arith.mulf %1014, %1009 : vector<2x128xf32>
    %c0_376 = arith.constant 0 : index
    %c1_377 = arith.constant 1 : index
    %c0_378 = arith.constant 0 : index
    %c0_379 = arith.constant 0 : index
    %c0_380 = arith.constant 0 : index
    %1016 = vector.load %arg3[%c0_376, %c1_377, %c0_378, %c0_379, %c0_380] : memref<1x3x9x2x128xbf16, #tpu.memory_space<vmem>>, vector<1x1x1x2x128xbf16>
    %1017 = vector.shape_cast %1016 : vector<1x1x1x2x128xbf16> to vector<2x128xbf16>
    %1018 = arith.extf %1017 : vector<2x128xbf16> to vector<2x128xf32>
    %1019 = arith.subf %595, %1018 : vector<2x128xf32>
    %1020 = arith.mulf %1019, %1019 : vector<2x128xf32>
    %c0_381 = arith.constant 0 : index
    %c1_382 = arith.constant 1 : index
    %c1_383 = arith.constant 1 : index
    %c0_384 = arith.constant 0 : index
    %c0_385 = arith.constant 0 : index
    %1021 = vector.load %arg3[%c0_381, %c1_382, %c1_383, %c0_384, %c0_385] : memref<1x3x9x2x128xbf16, #tpu.memory_space<vmem>>, vector<1x1x1x2x128xbf16>
    %1022 = vector.shape_cast %1021 : vector<1x1x1x2x128xbf16> to vector<2x128xbf16>
    %1023 = arith.extf %1022 : vector<2x128xbf16> to vector<2x128xf32>
    %1024 = arith.subf %601, %1023 : vector<2x128xf32>
    %1025 = arith.mulf %1024, %1024 : vector<2x128xf32>
    %1026 = arith.addf %1020, %1025 : vector<2x128xf32>
    %c0_386 = arith.constant 0 : index
    %c1_387 = arith.constant 1 : index
    %c2_388 = arith.constant 2 : index
    %c0_389 = arith.constant 0 : index
    %c0_390 = arith.constant 0 : index
    %1027 = vector.load %arg3[%c0_386, %c1_387, %c2_388, %c0_389, %c0_390] : memref<1x3x9x2x128xbf16, #tpu.memory_space<vmem>>, vector<1x1x1x2x128xbf16>
    %1028 = vector.shape_cast %1027 : vector<1x1x1x2x128xbf16> to vector<2x128xbf16>
    %1029 = arith.extf %1028 : vector<2x128xbf16> to vector<2x128xf32>
    %1030 = arith.subf %585, %1029 : vector<2x128xf32>
    %1031 = arith.mulf %1030, %1030 : vector<2x128xf32>
    %1032 = arith.addf %1026, %1031 : vector<2x128xf32>
    %c0_391 = arith.constant 0 : index
    %c1_392 = arith.constant 1 : index
    %c3_393 = arith.constant 3 : index
    %c0_394 = arith.constant 0 : index
    %c0_395 = arith.constant 0 : index
    %1033 = vector.load %arg3[%c0_391, %c1_392, %c3_393, %c0_394, %c0_395] : memref<1x3x9x2x128xbf16, #tpu.memory_space<vmem>>, vector<1x1x1x2x128xbf16>
    %1034 = vector.shape_cast %1033 : vector<1x1x1x2x128xbf16> to vector<2x128xbf16>
    %1035 = arith.extf %1034 : vector<2x128xbf16> to vector<2x128xf32>
    %1036 = arith.subf %587, %1035 : vector<2x128xf32>
    %1037 = arith.mulf %1036, %1036 : vector<2x128xf32>
    %1038 = arith.addf %1032, %1037 : vector<2x128xf32>
    %1039 = arith.mulf %1038, %1015 : vector<2x128xf32>
    %cst_396 = arith.constant -16.1180954 : f32
    %cst_397 = arith.constant 16.1180954 : f32
    %1040 = vector.broadcast %cst_396 : f32 to vector<2x128xf32>
    %1041 = arith.maximumf %1040, %589 : vector<2x128xf32>
    %1042 = vector.broadcast %cst_397 : f32 to vector<2x128xf32>
    %1043 = arith.minimumf %1042, %1041 : vector<2x128xf32>
    %cst_398 = arith.constant 0.000000e+00 : f32
    %1044 = vector.broadcast %cst_398 : f32 to vector<2x128xf32>
    %1045 = arith.maximumf %1043, %1044 : vector<2x128xf32>
    %1046 = arith.mulf %1043, %1009 : vector<2x128xf32>
    %1047 = arith.subf %1045, %1046 : vector<2x128xf32>
    %1048 = math.absf %1043 : vector<2x128xf32>
    %cst_399 = arith.constant 0.000000e+00 : f32
    %1049 = vector.broadcast %cst_399 : f32 to vector<2x128xf32>
    %1050 = arith.subf %1049, %1048 : vector<2x128xf32>
    %1051 = math.exp %1050 : vector<2x128xf32>
    %cst_400 = arith.constant 1.000000e+00 : f32
    %1052 = vector.broadcast %cst_400 : f32 to vector<2x128xf32>
    %1053 = arith.addf %1052, %1051 : vector<2x128xf32>
    %1054 = math.log %1053 : vector<2x128xf32>
    %1055 = arith.addf %1047, %1054 : vector<2x128xf32>
    %1056 = arith.addf %1009, %1006 : vector<2x128xf32>
    %1057 = arith.mulf %1055, %1056 : vector<2x128xf32>
    %cst_401 = arith.constant 0.000000e+00 : f32
    %1058 = vector.broadcast %cst_401 : f32 to vector<2x128xf32>
    %c0_i32_402 = arith.constant 0 : i32
    %c5_i32_403 = arith.constant 5 : i32
    %1059 = arith.addi %c5_i32_403, %c0_i32_402 : i32
    %c0_404 = arith.constant 0 : index
    %c1_405 = arith.constant 1 : index
    %1060 = arith.index_cast %1059 : i32 to index
    %c0_406 = arith.constant 0 : index
    %c0_407 = arith.constant 0 : index
    %1061 = vector.load %arg2[%c0_404, %c1_405, %1060, %c0_406, %c0_407] : memref<1x3x9x2x128xf32, #tpu.memory_space<vmem>>, vector<1x1x1x2x128xf32>
    %1062 = vector.shape_cast %1061 : vector<1x1x1x2x128xf32> to vector<2x128xf32>
    %c5_i32_408 = arith.constant 5 : i32
    %1063 = arith.addi %c5_i32_408, %c0_i32_402 : i32
    %c0_409 = arith.constant 0 : index
    %c1_410 = arith.constant 1 : index
    %1064 = arith.index_cast %1063 : i32 to index
    %c0_411 = arith.constant 0 : index
    %c0_412 = arith.constant 0 : index
    %1065 = vector.load %arg3[%c0_409, %c1_410, %1064, %c0_411, %c0_412] : memref<1x3x9x2x128xbf16, #tpu.memory_space<vmem>>, vector<1x1x1x2x128xbf16>
    %1066 = vector.shape_cast %1065 : vector<1x1x1x2x128xbf16> to vector<2x128xbf16>
    %1067 = arith.extf %1066 : vector<2x128xbf16> to vector<2x128xf32>
    %cst_413 = arith.constant 0.000000e+00 : f32
    %1068 = vector.broadcast %cst_413 : f32 to vector<2x128xf32>
    %1069 = arith.maximumf %1062, %1068 : vector<2x128xf32>
    %1070 = arith.mulf %1062, %1067 : vector<2x128xf32>
    %1071 = arith.subf %1069, %1070 : vector<2x128xf32>
    %1072 = math.absf %1062 : vector<2x128xf32>
    %cst_414 = arith.constant 0.000000e+00 : f32
    %1073 = vector.broadcast %cst_414 : f32 to vector<2x128xf32>
    %1074 = arith.subf %1073, %1072 : vector<2x128xf32>
    %1075 = math.exp %1074 : vector<2x128xf32>
    %cst_415 = arith.constant 1.000000e+00 : f32
    %1076 = vector.broadcast %cst_415 : f32 to vector<2x128xf32>
    %1077 = arith.addf %1076, %1075 : vector<2x128xf32>
    %1078 = math.log %1077 : vector<2x128xf32>
    %1079 = arith.addf %1071, %1078 : vector<2x128xf32>
    %1080 = arith.addf %1058, %1079 : vector<2x128xf32>
    %c1_i32_416 = arith.constant 1 : i32
    %c5_i32_417 = arith.constant 5 : i32
    %1081 = arith.addi %c5_i32_417, %c1_i32_416 : i32
    %c0_418 = arith.constant 0 : index
    %c1_419 = arith.constant 1 : index
    %1082 = arith.index_cast %1081 : i32 to index
    %c0_420 = arith.constant 0 : index
    %c0_421 = arith.constant 0 : index
    %1083 = vector.load %arg2[%c0_418, %c1_419, %1082, %c0_420, %c0_421] : memref<1x3x9x2x128xf32, #tpu.memory_space<vmem>>, vector<1x1x1x2x128xf32>
    %1084 = vector.shape_cast %1083 : vector<1x1x1x2x128xf32> to vector<2x128xf32>
    %c5_i32_422 = arith.constant 5 : i32
    %1085 = arith.addi %c5_i32_422, %c1_i32_416 : i32
    %c0_423 = arith.constant 0 : index
    %c1_424 = arith.constant 1 : index
    %1086 = arith.index_cast %1085 : i32 to index
    %c0_425 = arith.constant 0 : index
    %c0_426 = arith.constant 0 : index
    %1087 = vector.load %arg3[%c0_423, %c1_424, %1086, %c0_425, %c0_426] : memref<1x3x9x2x128xbf16, #tpu.memory_space<vmem>>, vector<1x1x1x2x128xbf16>
    %1088 = vector.shape_cast %1087 : vector<1x1x1x2x128xbf16> to vector<2x128xbf16>
    %1089 = arith.extf %1088 : vector<2x128xbf16> to vector<2x128xf32>
    %cst_427 = arith.constant 0.000000e+00 : f32
    %1090 = vector.broadcast %cst_427 : f32 to vector<2x128xf32>
    %1091 = arith.maximumf %1084, %1090 : vector<2x128xf32>
    %1092 = arith.mulf %1084, %1089 : vector<2x128xf32>
    %1093 = arith.subf %1091, %1092 : vector<2x128xf32>
    %1094 = math.absf %1084 : vector<2x128xf32>
    %cst_428 = arith.constant 0.000000e+00 : f32
    %1095 = vector.broadcast %cst_428 : f32 to vector<2x128xf32>
    %1096 = arith.subf %1095, %1094 : vector<2x128xf32>
    %1097 = math.exp %1096 : vector<2x128xf32>
    %cst_429 = arith.constant 1.000000e+00 : f32
    %1098 = vector.broadcast %cst_429 : f32 to vector<2x128xf32>
    %1099 = arith.addf %1098, %1097 : vector<2x128xf32>
    %1100 = math.log %1099 : vector<2x128xf32>
    %1101 = arith.addf %1093, %1100 : vector<2x128xf32>
    %1102 = arith.addf %1080, %1101 : vector<2x128xf32>
    %c2_i32_430 = arith.constant 2 : i32
    %c5_i32_431 = arith.constant 5 : i32
    %1103 = arith.addi %c5_i32_431, %c2_i32_430 : i32
    %c0_432 = arith.constant 0 : index
    %c1_433 = arith.constant 1 : index
    %1104 = arith.index_cast %1103 : i32 to index
    %c0_434 = arith.constant 0 : index
    %c0_435 = arith.constant 0 : index
    %1105 = vector.load %arg2[%c0_432, %c1_433, %1104, %c0_434, %c0_435] : memref<1x3x9x2x128xf32, #tpu.memory_space<vmem>>, vector<1x1x1x2x128xf32>
    %1106 = vector.shape_cast %1105 : vector<1x1x1x2x128xf32> to vector<2x128xf32>
    %c5_i32_436 = arith.constant 5 : i32
    %1107 = arith.addi %c5_i32_436, %c2_i32_430 : i32
    %c0_437 = arith.constant 0 : index
    %c1_438 = arith.constant 1 : index
    %1108 = arith.index_cast %1107 : i32 to index
    %c0_439 = arith.constant 0 : index
    %c0_440 = arith.constant 0 : index
    %1109 = vector.load %arg3[%c0_437, %c1_438, %1108, %c0_439, %c0_440] : memref<1x3x9x2x128xbf16, #tpu.memory_space<vmem>>, vector<1x1x1x2x128xbf16>
    %1110 = vector.shape_cast %1109 : vector<1x1x1x2x128xbf16> to vector<2x128xbf16>
    %1111 = arith.extf %1110 : vector<2x128xbf16> to vector<2x128xf32>
    %cst_441 = arith.constant 0.000000e+00 : f32
    %1112 = vector.broadcast %cst_441 : f32 to vector<2x128xf32>
    %1113 = arith.maximumf %1106, %1112 : vector<2x128xf32>
    %1114 = arith.mulf %1106, %1111 : vector<2x128xf32>
    %1115 = arith.subf %1113, %1114 : vector<2x128xf32>
    %1116 = math.absf %1106 : vector<2x128xf32>
    %cst_442 = arith.constant 0.000000e+00 : f32
    %1117 = vector.broadcast %cst_442 : f32 to vector<2x128xf32>
    %1118 = arith.subf %1117, %1116 : vector<2x128xf32>
    %1119 = math.exp %1118 : vector<2x128xf32>
    %cst_443 = arith.constant 1.000000e+00 : f32
    %1120 = vector.broadcast %cst_443 : f32 to vector<2x128xf32>
    %1121 = arith.addf %1120, %1119 : vector<2x128xf32>
    %1122 = math.log %1121 : vector<2x128xf32>
    %1123 = arith.addf %1115, %1122 : vector<2x128xf32>
    %1124 = arith.addf %1102, %1123 : vector<2x128xf32>
    %c3_i32_444 = arith.constant 3 : i32
    %c5_i32_445 = arith.constant 5 : i32
    %1125 = arith.addi %c5_i32_445, %c3_i32_444 : i32
    %c0_446 = arith.constant 0 : index
    %c1_447 = arith.constant 1 : index
    %1126 = arith.index_cast %1125 : i32 to index
    %c0_448 = arith.constant 0 : index
    %c0_449 = arith.constant 0 : index
    %1127 = vector.load %arg2[%c0_446, %c1_447, %1126, %c0_448, %c0_449] : memref<1x3x9x2x128xf32, #tpu.memory_space<vmem>>, vector<1x1x1x2x128xf32>
    %1128 = vector.shape_cast %1127 : vector<1x1x1x2x128xf32> to vector<2x128xf32>
    %c5_i32_450 = arith.constant 5 : i32
    %1129 = arith.addi %c5_i32_450, %c3_i32_444 : i32
    %c0_451 = arith.constant 0 : index
    %c1_452 = arith.constant 1 : index
    %1130 = arith.index_cast %1129 : i32 to index
    %c0_453 = arith.constant 0 : index
    %c0_454 = arith.constant 0 : index
    %1131 = vector.load %arg3[%c0_451, %c1_452, %1130, %c0_453, %c0_454] : memref<1x3x9x2x128xbf16, #tpu.memory_space<vmem>>, vector<1x1x1x2x128xbf16>
    %1132 = vector.shape_cast %1131 : vector<1x1x1x2x128xbf16> to vector<2x128xbf16>
    %1133 = arith.extf %1132 : vector<2x128xbf16> to vector<2x128xf32>
    %cst_455 = arith.constant 0.000000e+00 : f32
    %1134 = vector.broadcast %cst_455 : f32 to vector<2x128xf32>
    %1135 = arith.maximumf %1128, %1134 : vector<2x128xf32>
    %1136 = arith.mulf %1128, %1133 : vector<2x128xf32>
    %1137 = arith.subf %1135, %1136 : vector<2x128xf32>
    %1138 = math.absf %1128 : vector<2x128xf32>
    %cst_456 = arith.constant 0.000000e+00 : f32
    %1139 = vector.broadcast %cst_456 : f32 to vector<2x128xf32>
    %1140 = arith.subf %1139, %1138 : vector<2x128xf32>
    %1141 = math.exp %1140 : vector<2x128xf32>
    %cst_457 = arith.constant 1.000000e+00 : f32
    %1142 = vector.broadcast %cst_457 : f32 to vector<2x128xf32>
    %1143 = arith.addf %1142, %1141 : vector<2x128xf32>
    %1144 = math.log %1143 : vector<2x128xf32>
    %1145 = arith.addf %1137, %1144 : vector<2x128xf32>
    %1146 = arith.addf %1124, %1145 : vector<2x128xf32>
    %c4_i32_458 = arith.constant 4 : i32
    %1147 = arith.addf %578, %1039 : vector<2x128xf32>
    %1148 = arith.addf %1147, %1057 : vector<2x128xf32>
    %1149 = arith.mulf %1146, %1009 : vector<2x128xf32>
    %1150 = arith.addf %1148, %1149 : vector<2x128xf32>
    %1151 = arith.addf %579, %1009 : vector<2x128xf32>
    %c0_459 = arith.constant 0 : index
    %c2_460 = arith.constant 2 : index
    %c0_461 = arith.constant 0 : index
    %c0_462 = arith.constant 0 : index
    %c0_463 = arith.constant 0 : index
    %1152 = vector.load %arg2[%c0_459, %c2_460, %c0_461, %c0_462, %c0_463] : memref<1x3x9x2x128xf32, #tpu.memory_space<vmem>>, vector<1x1x1x2x128xf32>
    %1153 = vector.shape_cast %1152 : vector<1x1x1x2x128xf32> to vector<2x128xf32>
    %c0_464 = arith.constant 0 : index
    %c2_465 = arith.constant 2 : index
    %c1_466 = arith.constant 1 : index
    %c0_467 = arith.constant 0 : index
    %c0_468 = arith.constant 0 : index
    %1154 = vector.load %arg2[%c0_464, %c2_465, %c1_466, %c0_467, %c0_468] : memref<1x3x9x2x128xf32, #tpu.memory_space<vmem>>, vector<1x1x1x2x128xf32>
    %1155 = vector.shape_cast %1154 : vector<1x1x1x2x128xf32> to vector<2x128xf32>
    %c0_469 = arith.constant 0 : index
    %c2_470 = arith.constant 2 : index
    %c2_471 = arith.constant 2 : index
    %c0_472 = arith.constant 0 : index
    %c0_473 = arith.constant 0 : index
    %1156 = vector.load %arg2[%c0_469, %c2_470, %c2_471, %c0_472, %c0_473] : memref<1x3x9x2x128xf32, #tpu.memory_space<vmem>>, vector<1x1x1x2x128xf32>
    %1157 = vector.shape_cast %1156 : vector<1x1x1x2x128xf32> to vector<2x128xf32>
    %c0_474 = arith.constant 0 : index
    %c2_475 = arith.constant 2 : index
    %c3_476 = arith.constant 3 : index
    %c0_477 = arith.constant 0 : index
    %c0_478 = arith.constant 0 : index
    %1158 = vector.load %arg2[%c0_474, %c2_475, %c3_476, %c0_477, %c0_478] : memref<1x3x9x2x128xf32, #tpu.memory_space<vmem>>, vector<1x1x1x2x128xf32>
    %1159 = vector.shape_cast %1158 : vector<1x1x1x2x128xf32> to vector<2x128xf32>
    %c0_479 = arith.constant 0 : index
    %c2_480 = arith.constant 2 : index
    %c4_481 = arith.constant 4 : index
    %c0_482 = arith.constant 0 : index
    %c0_483 = arith.constant 0 : index
    %1160 = vector.load %arg2[%c0_479, %c2_480, %c4_481, %c0_482, %c0_483] : memref<1x3x9x2x128xf32, #tpu.memory_space<vmem>>, vector<1x1x1x2x128xf32>
    %1161 = vector.shape_cast %1160 : vector<1x1x1x2x128xf32> to vector<2x128xf32>
    %cst_484 = arith.constant 0.000000e+00 : f32
    %1162 = vector.broadcast %cst_484 : f32 to vector<2x128xf32>
    %1163 = arith.subf %1162, %1153 : vector<2x128xf32>
    %1164 = math.exp %1163 : vector<2x128xf32>
    %cst_485 = arith.constant 1.000000e+00 : f32
    %1165 = vector.broadcast %cst_485 : f32 to vector<2x128xf32>
    %1166 = arith.addf %1165, %1164 : vector<2x128xf32>
    %1167 = tpu.reciprocal %1166 {approx = true} : vector<2x128xf32> -> vector<2x128xf32>
    %cst_486 = arith.constant 0.000000e+00 : f32
    %1168 = vector.broadcast %cst_486 : f32 to vector<2x128xf32>
    %1169 = arith.subf %1168, %1155 : vector<2x128xf32>
    %1170 = math.exp %1169 : vector<2x128xf32>
    %cst_487 = arith.constant 1.000000e+00 : f32
    %1171 = vector.broadcast %cst_487 : f32 to vector<2x128xf32>
    %1172 = arith.addf %1171, %1170 : vector<2x128xf32>
    %1173 = tpu.reciprocal %1172 {approx = true} : vector<2x128xf32> -> vector<2x128xf32>
    %1174 = arith.addf %1167, %1 : vector<2x128xf32>
    %1175 = arith.addf %1173, %3 : vector<2x128xf32>
    %1176 = math.exp %1157 : vector<2x128xf32>
    %cst_488 = arith.constant 4.000000e+00 : f32
    %1177 = vector.broadcast %cst_488 : f32 to vector<2x128xf32>
    %1178 = arith.mulf %1176, %1177 : vector<2x128xf32>
    %1179 = math.exp %1159 : vector<2x128xf32>
    %cst_489 = arith.constant 2.000000e+00 : f32
    %1180 = vector.broadcast %cst_489 : f32 to vector<2x128xf32>
    %1181 = arith.mulf %1179, %1180 : vector<2x128xf32>
    %cst_490 = arith.constant 5.000000e-01 : f32
    %1182 = vector.broadcast %cst_490 : f32 to vector<2x128xf32>
    %1183 = arith.mulf %1182, %1178 : vector<2x128xf32>
    %1184 = arith.subf %1174, %1183 : vector<2x128xf32>
    %cst_491 = arith.constant 5.000000e-01 : f32
    %1185 = vector.broadcast %cst_491 : f32 to vector<2x128xf32>
    %1186 = arith.mulf %1185, %1178 : vector<2x128xf32>
    %1187 = arith.addf %1174, %1186 : vector<2x128xf32>
    %cst_492 = arith.constant 5.000000e-01 : f32
    %1188 = vector.broadcast %cst_492 : f32 to vector<2x128xf32>
    %1189 = arith.mulf %1188, %1181 : vector<2x128xf32>
    %1190 = arith.subf %1175, %1189 : vector<2x128xf32>
    %cst_493 = arith.constant 5.000000e-01 : f32
    %1191 = vector.broadcast %cst_493 : f32 to vector<2x128xf32>
    %1192 = arith.mulf %1191, %1181 : vector<2x128xf32>
    %1193 = arith.addf %1175, %1192 : vector<2x128xf32>
    %1194 = arith.mulf %1178, %1181 : vector<2x128xf32>
    %cst_494 = arith.constant 0.000000e+00 : f32
    %1195 = vector.broadcast %cst_494 : f32 to vector<2x128xf32>
    %c0_i32_495 = arith.constant 0 : i32
    %c4_i32_496 = arith.constant 4 : i32
    %1196 = arith.muli %c4_i32_496, %c0_i32_495 : i32
    %1197 = arith.index_cast %7 : i32 to index
    %1198 = arith.index_cast %1196 : i32 to index
    %1199 = memref.load %arg1[%1197, %1198] : memref<2x32xf32, #tpu.memory_space<smem>>
    %c1_i32_497 = arith.constant 1 : i32
    %1200 = arith.addi %1196, %c1_i32_497 : i32
    %1201 = arith.index_cast %7 : i32 to index
    %1202 = arith.index_cast %1200 : i32 to index
    %1203 = memref.load %arg1[%1201, %1202] : memref<2x32xf32, #tpu.memory_space<smem>>
    %c2_i32_498 = arith.constant 2 : i32
    %1204 = arith.addi %1196, %c2_i32_498 : i32
    %1205 = arith.index_cast %7 : i32 to index
    %1206 = arith.index_cast %1204 : i32 to index
    %1207 = memref.load %arg1[%1205, %1206] : memref<2x32xf32, #tpu.memory_space<smem>>
    %c3_i32_499 = arith.constant 3 : i32
    %1208 = arith.addi %1196, %c3_i32_499 : i32
    %1209 = arith.index_cast %7 : i32 to index
    %1210 = arith.index_cast %1208 : i32 to index
    %1211 = memref.load %arg1[%1209, %1210] : memref<2x32xf32, #tpu.memory_space<smem>>
    %cst_500 = arith.constant 5.000000e-01 : f32
    %1212 = arith.mulf %cst_500, %1207 : f32
    %1213 = arith.subf %1199, %1212 : f32
    %cst_501 = arith.constant 5.000000e-01 : f32
    %1214 = arith.mulf %cst_501, %1207 : f32
    %1215 = arith.addf %1199, %1214 : f32
    %cst_502 = arith.constant 5.000000e-01 : f32
    %1216 = arith.mulf %cst_502, %1211 : f32
    %1217 = arith.subf %1203, %1216 : f32
    %cst_503 = arith.constant 5.000000e-01 : f32
    %1218 = arith.mulf %cst_503, %1211 : f32
    %1219 = arith.addf %1203, %1218 : f32
    %1220 = vector.broadcast %1215 : f32 to vector<2x128xf32>
    %1221 = arith.minimumf %1220, %1187 : vector<2x128xf32>
    %1222 = vector.broadcast %1213 : f32 to vector<2x128xf32>
    %1223 = arith.maximumf %1222, %1184 : vector<2x128xf32>
    %1224 = arith.subf %1221, %1223 : vector<2x128xf32>
    %cst_504 = arith.constant 0.000000e+00 : f32
    %1225 = vector.broadcast %cst_504 : f32 to vector<2x128xf32>
    %1226 = arith.maximumf %1224, %1225 : vector<2x128xf32>
    %1227 = vector.broadcast %1219 : f32 to vector<2x128xf32>
    %1228 = arith.minimumf %1227, %1193 : vector<2x128xf32>
    %1229 = vector.broadcast %1217 : f32 to vector<2x128xf32>
    %1230 = arith.maximumf %1229, %1190 : vector<2x128xf32>
    %1231 = arith.subf %1228, %1230 : vector<2x128xf32>
    %cst_505 = arith.constant 0.000000e+00 : f32
    %1232 = vector.broadcast %cst_505 : f32 to vector<2x128xf32>
    %1233 = arith.maximumf %1231, %1232 : vector<2x128xf32>
    %1234 = arith.mulf %1226, %1233 : vector<2x128xf32>
    %1235 = arith.mulf %1207, %1211 : f32
    %1236 = vector.broadcast %1235 : f32 to vector<2x128xf32>
    %1237 = arith.addf %1236, %1194 : vector<2x128xf32>
    %1238 = arith.subf %1237, %1234 : vector<2x128xf32>
    %cst_506 = arith.constant 5.000000e-01 : f32
    %1239 = vector.broadcast %cst_506 : f32 to vector<2x128xf32>
    %1240 = arith.mulf %1239, %1238 : vector<2x128xf32>
    %1241 = arith.subf %1234, %1240 : vector<2x128xf32>
    %1242 = arith.maximumf %1195, %1241 : vector<2x128xf32>
    %c1_i32_507 = arith.constant 1 : i32
    %c4_i32_508 = arith.constant 4 : i32
    %1243 = arith.muli %c4_i32_508, %c1_i32_507 : i32
    %1244 = arith.index_cast %7 : i32 to index
    %1245 = arith.index_cast %1243 : i32 to index
    %1246 = memref.load %arg1[%1244, %1245] : memref<2x32xf32, #tpu.memory_space<smem>>
    %c1_i32_509 = arith.constant 1 : i32
    %1247 = arith.addi %1243, %c1_i32_509 : i32
    %1248 = arith.index_cast %7 : i32 to index
    %1249 = arith.index_cast %1247 : i32 to index
    %1250 = memref.load %arg1[%1248, %1249] : memref<2x32xf32, #tpu.memory_space<smem>>
    %c2_i32_510 = arith.constant 2 : i32
    %1251 = arith.addi %1243, %c2_i32_510 : i32
    %1252 = arith.index_cast %7 : i32 to index
    %1253 = arith.index_cast %1251 : i32 to index
    %1254 = memref.load %arg1[%1252, %1253] : memref<2x32xf32, #tpu.memory_space<smem>>
    %c3_i32_511 = arith.constant 3 : i32
    %1255 = arith.addi %1243, %c3_i32_511 : i32
    %1256 = arith.index_cast %7 : i32 to index
    %1257 = arith.index_cast %1255 : i32 to index
    %1258 = memref.load %arg1[%1256, %1257] : memref<2x32xf32, #tpu.memory_space<smem>>
    %cst_512 = arith.constant 5.000000e-01 : f32
    %1259 = arith.mulf %cst_512, %1254 : f32
    %1260 = arith.subf %1246, %1259 : f32
    %cst_513 = arith.constant 5.000000e-01 : f32
    %1261 = arith.mulf %cst_513, %1254 : f32
    %1262 = arith.addf %1246, %1261 : f32
    %cst_514 = arith.constant 5.000000e-01 : f32
    %1263 = arith.mulf %cst_514, %1258 : f32
    %1264 = arith.subf %1250, %1263 : f32
    %cst_515 = arith.constant 5.000000e-01 : f32
    %1265 = arith.mulf %cst_515, %1258 : f32
    %1266 = arith.addf %1250, %1265 : f32
    %1267 = vector.broadcast %1262 : f32 to vector<2x128xf32>
    %1268 = arith.minimumf %1267, %1187 : vector<2x128xf32>
    %1269 = vector.broadcast %1260 : f32 to vector<2x128xf32>
    %1270 = arith.maximumf %1269, %1184 : vector<2x128xf32>
    %1271 = arith.subf %1268, %1270 : vector<2x128xf32>
    %cst_516 = arith.constant 0.000000e+00 : f32
    %1272 = vector.broadcast %cst_516 : f32 to vector<2x128xf32>
    %1273 = arith.maximumf %1271, %1272 : vector<2x128xf32>
    %1274 = vector.broadcast %1266 : f32 to vector<2x128xf32>
    %1275 = arith.minimumf %1274, %1193 : vector<2x128xf32>
    %1276 = vector.broadcast %1264 : f32 to vector<2x128xf32>
    %1277 = arith.maximumf %1276, %1190 : vector<2x128xf32>
    %1278 = arith.subf %1275, %1277 : vector<2x128xf32>
    %cst_517 = arith.constant 0.000000e+00 : f32
    %1279 = vector.broadcast %cst_517 : f32 to vector<2x128xf32>
    %1280 = arith.maximumf %1278, %1279 : vector<2x128xf32>
    %1281 = arith.mulf %1273, %1280 : vector<2x128xf32>
    %1282 = arith.mulf %1254, %1258 : f32
    %1283 = vector.broadcast %1282 : f32 to vector<2x128xf32>
    %1284 = arith.addf %1283, %1194 : vector<2x128xf32>
    %1285 = arith.subf %1284, %1281 : vector<2x128xf32>
    %cst_518 = arith.constant 5.000000e-01 : f32
    %1286 = vector.broadcast %cst_518 : f32 to vector<2x128xf32>
    %1287 = arith.mulf %1286, %1285 : vector<2x128xf32>
    %1288 = arith.subf %1281, %1287 : vector<2x128xf32>
    %1289 = arith.maximumf %1242, %1288 : vector<2x128xf32>
    %c2_i32_519 = arith.constant 2 : i32
    %c4_i32_520 = arith.constant 4 : i32
    %1290 = arith.muli %c4_i32_520, %c2_i32_519 : i32
    %1291 = arith.index_cast %7 : i32 to index
    %1292 = arith.index_cast %1290 : i32 to index
    %1293 = memref.load %arg1[%1291, %1292] : memref<2x32xf32, #tpu.memory_space<smem>>
    %c1_i32_521 = arith.constant 1 : i32
    %1294 = arith.addi %1290, %c1_i32_521 : i32
    %1295 = arith.index_cast %7 : i32 to index
    %1296 = arith.index_cast %1294 : i32 to index
    %1297 = memref.load %arg1[%1295, %1296] : memref<2x32xf32, #tpu.memory_space<smem>>
    %c2_i32_522 = arith.constant 2 : i32
    %1298 = arith.addi %1290, %c2_i32_522 : i32
    %1299 = arith.index_cast %7 : i32 to index
    %1300 = arith.index_cast %1298 : i32 to index
    %1301 = memref.load %arg1[%1299, %1300] : memref<2x32xf32, #tpu.memory_space<smem>>
    %c3_i32_523 = arith.constant 3 : i32
    %1302 = arith.addi %1290, %c3_i32_523 : i32
    %1303 = arith.index_cast %7 : i32 to index
    %1304 = arith.index_cast %1302 : i32 to index
    %1305 = memref.load %arg1[%1303, %1304] : memref<2x32xf32, #tpu.memory_space<smem>>
    %cst_524 = arith.constant 5.000000e-01 : f32
    %1306 = arith.mulf %cst_524, %1301 : f32
    %1307 = arith.subf %1293, %1306 : f32
    %cst_525 = arith.constant 5.000000e-01 : f32
    %1308 = arith.mulf %cst_525, %1301 : f32
    %1309 = arith.addf %1293, %1308 : f32
    %cst_526 = arith.constant 5.000000e-01 : f32
    %1310 = arith.mulf %cst_526, %1305 : f32
    %1311 = arith.subf %1297, %1310 : f32
    %cst_527 = arith.constant 5.000000e-01 : f32
    %1312 = arith.mulf %cst_527, %1305 : f32
    %1313 = arith.addf %1297, %1312 : f32
    %1314 = vector.broadcast %1309 : f32 to vector<2x128xf32>
    %1315 = arith.minimumf %1314, %1187 : vector<2x128xf32>
    %1316 = vector.broadcast %1307 : f32 to vector<2x128xf32>
    %1317 = arith.maximumf %1316, %1184 : vector<2x128xf32>
    %1318 = arith.subf %1315, %1317 : vector<2x128xf32>
    %cst_528 = arith.constant 0.000000e+00 : f32
    %1319 = vector.broadcast %cst_528 : f32 to vector<2x128xf32>
    %1320 = arith.maximumf %1318, %1319 : vector<2x128xf32>
    %1321 = vector.broadcast %1313 : f32 to vector<2x128xf32>
    %1322 = arith.minimumf %1321, %1193 : vector<2x128xf32>
    %1323 = vector.broadcast %1311 : f32 to vector<2x128xf32>
    %1324 = arith.maximumf %1323, %1190 : vector<2x128xf32>
    %1325 = arith.subf %1322, %1324 : vector<2x128xf32>
    %cst_529 = arith.constant 0.000000e+00 : f32
    %1326 = vector.broadcast %cst_529 : f32 to vector<2x128xf32>
    %1327 = arith.maximumf %1325, %1326 : vector<2x128xf32>
    %1328 = arith.mulf %1320, %1327 : vector<2x128xf32>
    %1329 = arith.mulf %1301, %1305 : f32
    %1330 = vector.broadcast %1329 : f32 to vector<2x128xf32>
    %1331 = arith.addf %1330, %1194 : vector<2x128xf32>
    %1332 = arith.subf %1331, %1328 : vector<2x128xf32>
    %cst_530 = arith.constant 5.000000e-01 : f32
    %1333 = vector.broadcast %cst_530 : f32 to vector<2x128xf32>
    %1334 = arith.mulf %1333, %1332 : vector<2x128xf32>
    %1335 = arith.subf %1328, %1334 : vector<2x128xf32>
    %1336 = arith.maximumf %1289, %1335 : vector<2x128xf32>
    %c3_i32_531 = arith.constant 3 : i32
    %c4_i32_532 = arith.constant 4 : i32
    %1337 = arith.muli %c4_i32_532, %c3_i32_531 : i32
    %1338 = arith.index_cast %7 : i32 to index
    %1339 = arith.index_cast %1337 : i32 to index
    %1340 = memref.load %arg1[%1338, %1339] : memref<2x32xf32, #tpu.memory_space<smem>>
    %c1_i32_533 = arith.constant 1 : i32
    %1341 = arith.addi %1337, %c1_i32_533 : i32
    %1342 = arith.index_cast %7 : i32 to index
    %1343 = arith.index_cast %1341 : i32 to index
    %1344 = memref.load %arg1[%1342, %1343] : memref<2x32xf32, #tpu.memory_space<smem>>
    %c2_i32_534 = arith.constant 2 : i32
    %1345 = arith.addi %1337, %c2_i32_534 : i32
    %1346 = arith.index_cast %7 : i32 to index
    %1347 = arith.index_cast %1345 : i32 to index
    %1348 = memref.load %arg1[%1346, %1347] : memref<2x32xf32, #tpu.memory_space<smem>>
    %c3_i32_535 = arith.constant 3 : i32
    %1349 = arith.addi %1337, %c3_i32_535 : i32
    %1350 = arith.index_cast %7 : i32 to index
    %1351 = arith.index_cast %1349 : i32 to index
    %1352 = memref.load %arg1[%1350, %1351] : memref<2x32xf32, #tpu.memory_space<smem>>
    %cst_536 = arith.constant 5.000000e-01 : f32
    %1353 = arith.mulf %cst_536, %1348 : f32
    %1354 = arith.subf %1340, %1353 : f32
    %cst_537 = arith.constant 5.000000e-01 : f32
    %1355 = arith.mulf %cst_537, %1348 : f32
    %1356 = arith.addf %1340, %1355 : f32
    %cst_538 = arith.constant 5.000000e-01 : f32
    %1357 = arith.mulf %cst_538, %1352 : f32
    %1358 = arith.subf %1344, %1357 : f32
    %cst_539 = arith.constant 5.000000e-01 : f32
    %1359 = arith.mulf %cst_539, %1352 : f32
    %1360 = arith.addf %1344, %1359 : f32
    %1361 = vector.broadcast %1356 : f32 to vector<2x128xf32>
    %1362 = arith.minimumf %1361, %1187 : vector<2x128xf32>
    %1363 = vector.broadcast %1354 : f32 to vector<2x128xf32>
    %1364 = arith.maximumf %1363, %1184 : vector<2x128xf32>
    %1365 = arith.subf %1362, %1364 : vector<2x128xf32>
    %cst_540 = arith.constant 0.000000e+00 : f32
    %1366 = vector.broadcast %cst_540 : f32 to vector<2x128xf32>
    %1367 = arith.maximumf %1365, %1366 : vector<2x128xf32>
    %1368 = vector.broadcast %1360 : f32 to vector<2x128xf32>
    %1369 = arith.minimumf %1368, %1193 : vector<2x128xf32>
    %1370 = vector.broadcast %1358 : f32 to vector<2x128xf32>
    %1371 = arith.maximumf %1370, %1190 : vector<2x128xf32>
    %1372 = arith.subf %1369, %1371 : vector<2x128xf32>
    %cst_541 = arith.constant 0.000000e+00 : f32
    %1373 = vector.broadcast %cst_541 : f32 to vector<2x128xf32>
    %1374 = arith.maximumf %1372, %1373 : vector<2x128xf32>
    %1375 = arith.mulf %1367, %1374 : vector<2x128xf32>
    %1376 = arith.mulf %1348, %1352 : f32
    %1377 = vector.broadcast %1376 : f32 to vector<2x128xf32>
    %1378 = arith.addf %1377, %1194 : vector<2x128xf32>
    %1379 = arith.subf %1378, %1375 : vector<2x128xf32>
    %cst_542 = arith.constant 5.000000e-01 : f32
    %1380 = vector.broadcast %cst_542 : f32 to vector<2x128xf32>
    %1381 = arith.mulf %1380, %1379 : vector<2x128xf32>
    %1382 = arith.subf %1375, %1381 : vector<2x128xf32>
    %1383 = arith.maximumf %1336, %1382 : vector<2x128xf32>
    %c4_i32_543 = arith.constant 4 : i32
    %c4_i32_544 = arith.constant 4 : i32
    %1384 = arith.muli %c4_i32_544, %c4_i32_543 : i32
    %1385 = arith.index_cast %7 : i32 to index
    %1386 = arith.index_cast %1384 : i32 to index
    %1387 = memref.load %arg1[%1385, %1386] : memref<2x32xf32, #tpu.memory_space<smem>>
    %c1_i32_545 = arith.constant 1 : i32
    %1388 = arith.addi %1384, %c1_i32_545 : i32
    %1389 = arith.index_cast %7 : i32 to index
    %1390 = arith.index_cast %1388 : i32 to index
    %1391 = memref.load %arg1[%1389, %1390] : memref<2x32xf32, #tpu.memory_space<smem>>
    %c2_i32_546 = arith.constant 2 : i32
    %1392 = arith.addi %1384, %c2_i32_546 : i32
    %1393 = arith.index_cast %7 : i32 to index
    %1394 = arith.index_cast %1392 : i32 to index
    %1395 = memref.load %arg1[%1393, %1394] : memref<2x32xf32, #tpu.memory_space<smem>>
    %c3_i32_547 = arith.constant 3 : i32
    %1396 = arith.addi %1384, %c3_i32_547 : i32
    %1397 = arith.index_cast %7 : i32 to index
    %1398 = arith.index_cast %1396 : i32 to index
    %1399 = memref.load %arg1[%1397, %1398] : memref<2x32xf32, #tpu.memory_space<smem>>
    %cst_548 = arith.constant 5.000000e-01 : f32
    %1400 = arith.mulf %cst_548, %1395 : f32
    %1401 = arith.subf %1387, %1400 : f32
    %cst_549 = arith.constant 5.000000e-01 : f32
    %1402 = arith.mulf %cst_549, %1395 : f32
    %1403 = arith.addf %1387, %1402 : f32
    %cst_550 = arith.constant 5.000000e-01 : f32
    %1404 = arith.mulf %cst_550, %1399 : f32
    %1405 = arith.subf %1391, %1404 : f32
    %cst_551 = arith.constant 5.000000e-01 : f32
    %1406 = arith.mulf %cst_551, %1399 : f32
    %1407 = arith.addf %1391, %1406 : f32
    %1408 = vector.broadcast %1403 : f32 to vector<2x128xf32>
    %1409 = arith.minimumf %1408, %1187 : vector<2x128xf32>
    %1410 = vector.broadcast %1401 : f32 to vector<2x128xf32>
    %1411 = arith.maximumf %1410, %1184 : vector<2x128xf32>
    %1412 = arith.subf %1409, %1411 : vector<2x128xf32>
    %cst_552 = arith.constant 0.000000e+00 : f32
    %1413 = vector.broadcast %cst_552 : f32 to vector<2x128xf32>
    %1414 = arith.maximumf %1412, %1413 : vector<2x128xf32>
    %1415 = vector.broadcast %1407 : f32 to vector<2x128xf32>
    %1416 = arith.minimumf %1415, %1193 : vector<2x128xf32>
    %1417 = vector.broadcast %1405 : f32 to vector<2x128xf32>
    %1418 = arith.maximumf %1417, %1190 : vector<2x128xf32>
    %1419 = arith.subf %1416, %1418 : vector<2x128xf32>
    %cst_553 = arith.constant 0.000000e+00 : f32
    %1420 = vector.broadcast %cst_553 : f32 to vector<2x128xf32>
    %1421 = arith.maximumf %1419, %1420 : vector<2x128xf32>
    %1422 = arith.mulf %1414, %1421 : vector<2x128xf32>
    %1423 = arith.mulf %1395, %1399 : f32
    %1424 = vector.broadcast %1423 : f32 to vector<2x128xf32>
    %1425 = arith.addf %1424, %1194 : vector<2x128xf32>
    %1426 = arith.subf %1425, %1422 : vector<2x128xf32>
    %cst_554 = arith.constant 5.000000e-01 : f32
    %1427 = vector.broadcast %cst_554 : f32 to vector<2x128xf32>
    %1428 = arith.mulf %1427, %1426 : vector<2x128xf32>
    %1429 = arith.subf %1422, %1428 : vector<2x128xf32>
    %1430 = arith.maximumf %1383, %1429 : vector<2x128xf32>
    %c5_i32_555 = arith.constant 5 : i32
    %c4_i32_556 = arith.constant 4 : i32
    %1431 = arith.muli %c4_i32_556, %c5_i32_555 : i32
    %1432 = arith.index_cast %7 : i32 to index
    %1433 = arith.index_cast %1431 : i32 to index
    %1434 = memref.load %arg1[%1432, %1433] : memref<2x32xf32, #tpu.memory_space<smem>>
    %c1_i32_557 = arith.constant 1 : i32
    %1435 = arith.addi %1431, %c1_i32_557 : i32
    %1436 = arith.index_cast %7 : i32 to index
    %1437 = arith.index_cast %1435 : i32 to index
    %1438 = memref.load %arg1[%1436, %1437] : memref<2x32xf32, #tpu.memory_space<smem>>
    %c2_i32_558 = arith.constant 2 : i32
    %1439 = arith.addi %1431, %c2_i32_558 : i32
    %1440 = arith.index_cast %7 : i32 to index
    %1441 = arith.index_cast %1439 : i32 to index
    %1442 = memref.load %arg1[%1440, %1441] : memref<2x32xf32, #tpu.memory_space<smem>>
    %c3_i32_559 = arith.constant 3 : i32
    %1443 = arith.addi %1431, %c3_i32_559 : i32
    %1444 = arith.index_cast %7 : i32 to index
    %1445 = arith.index_cast %1443 : i32 to index
    %1446 = memref.load %arg1[%1444, %1445] : memref<2x32xf32, #tpu.memory_space<smem>>
    %cst_560 = arith.constant 5.000000e-01 : f32
    %1447 = arith.mulf %cst_560, %1442 : f32
    %1448 = arith.subf %1434, %1447 : f32
    %cst_561 = arith.constant 5.000000e-01 : f32
    %1449 = arith.mulf %cst_561, %1442 : f32
    %1450 = arith.addf %1434, %1449 : f32
    %cst_562 = arith.constant 5.000000e-01 : f32
    %1451 = arith.mulf %cst_562, %1446 : f32
    %1452 = arith.subf %1438, %1451 : f32
    %cst_563 = arith.constant 5.000000e-01 : f32
    %1453 = arith.mulf %cst_563, %1446 : f32
    %1454 = arith.addf %1438, %1453 : f32
    %1455 = vector.broadcast %1450 : f32 to vector<2x128xf32>
    %1456 = arith.minimumf %1455, %1187 : vector<2x128xf32>
    %1457 = vector.broadcast %1448 : f32 to vector<2x128xf32>
    %1458 = arith.maximumf %1457, %1184 : vector<2x128xf32>
    %1459 = arith.subf %1456, %1458 : vector<2x128xf32>
    %cst_564 = arith.constant 0.000000e+00 : f32
    %1460 = vector.broadcast %cst_564 : f32 to vector<2x128xf32>
    %1461 = arith.maximumf %1459, %1460 : vector<2x128xf32>
    %1462 = vector.broadcast %1454 : f32 to vector<2x128xf32>
    %1463 = arith.minimumf %1462, %1193 : vector<2x128xf32>
    %1464 = vector.broadcast %1452 : f32 to vector<2x128xf32>
    %1465 = arith.maximumf %1464, %1190 : vector<2x128xf32>
    %1466 = arith.subf %1463, %1465 : vector<2x128xf32>
    %cst_565 = arith.constant 0.000000e+00 : f32
    %1467 = vector.broadcast %cst_565 : f32 to vector<2x128xf32>
    %1468 = arith.maximumf %1466, %1467 : vector<2x128xf32>
    %1469 = arith.mulf %1461, %1468 : vector<2x128xf32>
    %1470 = arith.mulf %1442, %1446 : f32
    %1471 = vector.broadcast %1470 : f32 to vector<2x128xf32>
    %1472 = arith.addf %1471, %1194 : vector<2x128xf32>
    %1473 = arith.subf %1472, %1469 : vector<2x128xf32>
    %cst_566 = arith.constant 5.000000e-01 : f32
    %1474 = vector.broadcast %cst_566 : f32 to vector<2x128xf32>
    %1475 = arith.mulf %1474, %1473 : vector<2x128xf32>
    %1476 = arith.subf %1469, %1475 : vector<2x128xf32>
    %1477 = arith.maximumf %1430, %1476 : vector<2x128xf32>
    %c6_i32_567 = arith.constant 6 : i32
    %c4_i32_568 = arith.constant 4 : i32
    %1478 = arith.muli %c4_i32_568, %c6_i32_567 : i32
    %1479 = arith.index_cast %7 : i32 to index
    %1480 = arith.index_cast %1478 : i32 to index
    %1481 = memref.load %arg1[%1479, %1480] : memref<2x32xf32, #tpu.memory_space<smem>>
    %c1_i32_569 = arith.constant 1 : i32
    %1482 = arith.addi %1478, %c1_i32_569 : i32
    %1483 = arith.index_cast %7 : i32 to index
    %1484 = arith.index_cast %1482 : i32 to index
    %1485 = memref.load %arg1[%1483, %1484] : memref<2x32xf32, #tpu.memory_space<smem>>
    %c2_i32_570 = arith.constant 2 : i32
    %1486 = arith.addi %1478, %c2_i32_570 : i32
    %1487 = arith.index_cast %7 : i32 to index
    %1488 = arith.index_cast %1486 : i32 to index
    %1489 = memref.load %arg1[%1487, %1488] : memref<2x32xf32, #tpu.memory_space<smem>>
    %c3_i32_571 = arith.constant 3 : i32
    %1490 = arith.addi %1478, %c3_i32_571 : i32
    %1491 = arith.index_cast %7 : i32 to index
    %1492 = arith.index_cast %1490 : i32 to index
    %1493 = memref.load %arg1[%1491, %1492] : memref<2x32xf32, #tpu.memory_space<smem>>
    %cst_572 = arith.constant 5.000000e-01 : f32
    %1494 = arith.mulf %cst_572, %1489 : f32
    %1495 = arith.subf %1481, %1494 : f32
    %cst_573 = arith.constant 5.000000e-01 : f32
    %1496 = arith.mulf %cst_573, %1489 : f32
    %1497 = arith.addf %1481, %1496 : f32
    %cst_574 = arith.constant 5.000000e-01 : f32
    %1498 = arith.mulf %cst_574, %1493 : f32
    %1499 = arith.subf %1485, %1498 : f32
    %cst_575 = arith.constant 5.000000e-01 : f32
    %1500 = arith.mulf %cst_575, %1493 : f32
    %1501 = arith.addf %1485, %1500 : f32
    %1502 = vector.broadcast %1497 : f32 to vector<2x128xf32>
    %1503 = arith.minimumf %1502, %1187 : vector<2x128xf32>
    %1504 = vector.broadcast %1495 : f32 to vector<2x128xf32>
    %1505 = arith.maximumf %1504, %1184 : vector<2x128xf32>
    %1506 = arith.subf %1503, %1505 : vector<2x128xf32>
    %cst_576 = arith.constant 0.000000e+00 : f32
    %1507 = vector.broadcast %cst_576 : f32 to vector<2x128xf32>
    %1508 = arith.maximumf %1506, %1507 : vector<2x128xf32>
    %1509 = vector.broadcast %1501 : f32 to vector<2x128xf32>
    %1510 = arith.minimumf %1509, %1193 : vector<2x128xf32>
    %1511 = vector.broadcast %1499 : f32 to vector<2x128xf32>
    %1512 = arith.maximumf %1511, %1190 : vector<2x128xf32>
    %1513 = arith.subf %1510, %1512 : vector<2x128xf32>
    %cst_577 = arith.constant 0.000000e+00 : f32
    %1514 = vector.broadcast %cst_577 : f32 to vector<2x128xf32>
    %1515 = arith.maximumf %1513, %1514 : vector<2x128xf32>
    %1516 = arith.mulf %1508, %1515 : vector<2x128xf32>
    %1517 = arith.mulf %1489, %1493 : f32
    %1518 = vector.broadcast %1517 : f32 to vector<2x128xf32>
    %1519 = arith.addf %1518, %1194 : vector<2x128xf32>
    %1520 = arith.subf %1519, %1516 : vector<2x128xf32>
    %cst_578 = arith.constant 5.000000e-01 : f32
    %1521 = vector.broadcast %cst_578 : f32 to vector<2x128xf32>
    %1522 = arith.mulf %1521, %1520 : vector<2x128xf32>
    %1523 = arith.subf %1516, %1522 : vector<2x128xf32>
    %1524 = arith.maximumf %1477, %1523 : vector<2x128xf32>
    %c7_i32_579 = arith.constant 7 : i32
    %c4_i32_580 = arith.constant 4 : i32
    %1525 = arith.muli %c4_i32_580, %c7_i32_579 : i32
    %1526 = arith.index_cast %7 : i32 to index
    %1527 = arith.index_cast %1525 : i32 to index
    %1528 = memref.load %arg1[%1526, %1527] : memref<2x32xf32, #tpu.memory_space<smem>>
    %c1_i32_581 = arith.constant 1 : i32
    %1529 = arith.addi %1525, %c1_i32_581 : i32
    %1530 = arith.index_cast %7 : i32 to index
    %1531 = arith.index_cast %1529 : i32 to index
    %1532 = memref.load %arg1[%1530, %1531] : memref<2x32xf32, #tpu.memory_space<smem>>
    %c2_i32_582 = arith.constant 2 : i32
    %1533 = arith.addi %1525, %c2_i32_582 : i32
    %1534 = arith.index_cast %7 : i32 to index
    %1535 = arith.index_cast %1533 : i32 to index
    %1536 = memref.load %arg1[%1534, %1535] : memref<2x32xf32, #tpu.memory_space<smem>>
    %c3_i32_583 = arith.constant 3 : i32
    %1537 = arith.addi %1525, %c3_i32_583 : i32
    %1538 = arith.index_cast %7 : i32 to index
    %1539 = arith.index_cast %1537 : i32 to index
    %1540 = memref.load %arg1[%1538, %1539] : memref<2x32xf32, #tpu.memory_space<smem>>
    %cst_584 = arith.constant 5.000000e-01 : f32
    %1541 = arith.mulf %cst_584, %1536 : f32
    %1542 = arith.subf %1528, %1541 : f32
    %cst_585 = arith.constant 5.000000e-01 : f32
    %1543 = arith.mulf %cst_585, %1536 : f32
    %1544 = arith.addf %1528, %1543 : f32
    %cst_586 = arith.constant 5.000000e-01 : f32
    %1545 = arith.mulf %cst_586, %1540 : f32
    %1546 = arith.subf %1532, %1545 : f32
    %cst_587 = arith.constant 5.000000e-01 : f32
    %1547 = arith.mulf %cst_587, %1540 : f32
    %1548 = arith.addf %1532, %1547 : f32
    %1549 = vector.broadcast %1544 : f32 to vector<2x128xf32>
    %1550 = arith.minimumf %1549, %1187 : vector<2x128xf32>
    %1551 = vector.broadcast %1542 : f32 to vector<2x128xf32>
    %1552 = arith.maximumf %1551, %1184 : vector<2x128xf32>
    %1553 = arith.subf %1550, %1552 : vector<2x128xf32>
    %cst_588 = arith.constant 0.000000e+00 : f32
    %1554 = vector.broadcast %cst_588 : f32 to vector<2x128xf32>
    %1555 = arith.maximumf %1553, %1554 : vector<2x128xf32>
    %1556 = vector.broadcast %1548 : f32 to vector<2x128xf32>
    %1557 = arith.minimumf %1556, %1193 : vector<2x128xf32>
    %1558 = vector.broadcast %1546 : f32 to vector<2x128xf32>
    %1559 = arith.maximumf %1558, %1190 : vector<2x128xf32>
    %1560 = arith.subf %1557, %1559 : vector<2x128xf32>
    %cst_589 = arith.constant 0.000000e+00 : f32
    %1561 = vector.broadcast %cst_589 : f32 to vector<2x128xf32>
    %1562 = arith.maximumf %1560, %1561 : vector<2x128xf32>
    %1563 = arith.mulf %1555, %1562 : vector<2x128xf32>
    %1564 = arith.mulf %1536, %1540 : f32
    %1565 = vector.broadcast %1564 : f32 to vector<2x128xf32>
    %1566 = arith.addf %1565, %1194 : vector<2x128xf32>
    %1567 = arith.subf %1566, %1563 : vector<2x128xf32>
    %cst_590 = arith.constant 5.000000e-01 : f32
    %1568 = vector.broadcast %cst_590 : f32 to vector<2x128xf32>
    %1569 = arith.mulf %1568, %1567 : vector<2x128xf32>
    %1570 = arith.subf %1563, %1569 : vector<2x128xf32>
    %1571 = arith.maximumf %1524, %1570 : vector<2x128xf32>
    %c8_i32_591 = arith.constant 8 : i32
    %cst_592 = arith.constant 0.000000e+00 : f32
    %1572 = vector.broadcast %cst_592 : f32 to vector<2x128xf32>
    %1573 = arith.cmpf ogt, %1571, %1572 : vector<2x128xf32>
    %c0_593 = arith.constant 0 : index
    %c2_594 = arith.constant 2 : index
    %c0_595 = arith.constant 0 : index
    %c0_596 = arith.constant 0 : index
    %1574 = vector.load %arg4[%c0_593, %c2_594, %c0_595, %c0_596] : memref<1x3x2x128xbf16, #tpu.memory_space<vmem>>, vector<1x1x2x128xbf16>
    %1575 = vector.shape_cast %1574 : vector<1x1x2x128xbf16> to vector<2x128xbf16>
    %1576 = arith.extf %1575 : vector<2x128xbf16> to vector<2x128xf32>
    %cst_597 = arith.constant 0.000000e+00 : f32
    %1577 = vector.broadcast %cst_597 : f32 to vector<2x128xf32>
    %1578 = arith.select %1573, %1577, %1576 : vector<2x128xi1>, vector<2x128xf32>
    %c0_598 = arith.constant 0 : index
    %c2_599 = arith.constant 2 : index
    %c4_600 = arith.constant 4 : index
    %c0_601 = arith.constant 0 : index
    %c0_602 = arith.constant 0 : index
    %1579 = vector.load %arg3[%c0_598, %c2_599, %c4_600, %c0_601, %c0_602] : memref<1x3x9x2x128xbf16, #tpu.memory_space<vmem>>, vector<1x1x1x2x128xbf16>
    %1580 = vector.shape_cast %1579 : vector<1x1x1x2x128xbf16> to vector<2x128xbf16>
    %1581 = arith.extf %1580 : vector<2x128xbf16> to vector<2x128xf32>
    %c0_603 = arith.constant 0 : index
    %c2_604 = arith.constant 2 : index
    %c0_605 = arith.constant 0 : index
    %c0_606 = arith.constant 0 : index
    %1582 = vector.load %arg5[%c0_603, %c2_604, %c0_605, %c0_606] : memref<1x3x2x128xbf16, #tpu.memory_space<vmem>>, vector<1x1x2x128xbf16>
    %1583 = vector.shape_cast %1582 : vector<1x1x2x128xbf16> to vector<2x128xbf16>
    %1584 = arith.extf %1583 : vector<2x128xbf16> to vector<2x128xf32>
    %cst_607 = arith.constant 2.000000e+00 : f32
    %1585 = vector.broadcast %cst_607 : f32 to vector<2x128xf32>
    %1586 = arith.subf %1585, %1584 : vector<2x128xf32>
    %1587 = arith.mulf %1586, %1581 : vector<2x128xf32>
    %c0_608 = arith.constant 0 : index
    %c2_609 = arith.constant 2 : index
    %c0_610 = arith.constant 0 : index
    %c0_611 = arith.constant 0 : index
    %c0_612 = arith.constant 0 : index
    %1588 = vector.load %arg3[%c0_608, %c2_609, %c0_610, %c0_611, %c0_612] : memref<1x3x9x2x128xbf16, #tpu.memory_space<vmem>>, vector<1x1x1x2x128xbf16>
    %1589 = vector.shape_cast %1588 : vector<1x1x1x2x128xbf16> to vector<2x128xbf16>
    %1590 = arith.extf %1589 : vector<2x128xbf16> to vector<2x128xf32>
    %1591 = arith.subf %1167, %1590 : vector<2x128xf32>
    %1592 = arith.mulf %1591, %1591 : vector<2x128xf32>
    %c0_613 = arith.constant 0 : index
    %c2_614 = arith.constant 2 : index
    %c1_615 = arith.constant 1 : index
    %c0_616 = arith.constant 0 : index
    %c0_617 = arith.constant 0 : index
    %1593 = vector.load %arg3[%c0_613, %c2_614, %c1_615, %c0_616, %c0_617] : memref<1x3x9x2x128xbf16, #tpu.memory_space<vmem>>, vector<1x1x1x2x128xbf16>
    %1594 = vector.shape_cast %1593 : vector<1x1x1x2x128xbf16> to vector<2x128xbf16>
    %1595 = arith.extf %1594 : vector<2x128xbf16> to vector<2x128xf32>
    %1596 = arith.subf %1173, %1595 : vector<2x128xf32>
    %1597 = arith.mulf %1596, %1596 : vector<2x128xf32>
    %1598 = arith.addf %1592, %1597 : vector<2x128xf32>
    %c0_618 = arith.constant 0 : index
    %c2_619 = arith.constant 2 : index
    %c2_620 = arith.constant 2 : index
    %c0_621 = arith.constant 0 : index
    %c0_622 = arith.constant 0 : index
    %1599 = vector.load %arg3[%c0_618, %c2_619, %c2_620, %c0_621, %c0_622] : memref<1x3x9x2x128xbf16, #tpu.memory_space<vmem>>, vector<1x1x1x2x128xbf16>
    %1600 = vector.shape_cast %1599 : vector<1x1x1x2x128xbf16> to vector<2x128xbf16>
    %1601 = arith.extf %1600 : vector<2x128xbf16> to vector<2x128xf32>
    %1602 = arith.subf %1157, %1601 : vector<2x128xf32>
    %1603 = arith.mulf %1602, %1602 : vector<2x128xf32>
    %1604 = arith.addf %1598, %1603 : vector<2x128xf32>
    %c0_623 = arith.constant 0 : index
    %c2_624 = arith.constant 2 : index
    %c3_625 = arith.constant 3 : index
    %c0_626 = arith.constant 0 : index
    %c0_627 = arith.constant 0 : index
    %1605 = vector.load %arg3[%c0_623, %c2_624, %c3_625, %c0_626, %c0_627] : memref<1x3x9x2x128xbf16, #tpu.memory_space<vmem>>, vector<1x1x1x2x128xbf16>
    %1606 = vector.shape_cast %1605 : vector<1x1x1x2x128xbf16> to vector<2x128xbf16>
    %1607 = arith.extf %1606 : vector<2x128xbf16> to vector<2x128xf32>
    %1608 = arith.subf %1159, %1607 : vector<2x128xf32>
    %1609 = arith.mulf %1608, %1608 : vector<2x128xf32>
    %1610 = arith.addf %1604, %1609 : vector<2x128xf32>
    %1611 = arith.mulf %1610, %1587 : vector<2x128xf32>
    %cst_628 = arith.constant -16.1180954 : f32
    %cst_629 = arith.constant 16.1180954 : f32
    %1612 = vector.broadcast %cst_628 : f32 to vector<2x128xf32>
    %1613 = arith.maximumf %1612, %1161 : vector<2x128xf32>
    %1614 = vector.broadcast %cst_629 : f32 to vector<2x128xf32>
    %1615 = arith.minimumf %1614, %1613 : vector<2x128xf32>
    %cst_630 = arith.constant 0.000000e+00 : f32
    %1616 = vector.broadcast %cst_630 : f32 to vector<2x128xf32>
    %1617 = arith.maximumf %1615, %1616 : vector<2x128xf32>
    %1618 = arith.mulf %1615, %1581 : vector<2x128xf32>
    %1619 = arith.subf %1617, %1618 : vector<2x128xf32>
    %1620 = math.absf %1615 : vector<2x128xf32>
    %cst_631 = arith.constant 0.000000e+00 : f32
    %1621 = vector.broadcast %cst_631 : f32 to vector<2x128xf32>
    %1622 = arith.subf %1621, %1620 : vector<2x128xf32>
    %1623 = math.exp %1622 : vector<2x128xf32>
    %cst_632 = arith.constant 1.000000e+00 : f32
    %1624 = vector.broadcast %cst_632 : f32 to vector<2x128xf32>
    %1625 = arith.addf %1624, %1623 : vector<2x128xf32>
    %1626 = math.log %1625 : vector<2x128xf32>
    %1627 = arith.addf %1619, %1626 : vector<2x128xf32>
    %1628 = arith.addf %1581, %1578 : vector<2x128xf32>
    %1629 = arith.mulf %1627, %1628 : vector<2x128xf32>
    %cst_633 = arith.constant 0.000000e+00 : f32
    %1630 = vector.broadcast %cst_633 : f32 to vector<2x128xf32>
    %c0_i32_634 = arith.constant 0 : i32
    %c5_i32_635 = arith.constant 5 : i32
    %1631 = arith.addi %c5_i32_635, %c0_i32_634 : i32
    %c0_636 = arith.constant 0 : index
    %c2_637 = arith.constant 2 : index
    %1632 = arith.index_cast %1631 : i32 to index
    %c0_638 = arith.constant 0 : index
    %c0_639 = arith.constant 0 : index
    %1633 = vector.load %arg2[%c0_636, %c2_637, %1632, %c0_638, %c0_639] : memref<1x3x9x2x128xf32, #tpu.memory_space<vmem>>, vector<1x1x1x2x128xf32>
    %1634 = vector.shape_cast %1633 : vector<1x1x1x2x128xf32> to vector<2x128xf32>
    %c5_i32_640 = arith.constant 5 : i32
    %1635 = arith.addi %c5_i32_640, %c0_i32_634 : i32
    %c0_641 = arith.constant 0 : index
    %c2_642 = arith.constant 2 : index
    %1636 = arith.index_cast %1635 : i32 to index
    %c0_643 = arith.constant 0 : index
    %c0_644 = arith.constant 0 : index
    %1637 = vector.load %arg3[%c0_641, %c2_642, %1636, %c0_643, %c0_644] : memref<1x3x9x2x128xbf16, #tpu.memory_space<vmem>>, vector<1x1x1x2x128xbf16>
    %1638 = vector.shape_cast %1637 : vector<1x1x1x2x128xbf16> to vector<2x128xbf16>
    %1639 = arith.extf %1638 : vector<2x128xbf16> to vector<2x128xf32>
    %cst_645 = arith.constant 0.000000e+00 : f32
    %1640 = vector.broadcast %cst_645 : f32 to vector<2x128xf32>
    %1641 = arith.maximumf %1634, %1640 : vector<2x128xf32>
    %1642 = arith.mulf %1634, %1639 : vector<2x128xf32>
    %1643 = arith.subf %1641, %1642 : vector<2x128xf32>
    %1644 = math.absf %1634 : vector<2x128xf32>
    %cst_646 = arith.constant 0.000000e+00 : f32
    %1645 = vector.broadcast %cst_646 : f32 to vector<2x128xf32>
    %1646 = arith.subf %1645, %1644 : vector<2x128xf32>
    %1647 = math.exp %1646 : vector<2x128xf32>
    %cst_647 = arith.constant 1.000000e+00 : f32
    %1648 = vector.broadcast %cst_647 : f32 to vector<2x128xf32>
    %1649 = arith.addf %1648, %1647 : vector<2x128xf32>
    %1650 = math.log %1649 : vector<2x128xf32>
    %1651 = arith.addf %1643, %1650 : vector<2x128xf32>
    %1652 = arith.addf %1630, %1651 : vector<2x128xf32>
    %c1_i32_648 = arith.constant 1 : i32
    %c5_i32_649 = arith.constant 5 : i32
    %1653 = arith.addi %c5_i32_649, %c1_i32_648 : i32
    %c0_650 = arith.constant 0 : index
    %c2_651 = arith.constant 2 : index
    %1654 = arith.index_cast %1653 : i32 to index
    %c0_652 = arith.constant 0 : index
    %c0_653 = arith.constant 0 : index
    %1655 = vector.load %arg2[%c0_650, %c2_651, %1654, %c0_652, %c0_653] : memref<1x3x9x2x128xf32, #tpu.memory_space<vmem>>, vector<1x1x1x2x128xf32>
    %1656 = vector.shape_cast %1655 : vector<1x1x1x2x128xf32> to vector<2x128xf32>
    %c5_i32_654 = arith.constant 5 : i32
    %1657 = arith.addi %c5_i32_654, %c1_i32_648 : i32
    %c0_655 = arith.constant 0 : index
    %c2_656 = arith.constant 2 : index
    %1658 = arith.index_cast %1657 : i32 to index
    %c0_657 = arith.constant 0 : index
    %c0_658 = arith.constant 0 : index
    %1659 = vector.load %arg3[%c0_655, %c2_656, %1658, %c0_657, %c0_658] : memref<1x3x9x2x128xbf16, #tpu.memory_space<vmem>>, vector<1x1x1x2x128xbf16>
    %1660 = vector.shape_cast %1659 : vector<1x1x1x2x128xbf16> to vector<2x128xbf16>
    %1661 = arith.extf %1660 : vector<2x128xbf16> to vector<2x128xf32>
    %cst_659 = arith.constant 0.000000e+00 : f32
    %1662 = vector.broadcast %cst_659 : f32 to vector<2x128xf32>
    %1663 = arith.maximumf %1656, %1662 : vector<2x128xf32>
    %1664 = arith.mulf %1656, %1661 : vector<2x128xf32>
    %1665 = arith.subf %1663, %1664 : vector<2x128xf32>
    %1666 = math.absf %1656 : vector<2x128xf32>
    %cst_660 = arith.constant 0.000000e+00 : f32
    %1667 = vector.broadcast %cst_660 : f32 to vector<2x128xf32>
    %1668 = arith.subf %1667, %1666 : vector<2x128xf32>
    %1669 = math.exp %1668 : vector<2x128xf32>
    %cst_661 = arith.constant 1.000000e+00 : f32
    %1670 = vector.broadcast %cst_661 : f32 to vector<2x128xf32>
    %1671 = arith.addf %1670, %1669 : vector<2x128xf32>
    %1672 = math.log %1671 : vector<2x128xf32>
    %1673 = arith.addf %1665, %1672 : vector<2x128xf32>
    %1674 = arith.addf %1652, %1673 : vector<2x128xf32>
    %c2_i32_662 = arith.constant 2 : i32
    %c5_i32_663 = arith.constant 5 : i32
    %1675 = arith.addi %c5_i32_663, %c2_i32_662 : i32
    %c0_664 = arith.constant 0 : index
    %c2_665 = arith.constant 2 : index
    %1676 = arith.index_cast %1675 : i32 to index
    %c0_666 = arith.constant 0 : index
    %c0_667 = arith.constant 0 : index
    %1677 = vector.load %arg2[%c0_664, %c2_665, %1676, %c0_666, %c0_667] : memref<1x3x9x2x128xf32, #tpu.memory_space<vmem>>, vector<1x1x1x2x128xf32>
    %1678 = vector.shape_cast %1677 : vector<1x1x1x2x128xf32> to vector<2x128xf32>
    %c5_i32_668 = arith.constant 5 : i32
    %1679 = arith.addi %c5_i32_668, %c2_i32_662 : i32
    %c0_669 = arith.constant 0 : index
    %c2_670 = arith.constant 2 : index
    %1680 = arith.index_cast %1679 : i32 to index
    %c0_671 = arith.constant 0 : index
    %c0_672 = arith.constant 0 : index
    %1681 = vector.load %arg3[%c0_669, %c2_670, %1680, %c0_671, %c0_672] : memref<1x3x9x2x128xbf16, #tpu.memory_space<vmem>>, vector<1x1x1x2x128xbf16>
    %1682 = vector.shape_cast %1681 : vector<1x1x1x2x128xbf16> to vector<2x128xbf16>
    %1683 = arith.extf %1682 : vector<2x128xbf16> to vector<2x128xf32>
    %cst_673 = arith.constant 0.000000e+00 : f32
    %1684 = vector.broadcast %cst_673 : f32 to vector<2x128xf32>
    %1685 = arith.maximumf %1678, %1684 : vector<2x128xf32>
    %1686 = arith.mulf %1678, %1683 : vector<2x128xf32>
    %1687 = arith.subf %1685, %1686 : vector<2x128xf32>
    %1688 = math.absf %1678 : vector<2x128xf32>
    %cst_674 = arith.constant 0.000000e+00 : f32
    %1689 = vector.broadcast %cst_674 : f32 to vector<2x128xf32>
    %1690 = arith.subf %1689, %1688 : vector<2x128xf32>
    %1691 = math.exp %1690 : vector<2x128xf32>
    %cst_675 = arith.constant 1.000000e+00 : f32
    %1692 = vector.broadcast %cst_675 : f32 to vector<2x128xf32>
    %1693 = arith.addf %1692, %1691 : vector<2x128xf32>
    %1694 = math.log %1693 : vector<2x128xf32>
    %1695 = arith.addf %1687, %1694 : vector<2x128xf32>
    %1696 = arith.addf %1674, %1695 : vector<2x128xf32>
    %c3_i32_676 = arith.constant 3 : i32
    %c5_i32_677 = arith.constant 5 : i32
    %1697 = arith.addi %c5_i32_677, %c3_i32_676 : i32
    %c0_678 = arith.constant 0 : index
    %c2_679 = arith.constant 2 : index
    %1698 = arith.index_cast %1697 : i32 to index
    %c0_680 = arith.constant 0 : index
    %c0_681 = arith.constant 0 : index
    %1699 = vector.load %arg2[%c0_678, %c2_679, %1698, %c0_680, %c0_681] : memref<1x3x9x2x128xf32, #tpu.memory_space<vmem>>, vector<1x1x1x2x128xf32>
    %1700 = vector.shape_cast %1699 : vector<1x1x1x2x128xf32> to vector<2x128xf32>
    %c5_i32_682 = arith.constant 5 : i32
    %1701 = arith.addi %c5_i32_682, %c3_i32_676 : i32
    %c0_683 = arith.constant 0 : index
    %c2_684 = arith.constant 2 : index
    %1702 = arith.index_cast %1701 : i32 to index
    %c0_685 = arith.constant 0 : index
    %c0_686 = arith.constant 0 : index
    %1703 = vector.load %arg3[%c0_683, %c2_684, %1702, %c0_685, %c0_686] : memref<1x3x9x2x128xbf16, #tpu.memory_space<vmem>>, vector<1x1x1x2x128xbf16>
    %1704 = vector.shape_cast %1703 : vector<1x1x1x2x128xbf16> to vector<2x128xbf16>
    %1705 = arith.extf %1704 : vector<2x128xbf16> to vector<2x128xf32>
    %cst_687 = arith.constant 0.000000e+00 : f32
    %1706 = vector.broadcast %cst_687 : f32 to vector<2x128xf32>
    %1707 = arith.maximumf %1700, %1706 : vector<2x128xf32>
    %1708 = arith.mulf %1700, %1705 : vector<2x128xf32>
    %1709 = arith.subf %1707, %1708 : vector<2x128xf32>
    %1710 = math.absf %1700 : vector<2x128xf32>
    %cst_688 = arith.constant 0.000000e+00 : f32
    %1711 = vector.broadcast %cst_688 : f32 to vector<2x128xf32>
    %1712 = arith.subf %1711, %1710 : vector<2x128xf32>
    %1713 = math.exp %1712 : vector<2x128xf32>
    %cst_689 = arith.constant 1.000000e+00 : f32
    %1714 = vector.broadcast %cst_689 : f32 to vector<2x128xf32>
    %1715 = arith.addf %1714, %1713 : vector<2x128xf32>
    %1716 = math.log %1715 : vector<2x128xf32>
    %1717 = arith.addf %1709, %1716 : vector<2x128xf32>
    %1718 = arith.addf %1696, %1717 : vector<2x128xf32>
    %c4_i32_690 = arith.constant 4 : i32
    %1719 = arith.addf %1150, %1611 : vector<2x128xf32>
    %1720 = arith.addf %1719, %1629 : vector<2x128xf32>
    %1721 = arith.mulf %1718, %1581 : vector<2x128xf32>
    %1722 = arith.addf %1720, %1721 : vector<2x128xf32>
    %1723 = arith.addf %1151, %1581 : vector<2x128xf32>
    %cst_691 = arith.constant dense<0.000000e+00> : vector<128xf32>
    %1724 = vector.multi_reduction <add>, %1722, %cst_691 [0] : vector<2x128xf32> to vector<128xf32>
    %1725 = vector.shape_cast %1724 : vector<128xf32> to vector<1x128xf32>
    %cst_692 = arith.constant dense<0.000000e+00> : vector<128xf32>
    %1726 = vector.multi_reduction <add>, %1723, %cst_692 [0] : vector<2x128xf32> to vector<128xf32>
    %1727 = vector.shape_cast %1726 : vector<128xf32> to vector<1x128xf32>
    %1728 = tpu.concatenate %1725, %1727 in 0 : vector<1x128xf32>, vector<1x128xf32> -> vector<2x128xf32>
    %1729 = vector.shape_cast %1728 : vector<2x128xf32> to vector<1x2x128xf32>
    %c0_693 = arith.constant 0 : index
    %c0_694 = arith.constant 0 : index
    %c0_695 = arith.constant 0 : index
    %1730 = vector.load %arg7[%c0_693, %c0_694, %c0_695] : memref<1x2x128xf32, #tpu.memory_space<vmem>>, vector<1x2x128xf32>
    tpu.vector_store %arg7[%c0_693, %c0_694, %c0_695], %1729 {strides = array<i32>} : memref<1x2x128xf32, #tpu.memory_space<vmem>>, vector<1x2x128xf32>,
    return
  }
  func.func @transform_0(%arg0: i32) -> (i32, i32) {
    %c0_i32 = arith.constant 0 : i32
    %c0_i32_0 = arith.constant 0 : i32
    %c0_i32_1 = arith.constant 0 : i32
    return %c0_i32, %c0_i32_0 : i32, i32
  }
  func.func @transform_1(%arg0: i32) -> (i32, i32, i32, i32, i32) {
    %c0_i32 = arith.constant 0 : i32
    %c0_i32_0 = arith.constant 0 : i32
    %c0_i32_1 = arith.constant 0 : i32
    %c0_i32_2 = arith.constant 0 : i32
    %c0_i32_3 = arith.constant 0 : i32
    return %arg0, %c0_i32, %c0_i32_0, %c0_i32_1, %c0_i32_2 : i32, i32, i32, i32, i32
  }
  func.func @transform_2(%arg0: i32) -> (i32, i32, i32, i32, i32) {
    %c0_i32 = arith.constant 0 : i32
    %c0_i32_0 = arith.constant 0 : i32
    %c0_i32_1 = arith.constant 0 : i32
    %c0_i32_2 = arith.constant 0 : i32
    %c0_i32_3 = arith.constant 0 : i32
    return %arg0, %c0_i32, %c0_i32_0, %c0_i32_1, %c0_i32_2 : i32, i32, i32, i32, i32
  }
  func.func @transform_3(%arg0: i32) -> (i32, i32, i32, i32) {
    %c0_i32 = arith.constant 0 : i32
    %c0_i32_0 = arith.constant 0 : i32
    %c0_i32_1 = arith.constant 0 : i32
    %c0_i32_2 = arith.constant 0 : i32
    return %arg0, %c0_i32, %c0_i32_0, %c0_i32_1 : i32, i32, i32, i32
  }
  func.func @transform_4(%arg0: i32) -> (i32, i32, i32, i32) {
    %c0_i32 = arith.constant 0 : i32
    %c0_i32_0 = arith.constant 0 : i32
    %c0_i32_1 = arith.constant 0 : i32
    %c0_i32_2 = arith.constant 0 : i32
    return %arg0, %c0_i32, %c0_i32_0, %c0_i32_1 : i32, i32, i32, i32
  }
  func.func @transform_5(%arg0: i32) -> (i32, i32, i32) {
    %c0_i32 = arith.constant 0 : i32
    %c0_i32_0 = arith.constant 0 : i32
    %c0_i32_1 = arith.constant 0 : i32
    %c0_i32_2 = arith.constant 0 : i32
    return %c0_i32, %c0_i32_0, %c0_i32_1 : i32, i32, i32
  }
  func.func @transform_6(%arg0: i32) -> (i32, i32, i32) {
    %c0_i32 = arith.constant 0 : i32
    %c0_i32_0 = arith.constant 0 : i32
    %c0_i32_1 = arith.constant 0 : i32
    return %arg0, %c0_i32, %c0_i32_0 : i32, i32, i32
  }
}

</mosaic_0001>

<bundles_post_ra>
// kernel: _yolo_loss_call.1
= control target key start
LH: loop header
LB: loop body
LE: loop exit
PB: predicated region body
PF: predicated region fallthrough
CT: control target
= control target key end

     0   :  { %s2835_s0 = inlined_call_operand.vmem [shape: f32[2,32], index: 0, kind: input, shape index: {}]   ;;  %s2836_s1 = inlined_call_operand.vmem [shape: f32[2,3,9,2,128], index: 1, kind: input, shape index: {}]   ;;  %s2837_s2 = inlined_call_operand.vmem [shape: bf16[2,3,9,2,128], index: 2, kind: input, shape index: {}]   ;;  %s2838_s3 = inlined_call_operand.vmem [shape: bf16[2,3,2,128], index: 3, kind: input, shape index: {}]   ;;  %s2839_s4 = inlined_call_operand.vmem [shape: bf16[2,3,2,128], index: 4, kind: input, shape index: {}]   ;;  %s2840_s5 = inlined_call_operand.vmem [shape: f32[2,2,128], index: 5, kind: input, shape index: {}]   ;;  %s2841_s6 = inlined_call_operand.vmem [shape: f32[2,2,128], index: 6, kind: output, shape index: {}]  }
   0x1   :  { %2917 = sst [smem:[#allocation52_spill]] %s2835_s0 }
   0x2   :  { %2918 = sst [smem:[#allocation53_spill]] %s2836_s1 }
   0x3   :  { %2919 = sst [smem:[#allocation54_spill]] %s2837_s2 }
   0x4   :  { %2920 = sst [smem:[#allocation55_spill]] %s2838_s3 }
   0x5   :  { %2921 = sst [smem:[#allocation56_spill]] %s2839_s4 }
   0x6   :  { %2922 = sst [smem:[#allocation57_spill]] %s2841_s6 }
   0x7   :  { %11 = vsyncpa [#allocation3], 0  ;;  %s1662_s21 = smov 0  }
   0x8 LB: > { %2923 = sst [smem:[#allocation5_spill]] %s1624_s21  ;;  %s1407_s22 = sadd.s32 4294967295, %s1624_s21   ;;  %s1624_s21 = sphi %s1662_s21, %s17_s21  }
   0x9   : > { %p1409_p0 = scmp.ge.s32.totalorder %s1624_s21, 1  ;;  %p194_p1 = scmp.lt.s32.totalorder %s1624_s21, 3 }
   0xa   : > { %s2924_s0 = sld [smem:[#allocation52_spill]]  ;;  %p1490_p3 = scmp.eq.s32.totalorder %s1407_s22, 0 }
   0xb   : > { %p1673_p2 = pnand %p1409_p0, %p194_p1 }
   0xd   : > { %p1486_p4 = pneg %p1673_p2 }
   0xf   : > { %p1487_p5 = pnand %p1490_p3, %p1486_p4 }
  0x10   : > { %s207_s25 = sshll.u32 %s2924_s0, 4  ;;  %s208_s25 = int_to_ptr.vmem [resolvable:$true] %s207_s25 }
  0x11   : > { %s1599_s27 = scalar_lea.vmem %s208_s25, 32  ;;  %p1601_p7 = pneg %p1487_p5 }
  0x12   : > { %p1600_p6 = scmp.ne.s32.totalorder %s208_s25, %s1599_s27  ;;  %p1607_p10 = scmp.lt.s32.totalorder %s208_s25, %s208_s25 }
  0x13   : > { %p1608_p11 = scmp.lt.s32.totalorder %s1599_s27, %s1599_s27 }
  0x14   : > { %p1602_p8 = pnand %p1601_p7, %p1600_p6 }
  0x15   : > { %p1609_p12 = por %p1608_p11, %p1607_p10 }
  0x16   : > { %p1603_p9 = pneg %p1602_p8 }
  0x18   : > { %p1610_p13 = pnand %p1609_p12, %p1603_p9 }
  0x1a   : > { %1613 = shalt.err (!%p1610_p13)
}
  0x1b   : > { %s1626_s28 = smov [#allocation2]   ;;  %252 = sbr.rel (%p1673_p2) target bundleno = 270 (0x10e), region = 44 }
  0x1c   : > { %1489 = dma.vmem_to_smem (!%p1487_p5), %s208_s25, 32, %s1626_s28, [#allocation3]  }
  0x20   : > { %1619 = dma.done.wait (%p1490_p3), [#allocation3], 32  }
  0x21   : > { %1621 = vsyncadd (%p1490_p3), [#allocation3], 4294967264 }
  0x22   : > { %258 = sfence }
  0x23   : > { %p294_p0 = scmp.lt.s32.totalorder %s1407_s22, 1  ;;  %s1686_s30 = sshll.u32 %s1407_s22, 7  ;;  %v1883_v59 = vld [vmem:[%s2840_s5] sm:$0x3]  ;;  %vm1288_vm2 = vcmask 1041408   ;;  %vm1303_vm4 = vcmask 1040384  }
  0x24   : > { %s352_s8 = sadd.s32 1, %s1686_s30  ;;  %s2927_s1 = sld [smem:[#allocation53_spill]] }
  0x25   : > { %s1684_s29 = scalar_select %p294_p0, %s1407_s22, 1 }
  0x26   : > { %s354_s12 = sadd.s32 2, %s1686_s30  ;;  %s1699_s13 = sld [smem:[#allocation2 + %s1686_s30]] }
  0x27   : > { %2926 = sst [smem:[#allocation6_spill]] %s1684_s29  ;;  %s1479_s7 = smul.u32 54, %s1684_s29 }
  0x28   : > { %s1701_s14 = sld [smem:[#allocation2 + %s352_s8]]  ;;  %s356_s16 = sadd.s32 3, %s1686_s30 }
  0x29   : > { %s1703_s15 = sld [smem:[#allocation2 + %s354_s12]]  ;;  %s384_s18 = sadd.s32 4, %s1686_s30 }
  0x2a   : > { %s1693_s11 = scalar_lea.vmem %s2927_s1, %s1479_s7  ;;  %s1706_s17 = sld [smem:[#allocation2 + %s356_s16]] }
  0x2b   : > { %v318_v0 = vld [vmem:[%s1693_s11] sm:$0x3]  ;;  %v1417_v1 = vld [vmem:[%s1693_s11 + $0x2] sm:$0x3]  ;;  %s1480_s19 = smul.u32 27, %s1684_s29  ;;  %s1710_s20 = sld [smem:[#allocation2 + %s384_s18]] }
  0x2c   : > { %v327_v2 = vsub.f32 0.0, %v318_v0  ;;  %v332_v3 = vsub.f32 0.0, %v1417_v1  ;;  %s386_s22 = sadd.s32 5, %s1686_s30  ;;  %s388_s23 = sadd.s32 6, %s1686_s30  ;;  %v1724_v6 = vld [vmem:[%s1693_s11 + $0x4] sm:$0x3] }
  0x2d   : > { %s1714_s24 = sld [smem:[#allocation2 + %s388_s23]]  ;;  %s390_s25 = sadd.s32 7, %s1686_s30  ;;  %v1734_v7 = vld [vmem:[%s1693_s11 + $0x6] sm:$0x3]  ;;  %v339_v8 = vmul.f32 1.442695, %v1724_v6 }
  0x2e   : > { %v328_v4 = vmul.f32 1.442695, %v327_v2  ;;  %v333_v5 = vmul.f32 1.442695, %v332_v3  ;;  %s1717_s26 = sld [smem:[#allocation2 + %s390_s25]]  ;;  %s418_s27 = sadd.s32 8, %s1686_s30 }
  0x2f   : > { %s358_s28 = smul.f32 0.5, %s1703_s15  ;;  %s387_s8 = sld [smem:[#allocation2 + %s386_s22]]  ;;  %v1420_v9 = vld [vmem:[%s1693_s11 + $0x8] sm:$0x3]  ;;  %v341_v10 = vmul.f32 1.442695, %v1734_v7 }
  0x30   : > { %1501 = vpow2.f32 %v328_v4  ;;  %s361_s7 = smul.f32 0.5, %s1706_s17  ;;  %s1726_s10 = sld [smem:[#allocation2 + %s418_s27]]  ;;  %v1774_v12 = vclamps-f32 %v1420_v9, 16.118095  ;;  %v1785_v18 = vld [vmem:[%s1693_s11 + $0xa] sm:$0x3] }
  0x31   : > { %1503 = vpow2.f32 %v333_v5  ;;  %s1481_s9 = smul.u32 3, %s1684_s29  ;;  %s2928_s2 = sld [smem:[#allocation54_spill]]  ;;  %v679_v26 = vand.u32 2147483647, %v1785_v18  ;;  %v1819_v34 = vld [vmem:[%s1693_s11 + $0xc] sm:$0x3] }
  0x32   : > { %s1737_s23 = ssub.f32 %s1699_s13, %s358_s28  ;;  %s422_s1 = sadd.s32 10, %s1686_s30  ;;  %1505 = vpow2.f32 %v339_v8  ;;  %v661_v22 = vand.u32 2147483647, %v1774_v12  ;;  %v658_v37 = vmax.f32 %v1774_v12, 0.0  ;;  %v696_v44 = vand.u32 2147483647, %v1819_v34 }
  0x33   : > { %s1740_s25 = sadd.f32 %s358_s28, %s1699_s13  ;;  %s392_s22 = smul.f32 0.5, %s1714_s24  ;;  %1507 = vpow2.f32 %v341_v10  ;;  %v680_v39 = vsub.f32 0.0, %v679_v26  ;;  %v676_v47 = vmax.f32 %v1785_v18, 0.0  ;;  %v693_v57 = vmax.f32 %v1819_v34, 0.0  ;;  %v1905_v1 = vld [vmem:[%s2840_s5 + $0x2] sm:$0x3] }
  0x34   : > { %s1745_s0 = ssub.f32 %s1701_s14, %s361_s7  ;;  %s395_s27 = smul.f32 0.5, %s1717_s26  ;;  %v662_v32 = vsub.f32 0.0, %v661_v22  ;;  %v1869_v55 = vstv %s1737_s23  ;;  %v697_v63 = vsub.f32 0.0, %v696_v44 }
  0x35   : > { %s2929_s3 = sld [smem:[#allocation55_spill]]  ;;  %s456_s13 = sadd.s32 14, %s1686_s30  ;;  %v681_v53 = vmul.f32 1.442695, %v680_v39  ;;  %2938 = vst [vmem:[#allocation13_spill] sm:$0xff] %v1869_v55  ;;  %v1886_v60 = vstv %s1740_s25 }
  0x36   : > { %s2931_s4 = sld [smem:[#allocation56_spill]]  ;;  %s488_s29 = sadd.s32 17, %s1686_s30  ;;  %v663_v46 = vmul.f32 1.442695, %v662_v32  ;;  %2941 = vst [vmem:[#allocation15_spill] sm:$0xff] %v1886_v60  ;;  %v1889_v61 = vstv %s1745_s0 }
  0x37   : > { %s1731_s18 = scalar_lea.vmem %s2928_s2, %s1480_s19  ;;  %s1756_s19 = sadd.f32 %s361_s7, %s1701_s14  ;;  %2942 = vst [vmem:[#allocation16_spill] sm:$0xff] %v1889_v61 }
  0x38   : > { %s1764_s2 = ssub.f32 %s1710_s20, %s392_s22  ;;  %v1422_v11 = vld [vmem:[%s1731_s18 + $0x4] sm:$0x1]  ;;  %s420_s7 = sadd.s32 9, %s1686_s30  ;;  %v1424_v15 = vld [vmem:[%s1731_s18 + $0x2] sm:$0x1] }
  0x39   : > { %s1767_s6 = sadd.f32 %s392_s22, %s1710_s20  ;;  %v1425_v21 = vld [vmem:[%s1731_s18 + $0x3] sm:$0x1]  ;;  %v1798_v23 = vunpack.c.l.bf16 %v1422_v11  ;;  %v645_v24 = vunpack.c.l.bf16 %v1424_v15  ;;  %v1428_v25 = vld [vmem:[%s1731_s18 + $0x5] sm:$0x1]  ;;  %v1812_v28 = vld [vmem:[%s1731_s18] sm:$0x1]  ;;  %v1909_v3 = vstv %s1756_s19 }
  0x3a   : > { %s1770_s21 = ssub.f32 %s387_s8, %s395_s27  ;;  %v651_v29 = vunpack.c.l.bf16 %v1425_v21  ;;  %v1430_v30 = vld [vmem:[%s1731_s18 + $0x6] sm:$0x1]  ;;  %v675_v33 = vunpack.c.l.bf16 %v1428_v25  ;;  %v1825_v35 = vld [vmem:[%s1731_s18 + $0x1] sm:$0x1]  ;;  %v1900_v0 = vld [vmem:[%s1731_s18 + $0x7] sm:$0x1] }
  0x3b   : > { %s1751_s12 = scalar_lea.vmem %s2929_s3, %s1481_s9  ;;  %s424_s3 = sadd.s32 11, %s1686_s30  ;;  %2934 = vst [vmem:[#allocation10_spill] sm:$0xff] %v1798_v23  ;;  %v646_v36 = vsub.f32 %v1724_v6, %v645_v24  ;;  %v659_v38 = vmul.f32 %v1774_v12, %v1798_v23  ;;  %v692_v40 = vunpack.c.l.bf16 %v1430_v30  ;;  %2943 = vst [vmem:[#allocation17_spill] sm:$0xff] %v1909_v3  ;;  %v1936_v9 = vld [vmem:[%s1731_s18 + $0x8] sm:$0x1]  ;;  %v1943_v12 = vstv %s1767_s6 }
  0x3c   : > { %2930 = sst [smem:[#allocation7_spill]] %s1751_s12  ;;  %s1761_s16 = scalar_lea.vmem %s2931_s4, %s1481_s9  ;;  %v1806_v27 = vld [vmem:[%s1751_s12] sm:$0x1]  ;;  %v652_v43 = vsub.f32 %v1734_v7, %v651_v29  ;;  %v677_v48 = vmul.f32 %v1785_v18, %v675_v33  ;;  %v1923_v7 = vstv %s1764_s2  ;;  %2948 = vst [vmem:[#allocation20_spill] sm:$0xff] %v1943_v12  ;;  %v698_v18 = vmul.f32 1.442695, %v697_v63 }
  0x3d   : > { %2932 = sst [smem:[#allocation8_spill]] %s1761_s16  ;;  %v1502_v13 = vpop.eup %1501  ;;  %v629_v14 = vld [vmem:[%s1761_s16] sm:$0x1]  ;;  %s452_s9 = sadd.s32 12, %s1686_s30  ;;  %2935 = vst [vmem:[#allocation11_spill] sm:$0xff] %v1806_v27  ;;  %v1862_v51 = vmul.f32 %v646_v36, %v646_v36  ;;  %v1864_v52 = vsub.f32 %v658_v37, %v659_v38  ;;  %v694_v58 = vmul.f32 %v1819_v34, %v692_v40  ;;  %2944 = vst [vmem:[#allocation18_spill] sm:$0xff] %v1923_v7 }
  0x3e   : > { %s1776_s14 = sadd.f32 %s395_s27, %s387_s8  ;;  %v1504_v16 = vpop.eup %1503  ;;  %v330_v17 = vadd.f32 1.0, %v1502_v13  ;;  %s458_s27 = sadd.s32 15, %s1686_s30  ;;  %v630_v20 = vunpack.c.l.bf16 %v629_v14  ;;  %v1897_v62 = vmul.f32 %v652_v43, %v652_v43  ;;  %v1917_v4 = vsub.f32 %v676_v47, %v677_v48  ;;  %v1951_v14 = vld [vmem:[%s1693_s11 + $0xe] sm:$0x3]  ;;  %v2010_v40 = vld [vmem:[%s1693_s11 + $0x10] sm:$0x3] }
  0x3f   : > { %s1781_s20 = sld [smem:[#allocation2 + %s422_s1]]  ;;  %v335_v19 = vadd.f32 1.0, %v1504_v16  ;;  %v1851_v49 = vpop.eup %1505  ;;  %v1948_v13 = vsub.f32 %v693_v57, %v694_v58  ;;  %s524_s6 = sadd.s32 22, %s1686_s30  ;;  %v713_v30 = vand.u32 2147483647, %v1951_v14 }
  0x40   : > { %s1787_s22 = sld [smem:[#allocation2 + %s424_s3]]  ;;  %1509 = vrcp.f32 %v330_v17  ;;  %s454_s3 = sadd.s32 13, %s1686_s30  ;;  %v631_v31 = vsub.f32 2.0, %v630_v20  ;;  %v1866_v54 = vpop.eup %1507  ;;  %v343_v2 = vmul.f32 0.5, %v1851_v49  ;;  %v1957_v17 = vstv %s1770_s21  ;;  %v1435_v43 = vld [vmem:[%s1693_s11 + $0x12] sm:$0x3] }
  0x41   : > { %s1790_s8 = sld [smem:[#allocation2 + %s420_s7]]  ;;  %1511 = vrcp.f32 %v335_v19  ;;  %s486_s7 = sadd.s32 16, %s1686_s30  ;;  %v346_v6 = vmul.f32 0.5, %v1866_v54  ;;  %2949 = vst [vmem:[#allocation21_spill] sm:$0xff] %v1948_v13  ;;  %2950 = vst [vmem:[#allocation22_spill] sm:$0xff] %v1957_v17  ;;  %v1968_v22 = vstv %s1776_s14  ;;  %v714_v58 = vsub.f32 0.0, %v713_v30 }
  0x42   : > { %s1795_s28 = sld [smem:[#allocation2 + %s452_s9]]  ;;  %v1860_v50 = vmul.f32 %v631_v31, %v1798_v23  ;;  %1513 = vpow2.f32 %v663_v46  ;;  %2951 = vst [vmem:[#allocation23_spill] sm:$0xff] %v1968_v22  ;;  %s554_s14 = sadd.s32 24, %s1686_s30  ;;  %v1436_v63 = vld [vmem:[%s1693_s11 + $0x14] sm:$0x3] }
  0x43   : > { %s1802_s1 = sld [smem:[#allocation2 + %s456_s13]]  ;;  %1515 = vpow2.f32 %v681_v53  ;;  %v2027_v53 = vmul.f32 %v1866_v54, %v1851_v49  ;;  %v754_v54 = vsub.f32 0.0, %v1435_v43  ;;  %v715_v43 = vmul.f32 1.442695, %v714_v58  ;;  %v2082_v58 = vld [vmem:[%s1693_s11 + $0x16] sm:$0x3] }
  0x44   : > { %s1808_s4 = sld [smem:[#allocation2 + %s458_s27]]  ;;  %2937 = vst [vmem:[#allocation12_spill] sm:$0xff] %v1860_v50  ;;  %1517 = vpow2.f32 %v698_v18 }
  0x45   : > { %2933 = sst [smem:[#allocation9_spill]] %s1781_s20  ;;  %s426_s9 = smul.f32 0.5, %s1781_s20  ;;  %1519 = vpow2.f32 %v715_v43 }
  0x46   : > { %s1816_s16 = sld [smem:[#allocation2 + %s454_s3]]  ;;  %s377_s3 = smul.f32 %s1706_s17, %s1703_s15 }
  0x47   : > { %s1822_s27 = sld [smem:[#allocation2 + %s486_s7]]  ;;  %s2936_s15 = smul.f32 0.5, %s1787_s22 }
  0x48   : > { %s1833_s12 = sld [smem:[#allocation2 + %s488_s29]]  ;;  %v1871_v56 = vstv %s377_s3  ;;  %s492_s7 = sadd.s32 19, %s1686_s30 }
  0x49   : > { %s1838_s13 = ssub.f32 %s1726_s10, %s426_s9  ;;  %s460_s29 = smul.f32 0.5, %s1802_s1  ;;  %2939 = vst [vmem:[#allocation14_spill] sm:$0xff] %v1871_v56 }
  0x4a   : > { %s1845_s20 = sadd.f32 %s426_s9, %s1726_s10  ;;  %s2940_s9 = smov %s2936_s15 }
  0x4b   : > { %s1856_s17 = ssub.f32 %s1790_s8, %s2936_s15  ;;  %s2945_s10 = smul.f32 %s1717_s26, %s1714_s24  ;;  %v1982_v29 = vstv %s1838_s13 }
  0x4c   : > { %s1876_s15 = sadd.f32 %s2940_s9, %s1790_s8  ;;  %s490_s8 = sadd.s32 18, %s1686_s30  ;;  %2953 = vst [vmem:[#allocation24_spill] sm:$0xff] %v1982_v29  ;;  %v2014_v46 = vstv %s1845_s20 }
  0x4d   : > { %s1894_s23 = ssub.f32 %s1795_s28, %s460_s29  ;;  %v1919_v5 = vpop.eup %1509  ;;  %v1928_v8 = vstv %s2945_s10  ;;  %s2947_s19 = smul.f32 0.5, %s1808_s4  ;;  %2954 = vst [vmem:[#allocation25_spill] sm:$0xff] %v2014_v46  ;;  %v2020_v48 = vstv %s1856_s17 }
  0x4e   : > { %s1914_s0 = sadd.f32 %s460_s29, %s1795_s28  ;;  %2946 = vst [vmem:[#allocation19_spill] sm:$0xff] %v1928_v8  ;;  %v1938_v10 = vpop.eup %1511  ;;  %v337_v11 = vadd.f32 %v1919_v5, %v1883_v59  ;;  %s520_s24 = sadd.s32 20, %s1686_s30  ;;  %v2017_v47 = vstv %s1876_s15  ;;  %2956 = vst [vmem:[#allocation27_spill] sm:$0xff] %v2020_v48  ;;  %v2074_v19 = vadd.f32 %v1928_v8, %v2027_v53 }
  0x4f   : > { %s1933_s9 = ssub.f32 %s1816_s16, %s2947_s19  ;;  %v338_v16 = vadd.f32 %v1938_v10, %v1905_v1  ;;  %s2952_s28 = smov %s2947_s19  ;;  %2955 = vst [vmem:[#allocation26_spill] sm:$0xff] %v2017_v47 }
  0x50   : > { %s1945_s2 = sld [smem:[#allocation2 + %s490_s8]]  ;;  %v1963_v20 = vsub.f32 %v337_v11, %v343_v2  ;;  %v1965_v21 = vadd.f32 %v343_v2, %v337_v11  ;;  %s526_s8 = sadd.s32 23, %s1686_s30 }
  0x51   : > { %s1959_s26 = sld [smem:[#allocation2 + %s492_s7]]  ;;  %v1977_v25 = vsub.f32 %v338_v16, %v346_v6  ;;  %v1979_v26 = vadd.f32 %v346_v6, %v338_v16  ;;  %s522_s3 = sadd.s32 21, %s1686_s30 }
  0x52   : > { %s1973_s29 = sadd.f32 %s2952_s28, %s1816_s16  ;;  %v365_v31 = vmin.f32 %v1886_v60, %v1965_v21  ;;  %v367_v32 = vmax.f32 %v1869_v55, %v1963_v20  ;;  %v399_v33 = vmin.f32 %v1943_v12, %v1965_v21  ;;  %v401_v34 = vmax.f32 %v1923_v7, %v1963_v20  ;;  %s558_s28 = sadd.s32 26, %s1686_s30 }
  0x53   : > { %s1984_s21 = sld [smem:[#allocation2 + %s520_s24]]  ;;  %v371_v36 = vmin.f32 %v1909_v3, %v1979_v26  ;;  %v373_v37 = vmax.f32 %v1889_v61, %v1977_v25  ;;  %v405_v38 = vmin.f32 %v1968_v22, %v1979_v26  ;;  %v407_v39 = vmax.f32 %v1957_v17, %v1977_v25 }
  0x54   : > { %s1996_s16 = sld [smem:[#allocation2 + %s524_s6]]  ;;  %v368_v44 = vsub.f32 %v365_v31, %v367_v32  ;;  %v402_v2 = vsub.f32 %v399_v33, %v401_v34  ;;  %v433_v11 = vmin.f32 %v2014_v46, %v1965_v21  ;;  %v435_v16 = vmax.f32 %v1982_v29, %v1963_v20 }
  0x55   : > { %s2007_s13 = sld [smem:[#allocation2 + %s526_s8]]  ;;  %v374_v57 = vsub.f32 %v371_v36, %v373_v37  ;;  %v408_v6 = vsub.f32 %v405_v38, %v407_v39  ;;  %v439_v18 = vmin.f32 %v2017_v47, %v1979_v26  ;;  %v441_v30 = vmax.f32 %v2020_v48, %v1977_v25  ;;  %v1514_v36 = vpop.eup %1513 }
  0x56   : > { %s494_s25 = smul.f32 0.5, %s1945_s2  ;;  %s2023_s7 = sld [smem:[#allocation2 + %s522_s3]]  ;;  %v369_v31 = vmax.f32 %v368_v44, 0.0  ;;  %v2049_v33 = vstv %s1914_s0  ;;  %v759_v34 = vsub.f32 0.0, %v1436_v63  ;;  %v2056_v37 = vstv %s1894_s23  ;;  %v2068_v44 = vpop.eup %1515 }
  0x57   : > { %s497_s10 = smul.f32 0.5, %s1959_s26  ;;  %s2030_s19 = sld [smem:[#allocation2 + %s554_s14]]  ;;  %v375_v32 = vmax.f32 %v374_v57, 0.0  ;;  %2957 = vst [vmem:[#allocation28_spill] sm:$0xff] %v2049_v33  ;;  %2959 = vst [vmem:[#allocation29_spill] sm:$0xff] %v2056_v37  ;;  %v2059_v38 = vstv %s1973_s29  ;;  %v2062_v39 = vstv %s1933_s9  ;;  %v379_v57 = vadd.f32 %v1871_v56, %v2027_v53 }
  0x58   : > { %s2034_s20 = ssub.f32 %s1822_s27, %s494_s25  ;;  %2960 = vst [vmem:[#allocation30_spill] sm:$0xff] %v2059_v38  ;;  %2961 = vst [vmem:[#allocation31_spill] sm:$0xff] %v2062_v39  ;;  %v403_v41 = vmax.f32 %v402_v2, 0.0  ;;  %v409_v63 = vmax.f32 %v408_v6, 0.0  ;;  %v436_v45 = vsub.f32 %v433_v11, %v435_v16  ;;  %v442_v42 = vsub.f32 %v439_v18, %v441_v30  ;;  %s560_s29 = sadd.s32 27, %s1686_s30 }
  0x59   : > { %s2046_s17 = sadd.f32 %s494_s25, %s1822_s27  ;;  %v467_v2 = vmin.f32 %v2049_v33, %v1965_v21  ;;  %v755_v6 = vmul.f32 1.442695, %v754_v54  ;;  %v2090_v24 = vmul.f32 %v375_v32, %v369_v31  ;;  %v469_v15 = vmax.f32 %v2056_v37, %v1963_v20  ;;  %s479_s3 = smul.f32 %s1808_s4, %s1802_s1 }
  0x5a   : > { %s2958_s15 = sld [smem:[#allocation9_spill]]  ;;  %s528_s6 = smul.f32 0.5, %s1996_s16  ;;  %v473_v11 = vmin.f32 %v2059_v38, %v1979_v26  ;;  %v475_v16 = vmax.f32 %v2062_v39, %v1977_v25  ;;  %v2103_v18 = vstv %s2034_s20  ;;  %v760_v54 = vmul.f32 1.442695, %v759_v34 }
  0x5b   : > { %s2052_s24 = ssub.f32 %s1833_s12, %s497_s10  ;;  %s531_s0 = smul.f32 0.5, %s2007_s13  ;;  %2962 = vst [vmem:[#allocation32_spill] sm:$0xff] %v2103_v18  ;;  %v766_v30 = vmul.f32 1.442695, %v2082_v58  ;;  %v2110_v31 = vmul.f32 %v409_v63, %v403_v41  ;;  %v2115_v32 = vstv %s2046_s17  ;;  %v437_v27 = vmax.f32 %v436_v45, 0.0 }
  0x5c   : > { %s2065_s27 = sadd.f32 %s497_s10, %s1833_s12  ;;  %2963 = vst [vmem:[#allocation33_spill] sm:$0xff] %v2115_v32  ;;  %v665_v34 = vadd.f32 1.0, %v1514_v36  ;;  %1521 = vpow2.f32 %v755_v6  ;;  %v380_v41 = vsub.f32 %v379_v57, %v2090_v24  ;;  %v443_v43 = vmax.f32 %v442_v42, 0.0  ;;  %s594_s1 = sadd.s32 31, %s1686_s30 }
  0x5d   : > { %s2079_s12 = ssub.f32 %s1984_s21, %s528_s6  ;;  %v2121_v23 = vstv %s2052_s24  ;;  %v470_v63 = vsub.f32 %v467_v2, %v469_v15  ;;  %v476_v13 = vsub.f32 %v473_v11, %v475_v16  ;;  %v501_v45 = vmin.f32 %v2115_v32, %v1965_v21  ;;  %s588_s10 = sadd.s32 28, %s1686_s30  ;;  %v1518_v15 = vpop.eup %1517  ;;  %v2153_v16 = vld [vmem:[%s1693_s11 + $0x18] sm:$0x3] }
  0x5e   : > { %s2087_s9 = sadd.f32 %s528_s6, %s1984_s21  ;;  %s556_s21 = sadd.s32 25, %s1686_s30  ;;  %v2118_v49 = vstv %s2065_s27  ;;  %2965 = vst [vmem:[#allocation35_spill] sm:$0xff] %v2121_v23  ;;  %v503_v36 = vmax.f32 %v2103_v18, %v1963_v20  ;;  %v509_v42 = vmax.f32 %v2121_v23, %v1977_v25  ;;  %v414_v2 = vsub.f32 %v2074_v19, %v2110_v31 }
  0x5f   : > { %s2106_s8 = sadd.f32 %s531_s0, %s2023_s7  ;;  %2964 = vst [vmem:[#allocation34_spill] sm:$0xff] %v2118_v49  ;;  %v507_v57 = vmin.f32 %v2118_v49, %v1979_v26  ;;  %v2147_v11 = vstv %s479_s3  ;;  %s590_s20 = sadd.s32 29, %s1686_s30  ;;  %1523 = vpow2.f32 %v760_v54  ;;  %v2159_v23 = vstv %s2079_s12 }
  0x60   : > { %s445_s23 = smul.f32 %s1787_s22, %s2958_s15  ;;  %s2099_s22 = ssub.f32 %s2023_s7, %s531_s0  ;;  %2967 = vst [vmem:[#allocation37_spill] sm:$0xff] %v2147_v11  ;;  %v2156_v49 = vstv %s2087_s9  ;;  %2969 = vst [vmem:[#allocation39_spill] sm:$0xff] %v2159_v23  ;;  %v2169_v32 = vmul.f32 %v443_v43, %v437_v27  ;;  %v471_v39 = vmax.f32 %v470_v63, 0.0  ;;  %v477_v38 = vmax.f32 %v476_v13, 0.0 }
  0x61   : > { %s2123_s14 = sld [smem:[#allocation2 + %s558_s28]]  ;;  %s592_s7 = sadd.s32 30, %s1686_s30  ;;  %2968 = vst [vmem:[#allocation38_spill] sm:$0xff] %v2156_v49  ;;  %v2162_v18 = vstv %s2106_s8  ;;  %v504_v54 = vsub.f32 %v501_v45, %v503_v36  ;;  %v510_v37 = vsub.f32 %v507_v57, %v509_v42  ;;  %v683_v33 = vadd.f32 1.0, %v2068_v44 }
  0x62   : > { %v2125_v50 = vstv %s445_s23  ;;  %s2127_s25 = sld [smem:[#allocation2 + %s560_s29]]  ;;  %2970 = vst [vmem:[#allocation40_spill] sm:$0xff] %v2162_v18  ;;  %v2165_v19 = vstv %s2099_s22  ;;  %1525 = vpow2.f32 %v766_v30  ;;  %v535_v27 = vmin.f32 %v2156_v49, %v1965_v21  ;;  %s513_s23 = smul.f32 %s1959_s26, %s1945_s2 }
  0x63   : > { %2966 = vst [vmem:[#allocation36_spill] sm:$0xff] %v2125_v50  ;;  %s2131_s4 = sld [smem:[#allocation2 + %s556_s21]]  ;;  %v447_v6 = vadd.f32 %v2125_v50, %v2027_v53  ;;  %2971 = vst [vmem:[#allocation41_spill] sm:$0xff] %v2165_v19  ;;  %v381_v50 = vmul.f32 0.5, %v380_v41  ;;  %v537_v13 = vmax.f32 %v2159_v23, %v1963_v20  ;;  %v541_v41 = vmin.f32 %v2162_v18, %v1979_v26  ;;  %s547_s28 = smul.f32 %s2007_s13, %s1996_s16 }
  0x64   : > { %s2150_s17 = sld [smem:[#allocation2 + %s592_s7]]  ;;  %v543_v43 = vmax.f32 %v2165_v19, %v1977_v25  ;;  %v481_v44 = vadd.f32 %v2147_v11, %v2027_v53  ;;  %1527 = vlog2.f32 %v665_v34  ;;  %v2972_v30 = vand.u32 2147483647, %v2010_v40  ;;  %v1445_v11 = vld [vmem:[%s1731_s18 + $0xb] sm:$0x1] }
  0x65   : > { %s2167_s15 = sld [smem:[#allocation2 + %s594_s1]]  ;;  %v769_v45 = vmul.f32 1.442695, %v2153_v16  ;;  %v382_v36 = vsub.f32 %v2090_v24, %v381_v50  ;;  %v415_v57 = vmul.f32 0.5, %v414_v2  ;;  %v448_v42 = vsub.f32 %v447_v6, %v2169_v32  ;;  %v2217_v2 = vpop.eup %1519 }
  0x66   : > { %s2172_s24 = sld [smem:[#allocation2 + %s588_s10]]  ;;  %v731_v63 = vsub.f32 0.0, %v2972_v30  ;;  %v2201_v19 = vmul.f32 %v477_v38, %v471_v39  ;;  %1529 = vlog2.f32 %v683_v33  ;;  %v2973_v34 = vunpack.c.l.bf16 %v1900_v0 }
  0x67   : > { %s562_s30 = smul.f32 0.5, %s2123_s14  ;;  %s2175_s27 = sld [smem:[#allocation2 + %s590_s20]]  ;;  %v2974_v50 = vunpack.c.l.bf16 %v1936_v9  ;;  %v505_v38 = vmax.f32 %v504_v54, 0.0  ;;  %v511_v39 = vmax.f32 %v510_v37, 0.0  ;;  %v538_v33 = vsub.f32 %v535_v27, %v537_v13 }
  0x68   : > { %s565_s6 = smul.f32 0.5, %s2127_s25  ;;  %v2209_v30 = vmul.f32 %v1951_v14, %v2973_v34  ;;  %v544_v6 = vsub.f32 %v541_v41, %v543_v43  ;;  %v2220_v0 = vstv %s513_s23  ;;  %v700_v34 = vadd.f32 1.0, %v1518_v15  ;;  %s2980_s13 = sld [smem:[#allocation8_spill]] }
  0x69   : > { %s2187_s0 = ssub.f32 %s2030_s19, %s562_s30  ;;  %v2215_v24 = vmul.f32 %v2010_v40, %v2974_v50  ;;  %2975 = vst [vmem:[#allocation42_spill] sm:$0xff] %v2220_v0  ;;  %v732_v18 = vmul.f32 1.442695, %v731_v63  ;;  %1531 = vpow2.f32 %v769_v45  ;;  %v1522_v9 = vpop.eup %1521  ;;  %v383_v50 = vmax.f32 %v382_v36, 0.0  ;;  %s581_s21 = smul.f32 %s2127_s25, %s2123_s14 }
  0x6a   : > { %s2194_s12 = sadd.f32 %s562_s30, %s2030_s19  ;;  %s596_s2 = smul.f32 0.5, %s2150_s17  ;;  %v416_v23 = vsub.f32 %v2110_v31, %v415_v57  ;;  %v449_v54 = vmul.f32 0.5, %v448_v42  ;;  %v482_v37 = vsub.f32 %v481_v44, %v2201_v19  ;;  %v2238_v15 = vmul.f32 %v511_v39, %v505_v38 }
  0x6b   : > { %s566_s9 = ssub.f32 %s2131_s4, %s565_s6  ;;  %s599_s19 = smul.f32 0.5, %s2167_s15  ;;  %v2231_v13 = vstv %s2187_s0  ;;  %v515_v63 = vadd.f32 %v2220_v0, %v2027_v53  ;;  %v539_v31 = vmax.f32 %v538_v33, 0.0  ;;  %v545_v45 = vmax.f32 %v544_v6, 0.0 }
  0x6c   : > { %s567_s26 = sadd.f32 %s565_s6, %s2131_s4  ;;  %v2228_v27 = vstv %s2194_s12  ;;  %2977 = vst [vmem:[#allocation44_spill] sm:$0xff] %v2231_v13  ;;  %v1524_v44 = vpop.eup %1523  ;;  %v2243_v36 = vstv %s547_s28  ;;  %v2982_v57 = vunpack.c.l.bf16 %v1812_v28  ;;  %v2983_v49 = vunpack.c.l.bf16 %v1825_v35  ;;  %s615_s3 = smul.f32 %s2167_s15, %s2150_s17 }
  0x6d   : > { %s597_s22 = ssub.f32 %s2172_s24, %s596_s2  ;;  %2976 = vst [vmem:[#allocation43_spill] sm:$0xff] %v2228_v27  ;;  %v2235_v43 = vstv %s566_s9  ;;  %2981 = vst [vmem:[#allocation47_spill] sm:$0xff] %v2243_v36  ;;  %1533 = vlog2.f32 %v700_v34  ;;  %v569_v39 = vmin.f32 %v2228_v27, %v1965_v21  ;;  %v571_v33 = vmax.f32 %v2231_v13, %v1963_v20 }
  0x6e   : > { %v2233_v41 = vstv %s567_s26  ;;  %2979 = vst [vmem:[#allocation46_spill] sm:$0xff] %v2235_v43  ;;  %s598_s16 = sadd.f32 %s596_s2, %s2172_s24  ;;  %v635_v42 = vsub.f32 %v1919_v5, %v2982_v57  ;;  %v640_v38 = vsub.f32 %v1938_v10, %v2983_v49  ;;  %v577_v0 = vmax.f32 %v2235_v43, %v1977_v25  ;;  %v1442_v10 = vld [vmem:[%s2980_s13 + $0x1] sm:$0x1] }
  0x6f   : > { %2978 = vst [vmem:[#allocation45_spill] sm:$0xff] %v2233_v41  ;;  %s600_s29 = ssub.f32 %s2175_s27, %s599_s19  ;;  %v575_v6 = vmin.f32 %v2233_v41, %v1979_v26  ;;  %v417_v28 = vmax.f32 %v383_v50, %v416_v23  ;;  %v450_v5 = vsub.f32 %v2169_v32, %v449_v54  ;;  %v483_v57 = vmul.f32 0.5, %v482_v37  ;;  %v1526_v49 = vpop.eup %1525 }
  0x70   : > { %s601_s8 = sadd.f32 %s599_s19, %s2175_s27  ;;  %v757_v35 = vadd.f32 1.0, %v1522_v9  ;;  %v516_v34 = vsub.f32 %v515_v63, %v2238_v15  ;;  %v2263_v27 = vmul.f32 %v545_v45, %v539_v31  ;;  %v549_v13 = vadd.f32 %v2243_v36, %v2027_v53 }
  0x71   : > { %v2267_v41 = vstv %s597_s22  ;;  %v2269_v43 = vstv %s598_s16  ;;  %v2273_v32 = vstv %s600_s29  ;;  %v762_v9 = vadd.f32 1.0, %v1524_v44  ;;  %v1528_v50 = vpop.eup %1527  ;;  %s3020_s14 = sld [smem:[#allocation7_spill]] }
  0x72   : > { %2984 = vst [vmem:[#allocation48_spill] sm:$0xff] %v2267_v41  ;;  %v2271_v23 = vstv %s601_s8  ;;  %v572_v54 = vsub.f32 %v569_v39, %v571_v33  ;;  %v578_v37 = vsub.f32 %v575_v6, %v577_v0  ;;  %1535 = vpow2.f32 %v732_v18  ;;  %v1446_v0 = vld [vmem:[%s1731_s18 + $0xc] sm:$0x1]  ;;  %v1441_v6 = vld [vmem:[%s1731_s18 + $0xd] sm:$0x1]  ;;  %s3071_s17 = sld [smem:[#allocation57_spill]] }
  0x73   : > { %2985 = vst [vmem:[#allocation49_spill] sm:$0xff] %v2271_v23  ;;  %v901_v63 = vunpack.c.l.bf16 %v1442_v10  ;;  %v605_v31 = vmax.f32 %v2267_v41, %v1963_v20  ;;  %v636_v45 = vmul.f32 %v635_v42, %v635_v42  ;;  %v641_v36 = vmul.f32 %v640_v38, %v640_v38  ;;  %v1530_v48 = vpop.eup %1529 }
  0x74   : > { %1537 = vrcp.f32 %v757_v35  ;;  %v603_v44 = vmin.f32 %v2269_v43, %v1965_v21  ;;  %v609_v39 = vmin.f32 %v2271_v23, %v1979_v26  ;;  %v611_v18 = vmax.f32 %v2273_v32, %v1977_v25  ;;  %v2291_v26 = vld [vmem:[%s1731_s18 + $0x9] sm:$0x1] }
  0x75   : > { %1539 = vrcp.f32 %v762_v9  ;;  %v451_v33 = vmax.f32 %v417_v28, %v450_v5  ;;  %v484_v20 = vsub.f32 %v2201_v19, %v483_v57  ;;  %v517_v42 = vmul.f32 0.5, %v516_v34 }
  0x76   : > { %v550_v38 = vsub.f32 %v549_v13, %v2263_v27  ;;  %v1532_v35 = vpop.eup %1531  ;;  %v573_v10 = vmax.f32 %v572_v54, 0.0  ;;  %v579_v41 = vmax.f32 %v578_v37, 0.0  ;;  %v902_v21 = vsub.f32 2.0, %v901_v63 }
  0x77   : > { %v917_v23 = vunpack.c.l.bf16 %v1445_v11  ;;  %v2293_v25 = vstv %s581_s21  ;;  %v642_v9 = vadd.f32 %v641_v36, %v636_v45  ;;  %v2986_v19 = vmax.f32 %v1951_v14, 0.0  ;;  %v2308_v11 = vld [vmem:[%s1731_s18 + $0xa] sm:$0x1] }
  0x78   : > { %v923_v13 = vunpack.c.l.bf16 %v1446_v0  ;;  %v606_v5 = vsub.f32 %v603_v44, %v605_v31  ;;  %v612_v57 = vsub.f32 %v609_v39, %v611_v18  ;;  %v2987_v34 = vmax.f32 %v2010_v40, 0.0  ;;  %v1439_v18 = vld [vmem:[%s1693_s11 + $0x1a] sm:$0x3] }
  0x79   : > { %v2298_v28 = vsub.f32 %v2986_v19, %v2209_v30  ;;  %v2305_v37 = vunpack.c.l.bf16 %v1441_v6  ;;  %v485_v63 = vmax.f32 %v451_v33, %v484_v20  ;;  %v518_v36 = vsub.f32 %v2238_v15, %v517_v42 }
  0x7a   : > { %v2303_v54 = vsub.f32 %v2987_v34, %v2215_v24  ;;  %v551_v45 = vmul.f32 0.5, %v550_v38  ;;  %v1534_v30 = vpop.eup %1533  ;;  %v2314_v31 = vmul.f32 %v579_v41, %v573_v10  ;;  %v583_v44 = vadd.f32 %v2293_v25, %v2027_v53  ;;  %v2353_v34 = vld [vmem:[%s1693_s11 + $0x1c] sm:$0x3] }
  0x7b   : > { %2988 = vst [vmem:[#allocation50_spill] sm:$0xff] %v2305_v37  ;;  %v2319_v40 = vmul.f32 %v902_v21, %v2305_v37  ;;  %v918_v24 = vsub.f32 %v2082_v58, %v917_v23  ;;  %v648_v39 = vadd.f32 %v1862_v51, %v642_v9  ;;  %v768_v0 = vmul.f32 2.0, %v1526_v49 }
  0x7c   : > { %v924_v33 = vsub.f32 %v2153_v16, %v923_v13  ;;  %v607_v20 = vmax.f32 %v606_v5, 0.0  ;;  %v613_v42 = vmax.f32 %v612_v57, 0.0  ;;  %v667_v41 = vmul.f32 0.6931472, %v1528_v50 }
  0x7d   : > { %2989 = vst [vmem:[#allocation51_spill] sm:$0xff] %v2319_v40  ;;  %v771_v38 = vmul.f32 3.0, %v1532_v35  ;;  %v519_v6 = vmax.f32 %v485_v63, %v518_v36  ;;  %v552_v10 = vsub.f32 %v2263_v27, %v551_v45  ;;  %v2327_v19 = vstv %s615_s3  ;;  %v3004_v40 = vld [vmem:[#allocation41_spill] sm:$0xff] }
  0x7e   : > { %v685_v21 = vmul.f32 0.6931472, %v1530_v48  ;;  %v584_v58 = vsub.f32 %v583_v44, %v2314_v31  ;;  %v717_v51 = vadd.f32 1.0, %v2217_v2  ;;  %v2331_v49 = vmul.f32 %v918_v24, %v918_v24 }
  0x7f   : > { %v2333_v23 = vclamps-f32 %v1439_v18, 16.118095  ;;  %v1536_v16 = vpop.eup %1535  ;;  %v2335_v9 = vmul.f32 0.6931472, %v1534_v30  ;;  %v772_v50 = vmul.f32 0.5, %v768_v0  ;;  %v2337_v35 = vmul.f32 %v771_v38, %v768_v0 }
  0x80   : > { %v2339_v13 = vmul.f32 %v924_v33, %v924_v33  ;;  %v2343_v48 = vmul.f32 %v613_v42, %v607_v20  ;;  %v2347_v2 = vadd.f32 %v2327_v19, %v2027_v53  ;;  %v2350_v5 = vadd.f32 %v1897_v62, %v648_v39  ;;  %v2372_v39 = vld [vmem:[%s1693_s11 + $0x1e] sm:$0x3] }
  0x81   : > { %v2341_v27 = vpop.eup %1537  ;;  %v775_v57 = vmul.f32 0.5, %v771_v38  ;;  %v2357_v36 = vmax.f32 %v519_v6, %v552_v10  ;;  %v2360_v45 = vadd.f32 %v667_v41, %v1864_v52  ;;  %v2363_v30 = vadd.f32 %v685_v21, %v1917_v4 }
  0x82   : > { %v2355_v63 = vpop.eup %1539  ;;  %v764_v53 = vadd.f32 %v2341_v27, %v1883_v59  ;;  %v2367_v44 = vmul.f32 0.5, %v584_v58  ;;  %1541 = vlog2.f32 %v717_v51  ;;  %v734_v62 = vadd.f32 1.0, %v1536_v16 }
  0x83   : > { %v765_v24 = vadd.f32 %v2355_v63, %v1905_v1  ;;  %v788_v52 = vadd.f32 %v2337_v35, %v1871_v56  ;;  %v951_v4 = vand.u32 2147483647, %v2353_v34  ;;  %v618_v59 = vsub.f32 %v2347_v2, %v2343_v48 }
  0x84   : > { %v2374_v18 = vsub.f32 %v764_v53, %v772_v50  ;;  %v2376_v0 = vadd.f32 %v772_v50, %v764_v53  ;;  %v2389_v1 = vadd.f32 %v2337_v35, %v1928_v8  ;;  %v968_v6 = vand.u32 2147483647, %v2372_v39  ;;  %v3001_v8 = vld [vmem:[#allocation38_spill] sm:$0xff] }
  0x85   : > { %v2383_v33 = vsub.f32 %v765_v24, %v775_v57  ;;  %v2385_v20 = vadd.f32 %v775_v57, %v765_v24  ;;  %v952_v57 = vsub.f32 0.0, %v951_v4  ;;  %v2991_v4 = vld [vmem:[#allocation28_spill] sm:$0xff]  ;;  %1543 = vlog2.f32 %v734_v62 }
  0x86   : > { %v779_v42 = vmin.f32 %v1886_v60, %v2376_v0  ;;  %v780_v41 = vmax.f32 %v1869_v55, %v2374_v18  ;;  %v793_v38 = vmin.f32 %v1943_v12, %v2376_v0  ;;  %v794_v58 = vmax.f32 %v1923_v7, %v2374_v18 }
  0x87   : > { %v783_v10 = vmin.f32 %v1909_v3, %v2385_v20  ;;  %v784_v21 = vmax.f32 %v1889_v61, %v2383_v33  ;;  %v797_v51 = vmin.f32 %v1968_v22, %v2385_v20  ;;  %v798_v50 = vmax.f32 %v1957_v17, %v2383_v33  ;;  %v2990_v22 = vld [vmem:[#allocation27_spill] sm:$0xff] }
  0x88   : > { %v781_v16 = vsub.f32 %v779_v42, %v780_v41  ;;  %v807_v2 = vmin.f32 %v2014_v46, %v2376_v0  ;;  %v795_v24 = vsub.f32 %v793_v38, %v794_v58  ;;  %v808_v15 = vmax.f32 %v1982_v29, %v2374_v18  ;;  %v2992_v58 = vld [vmem:[#allocation29_spill] sm:$0xff] }
  0x89   : > { %v785_v53 = vsub.f32 %v783_v10, %v784_v21  ;;  %v811_v14 = vmin.f32 %v2017_v47, %v2385_v20  ;;  %v799_v3 = vsub.f32 %v797_v51, %v798_v50  ;;  %v812_v42 = vmax.f32 %v2990_v22, %v2383_v33  ;;  %v2993_v47 = vld [vmem:[#allocation30_spill] sm:$0xff]  ;;  %v2994_v22 = vld [vmem:[#allocation31_spill] sm:$0xff] }
  0x8a   : > { %v782_v61 = vmax.f32 %v781_v16, 0.0  ;;  %v969_v41 = vsub.f32 0.0, %v968_v6  ;;  %v796_v17 = vmax.f32 %v795_v24, 0.0  ;;  %v809_v12 = vsub.f32 %v807_v2, %v808_v15 }
  0x8b   : > { %v786_v7 = vmax.f32 %v785_v53, 0.0  ;;  %v821_v10 = vmin.f32 %v2991_v4, %v2376_v0  ;;  %v800_v38 = vmax.f32 %v799_v3, 0.0  ;;  %v813_v21 = vsub.f32 %v811_v14, %v812_v42  ;;  %v2995_v53 = vld [vmem:[#allocation33_spill] sm:$0xff]  ;;  %v2996_v3 = vld [vmem:[#allocation32_spill] sm:$0xff]  ;;  %v2431_v42 = vld [vmem:[%s1693_s11 + $0x20] sm:$0x3] }
  0x8c   : > { %v822_v29 = vmax.f32 %v2992_v58, %v2374_v18  ;;  %v825_v16 = vmin.f32 %v2993_v47, %v2385_v20  ;;  %v810_v50 = vmax.f32 %v809_v12, 0.0  ;;  %v826_v6 = vmax.f32 %v2994_v22, %v2383_v33  ;;  %v2998_v12 = vld [vmem:[#allocation35_spill] sm:$0xff] }
  0x8d   : > { %v787_v51 = vmul.f32 %v786_v7, %v782_v61  ;;  %v835_v24 = vmin.f32 %v2995_v53, %v2376_v0  ;;  %v2426_v15 = vmul.f32 %v800_v38, %v796_v17  ;;  %v814_v2 = vmax.f32 %v813_v21, 0.0  ;;  %v2997_v61 = vld [vmem:[#allocation34_spill] sm:$0xff]  ;;  %v2999_v17 = vld [vmem:[#allocation36_spill] sm:$0xff] }
  0x8e   : > { %v823_v4 = vsub.f32 %v821_v10, %v822_v29  ;;  %v836_v14 = vmax.f32 %v2996_v3, %v2374_v18  ;;  %v827_v46 = vsub.f32 %v825_v16, %v826_v6  ;;  %v839_v7 = vmin.f32 %v2997_v61, %v2385_v20  ;;  %v3000_v29 = vld [vmem:[#allocation37_spill] sm:$0xff] }
  0x8f   : > { %v789_v58 = vsub.f32 %v788_v52, %v787_v51  ;;  %v840_v22 = vmax.f32 %v2998_v12, %v2383_v33  ;;  %v2437_v47 = vpop.eup %1541  ;;  %v816_v38 = vadd.f32 %v2337_v35, %v2999_v17  ;;  %v830_v10 = vadd.f32 %v2337_v35, %v3000_v29 }
  0x90   : > { %v933_v21 = vand.u32 2147483647, %v2333_v23  ;;  %v586_v52 = vsub.f32 %v2314_v31, %v2367_v44  ;;  %v619_v16 = vmul.f32 0.5, %v618_v59  ;;  %v953_v6 = vmul.f32 1.442695, %v952_v57  ;;  %v3002_v31 = vld [vmem:[#allocation39_spill] sm:$0xff] }
  0x91   : > { %v985_v61 = vand.u32 2147483647, %v2431_v42  ;;  %v803_v12 = vsub.f32 %v2389_v1, %v2426_v15  ;;  %v2449_v3 = vmul.f32 %v814_v2, %v810_v50  ;;  %v824_v62 = vmax.f32 %v823_v4, 0.0  ;;  %v3003_v59 = vld [vmem:[#allocation40_spill] sm:$0xff] }
  0x92   : > { %v970_v53 = vmul.f32 1.442695, %v969_v41  ;;  %v790_v55 = vmul.f32 0.5, %v789_v58  ;;  %v828_v60 = vmax.f32 %v827_v46, 0.0  ;;  %v837_v17 = vsub.f32 %v835_v24, %v836_v14 }
  0x93   : > { %v841_v29 = vsub.f32 %v839_v7, %v840_v22  ;;  %v849_v56 = vmin.f32 %v3001_v8, %v2376_v0  ;;  %v850_v44 = vmax.f32 %v3002_v31, %v2374_v18  ;;  %v853_v57 = vmin.f32 %v3003_v59, %v2385_v20 }
  0x94   : > { %v854_v1 = vmax.f32 %v3004_v40, %v2383_v33  ;;  %v587_v50 = vmax.f32 %v2357_v36, %v586_v52  ;;  %v620_v41 = vsub.f32 %v2343_v48, %v619_v16  ;;  %v934_v4 = vsub.f32 0.0, %v933_v21  ;;  %v3005_v40 = vld [vmem:[#allocation43_spill] sm:$0xff]  ;;  %v3006_v36 = vld [vmem:[#allocation44_spill] sm:$0xff]  ;;  %v3007_v21 = vld [vmem:[#allocation21_spill] sm:$0xff] }
  0x95   : > { %1545 = vpow2.f32 %v953_v6  ;;  %v804_v46 = vmul.f32 0.5, %v803_v12  ;;  %v817_v22 = vsub.f32 %v816_v38, %v2449_v3  ;;  %v986_v58 = vsub.f32 0.0, %v985_v61  ;;  %v3008_v52 = vld [vmem:[#allocation42_spill] sm:$0xff] }
  0x96   : > { %1547 = vpow2.f32 %v970_v53  ;;  %v791_v24 = vsub.f32 %v787_v51, %v790_v55  ;;  %v2462_v2 = vmul.f32 %v828_v60, %v824_v62  ;;  %v838_v14 = vmax.f32 %v837_v17, 0.0  ;;  %v3009_v55 = vld [vmem:[#allocation45_spill] sm:$0xff]  ;;  %v3010_v51 = vld [vmem:[#allocation46_spill] sm:$0xff] }
  0x97   : > { %v842_v7 = vmax.f32 %v841_v29, 0.0  ;;  %v851_v59 = vsub.f32 %v849_v56, %v850_v44  ;;  %v855_v31 = vsub.f32 %v853_v57, %v854_v1  ;;  %v863_v8 = vmin.f32 %v3005_v40, %v2376_v0 }
  0x98   : > { %v864_v48 = vmax.f32 %v3006_v36, %v2374_v18  ;;  %v703_v12 = vadd.f32 %v2335_v9, %v3007_v21  ;;  %v844_v53 = vadd.f32 %v2337_v35, %v3008_v52  ;;  %v867_v60 = vmin.f32 %v3009_v55, %v2385_v20  ;;  %v1544_v55 = vpop.eup %1543 }
  0x99   : > { %v868_v61 = vmax.f32 %v3010_v51, %v2383_v33  ;;  %v621_v56 = vmax.f32 %v587_v50, %v620_v41  ;;  %v805_v17 = vsub.f32 %v2426_v15, %v804_v46  ;;  %v935_v38 = vmul.f32 1.442695, %v934_v4  ;;  %v3011_v50 = vld [vmem:[#allocation48_spill] sm:$0xff]  ;;  %v3012_v41 = vld [vmem:[#allocation49_spill] sm:$0xff] }
  0x9a   : > { %v987_v29 = vmul.f32 1.442695, %v986_v58  ;;  %v792_v16 = vmax.f32 %v791_v24, 0.0  ;;  %v818_v6 = vmul.f32 0.5, %v817_v22  ;;  %v831_v62 = vsub.f32 %v830_v10, %v2462_v2  ;;  %v3013_v46 = vld [vmem:[#allocation12_spill] sm:$0xff] }
  0x9b   : > { %v2478_v44 = vmul.f32 %v842_v7, %v838_v14  ;;  %v852_v9 = vmax.f32 %v851_v59, 0.0  ;;  %v856_v57 = vmax.f32 %v855_v31, 0.0  ;;  %v865_v1 = vsub.f32 %v863_v8, %v864_v48  ;;  %v1457_v24 = vld [vmem:[%s1693_s11 + $0x26] sm:$0x3] }
  0x9c   : > { %v877_v21 = vmin.f32 %v2269_v43, %v2376_v0  ;;  %v869_v36 = vsub.f32 %v867_v60, %v868_v61  ;;  %v878_v15 = vmax.f32 %v3011_v50, %v2374_v18  ;;  %v881_v4 = vmin.f32 %v3012_v41, %v2385_v20  ;;  %v3014_v0 = vld [vmem:[#allocation47_spill] sm:$0xff]  ;;  %v2506_v60 = vld [vmem:[%s1693_s11 + $0x22] sm:$0x3] }
  0x9d   : > { %v882_v10 = vmax.f32 %v2273_v32, %v2383_v33  ;;  %v2490_v31 = vmul.f32 %v2350_v5, %v3013_v46  ;;  %v704_v8 = vadd.f32 %v703_v12, %v2363_v30  ;;  %v858_v59 = vadd.f32 %v2337_v35, %v3014_v0  ;;  %v1456_v30 = vld [vmem:[%s1693_s11 + $0x24] sm:$0x3] }
  0x9e   : > { %1549 = vpow2.f32 %v935_v38  ;;  %v806_v22 = vmax.f32 %v792_v16, %v805_v17  ;;  %v819_v18 = vsub.f32 %v2449_v3, %v818_v6  ;;  %v832_v58 = vmul.f32 0.5, %v831_v62 }
  0x9f   : > { %v2498_v20 = vadd.f32 %v2337_v35, %v2293_v25  ;;  %vm622_vm0 = vcmp.gt.f32.partialorder %v621_v56, 0.0  ;;  %v845_v33 = vsub.f32 %v844_v53, %v2478_v44  ;;  %v2501_v5 = vmul.f32 %v856_v57, %v852_v9 }
  0xa0   : > { %1551 = vpow2.f32 %v987_v29  ;;  %v866_v14 = vmax.f32 %v865_v1, 0.0  ;;  %v870_v7 = vmax.f32 %v869_v36, 0.0  ;;  %v879_v48 = vsub.f32 %v877_v21, %v878_v15 }
  0xa1   : > { %v883_v12 = vsub.f32 %v881_v4, %v882_v10  ;;  %v719_v61 = vmul.f32 0.6931472, %v2437_v47  ;;  %v2511_v17 = vadd.f32 %v2337_v35, %v2327_v19  ;;  %v3015_v53 = vunpack.c.l.bf16 %v2291_v26  ;;  %v3017_v47 = vld [vmem:[#allocation11_spill] sm:$0xff] }
  0xa2   : > { %v1546_v3 = vpop.eup %1545  ;;  %v3016_v29 = vunpack.c.l.bf16 %v2308_v11  ;;  %v820_v6 = vmax.f32 %v806_v22, %v819_v18  ;;  %v833_v62 = vsub.f32 %v2462_v2, %v832_v58  ;;  %v1026_v9 = vsub.f32 0.0, %v1456_v30  ;;  %v1460_v4 = vld [vmem:[%s1693_s11 + $0x2c] sm:$0x3] }
  0xa3   : > { %v907_v38 = vsub.f32 %v2341_v27, %v3015_v53  ;;  %v1548_v16 = vpop.eup %1547  ;;  %v1031_v57 = vsub.f32 0.0, %v1457_v24  ;;  %v3018_v1 = vunpack.c.l.bf16 %v3017_v47  ;;  %v846_v35 = vmul.f32 0.5, %v845_v33  ;;  %v2530_v24 = vld [vmem:[%s1693_s11 + $0x28] sm:$0x3]  ;;  %v2550_v47 = vld [vmem:[%s1693_s11 + $0x2e] sm:$0x3] }
  0xa4   : > { %v912_v36 = vsub.f32 %v2355_v63, %v3016_v29  ;;  %v859_v26 = vsub.f32 %v858_v59, %v2501_v5  ;;  %v1002_v27 = vand.u32 2147483647, %v2506_v60  ;;  %v2525_v15 = vmul.f32 %v870_v7, %v866_v14 }
  0xa5   : > { %v625_v21 = vsel %vm622_vm0, 0.0, %v3018_v1  ;;  %v880_v11 = vmax.f32 %v879_v48, 0.0  ;;  %v884_v63 = vmax.f32 %v883_v12, 0.0  ;;  %v1027_v10 = vmul.f32 1.442695, %v1026_v9 }
  0xa6   : > { %v720_v2 = vadd.f32 %v719_v61, %v2298_v28  ;;  %v736_v46 = vmul.f32 0.6931472, %v1544_v55  ;;  %v955_v22 = vadd.f32 1.0, %v1546_v3  ;;  %v1032_v18 = vmul.f32 1.442695, %v1031_v57  ;;  %v3019_v3 = vld [vmem:[#allocation10_spill] sm:$0xff] }
  0xa7   : > { %v834_v56 = vmax.f32 %v820_v6, %v833_v62  ;;  %v908_v58 = vmul.f32 %v907_v38, %v907_v38  ;;  %v913_v33 = vmul.f32 %v912_v36, %v912_v36  ;;  %v972_v30 = vadd.f32 1.0, %v1548_v16  ;;  %v2534_v48 = vld [vmem:[%s1693_s11 + $0x2a] sm:$0x3]  ;;  %v1449_v16 = vld [vmem:[%s1731_s18 + $0xe] sm:$0x1] }
  0xa8   : > { %v847_v59 = vsub.f32 %v2478_v44, %v846_v35  ;;  %v860_v14 = vmul.f32 0.5, %v859_v26  ;;  %v1003_v7 = vsub.f32 0.0, %v1002_v27  ;;  %1553 = vpow2.f32 %v1027_v10 }
  0xa9   : > { %v873_v28 = vsub.f32 %v2498_v20, %v2525_v15  ;;  %v2538_v55 = vmul.f32 %v884_v63, %v880_v11  ;;  %1555 = vpow2.f32 %v1032_v18  ;;  %v2540_v12 = vclamps-f32 %v1460_v4, 16.118095  ;;  %v1451_v11 = vld [vmem:[%s1731_s18 + $0xf] sm:$0x1]  ;;  %v1453_v18 = vld [vmem:[%s1731_s18 + $0x10] sm:$0x1] }
  0xaa   : > { %v669_v61 = vadd.f32 %v3019_v3, %v625_v21  ;;  %v930_v53 = vmax.f32 %v2333_v23, 0.0  ;;  %1557 = vlog2.f32 %v955_v22  ;;  %v1038_v44 = vmul.f32 1.442695, %v2530_v24 }
  0xab   : > { %v1550_v38 = vpop.eup %1549  ;;  %v721_v29 = vadd.f32 %v720_v2, %v704_v8  ;;  %v737_v36 = vadd.f32 %v736_v46, %v2303_v54  ;;  %1559 = vlog2.f32 %v972_v30  ;;  %v1041_v20 = vmul.f32 1.442695, %v2534_v48 }
  0xac   : > { %v848_v6 = vmax.f32 %v834_v56, %v847_v59  ;;  %v861_v62 = vsub.f32 %v2501_v5, %v860_v14  ;;  %v914_v9 = vadd.f32 %v913_v33, %v908_v58  ;;  %v1004_v57 = vmul.f32 1.442695, %v1003_v7  ;;  %v1455_v56 = vld [vmem:[%s1731_s18 + $0x11] sm:$0x1] }
  0xad   : > { %v1552_v1 = vpop.eup %1551  ;;  %v874_v21 = vmul.f32 0.5, %v873_v28  ;;  %v887_v8 = vsub.f32 %v2511_v17, %v2538_v55  ;;  %v2556_v54 = vmul.f32 %v2333_v23, %v2305_v37  ;;  %v1205_v35 = vand.u32 2147483647, %v2540_v12  ;;  %v2563_v17 = vld [vmem:[%s1693_s11 + $0x30] sm:$0x3] }
  0xae   : > { %v670_v5 = vmul.f32 %v669_v61, %v2360_v45  ;;  %v937_v26 = vadd.f32 1.0, %v1550_v38  ;;  %v947_v27 = vunpack.c.l.bf16 %v1449_v16  ;;  %1561 = vpow2.f32 %v1038_v44 }
  0xaf   : > { %v989_v63 = vadd.f32 1.0, %v1552_v1  ;;  %1563 = vpow2.f32 %v1041_v20  ;;  %v1206_v4 = vsub.f32 0.0, %v1205_v35  ;;  %v1223_v10 = vand.u32 2147483647, %v2550_v47  ;;  %v2579_v1 = vld [vmem:[%s1693_s11 + $0x32] sm:$0x3] }
  0xb0   : > { %v738_v2 = vadd.f32 %v737_v36, %v721_v29  ;;  %v862_v46 = vmax.f32 %v848_v6, %v861_v62  ;;  %v920_v22 = vadd.f32 %v2331_v49, %v914_v9  ;;  %1565 = vpow2.f32 %v1004_v57  ;;  %3021 = vst [vmem:[#allocation43_spill] sm:$0xff] %v2579_v1 }
  0xb1   : > { %v875_v45 = vsub.f32 %v2525_v15, %v874_v21  ;;  %v888_v58 = vmul.f32 0.5, %v887_v8  ;;  %v1207_v33 = vmul.f32 1.442695, %v1206_v4  ;;  %v1224_v30 = vsub.f32 0.0, %v1223_v10  ;;  %v1440_v21 = vld [vmem:[%s3020_s14 + $0x1] sm:$0x1] }
  0xb2   : > { %1567 = vlog2.f32 %v937_v26  ;;  %v948_v59 = vmax.f32 %v2353_v34, 0.0  ;;  %v964_v14 = vunpack.c.l.bf16 %v1451_v11  ;;  %v1240_v7 = vand.u32 2147483647, %v2563_v17  ;;  %v2589_v4 = vld [vmem:[%s1693_s11 + $0x34] sm:$0x3] }
  0xb3   : > { %v981_v28 = vunpack.c.l.bf16 %v1453_v18  ;;  %1569 = vlog2.f32 %v989_v63  ;;  %v998_v61 = vunpack.c.l.bf16 %v1455_v56  ;;  %v1225_v44 = vmul.f32 1.442695, %v1224_v30  ;;  %v1466_v63 = vld [vmem:[%s1731_s18 + $0x14] sm:$0x1]  ;;  %3023 = vst [vmem:[#allocation21_spill] sm:$0xff] %v2589_v4 }
  0xb4   : > { %v740_v49 = vadd.f32 %v670_v5, %v2490_v31  ;;  %v741_v38 = vmul.f32 %v738_v2, %v3019_v3  ;;  %v926_v15 = vadd.f32 %v2339_v13, %v920_v22  ;;  %1571 = vpow2.f32 %v1207_v33  ;;  %v1463_v2 = vld [vmem:[%s2980_s13 + $0x2] sm:$0x1] }
  0xb5   : > { %v1554_v29 = vpop.eup %1553  ;;  %v876_v36 = vmax.f32 %v862_v46, %v875_v45  ;;  %v889_v16 = vsub.f32 %v2538_v55, %v888_v58  ;;  %1573 = vpow2.f32 %v1225_v44  ;;  %v1241_v20 = vsub.f32 0.0, %v1240_v7  ;;  %v1467_v58 = vld [vmem:[%s1731_s18 + $0x15] sm:$0x1] }
  0xb6   : > { %v1556_v6 = vpop.eup %1555  ;;  %v949_v62 = vmul.f32 %v2353_v34, %v947_v27  ;;  %v965_v9 = vmax.f32 %v2372_v39, 0.0  ;;  %v966_v31 = vmul.f32 %v2372_v39, %v964_v14  ;;  %v1029_v57 = vadd.f32 1.0, %v1554_v29  ;;  %v3022_v27 = vld [vmem:[#allocation51_spill] sm:$0xff] }
  0xb7   : > { %v1558_v13 = vpop.eup %1557  ;;  %v982_v8 = vmax.f32 %v2431_v42, 0.0  ;;  %v983_v55 = vmul.f32 %v2431_v42, %v981_v28  ;;  %v999_v35 = vmax.f32 %v2506_v60, 0.0  ;;  %v1034_v5 = vadd.f32 1.0, %v1556_v6  ;;  %v2603_v28 = vld [vmem:[%s3020_s14 + $0x2] sm:$0x1] }
  0xb8   : > { %v1560_v34 = vpop.eup %1559  ;;  %v742_v26 = vadd.f32 %v741_v38, %v740_v49  ;;  %v927_v11 = vmul.f32 %v926_v15, %v3022_v27  ;;  %v1000_v39 = vmul.f32 %v2506_v60, %v998_v61  ;;  %1575 = vrcp.f32 %v1029_v57  ;;  %v1462_v60 = vld [vmem:[%s1731_s18 + $0x16] sm:$0x1]  ;;  %3024 = vst [vmem:[#allocation42_spill] sm:$0xff] %v2603_v28  ;;  %v1464_v38 = vld [vmem:[%s1731_s18 + $0x12] sm:$0x1] }
  0xb9   : > { %v890_v10 = vmax.f32 %v876_v36, %v889_v16  ;;  %1577 = vrcp.f32 %v1034_v5  ;;  %v1242_v42 = vmul.f32 1.442695, %v1241_v20  ;;  %v1257_v46 = vand.u32 2147483647, %v2579_v1  ;;  %v2616_v15 = vld [vmem:[%s1731_s18 + $0x13] sm:$0x1] }
  0xba   : > { %v894_v22 = vunpack.c.l.bf16 %v1440_v21  ;;  %v2596_v18 = vsub.f32 %v930_v53, %v2556_v54  ;;  %v950_v56 = vsub.f32 %v948_v59, %v949_v62  ;;  %v957_v45 = vmul.f32 0.6931472, %v1558_v13  ;;  %v2622_v13 = vld [vmem:[%s1731_s18 + $0x17] sm:$0x1] }
  0xbb   : > { %v1562_v33 = vpop.eup %1561  ;;  %v967_v30 = vsub.f32 %v965_v9, %v966_v31  ;;  %v974_v14 = vmul.f32 0.6931472, %v1560_v34  ;;  %v2600_v7 = vsub.f32 %v982_v8, %v983_v55  ;;  %v1274_v61 = vand.u32 2147483647, %v2589_v4  ;;  %v3040_v20 = vld [vmem:[#allocation24_spill] sm:$0xff] }
  0xbc   : > { %v1564_v44 = vpop.eup %1563  ;;  %v2606_v49 = vsub.f32 %v999_v35, %v1000_v39  ;;  %v2608_v23 = vadd.f32 %v927_v11, %v742_v26  ;;  %v2612_v53 = vadd.f32 %v2305_v37, %v3019_v3  ;;  %v1173_v54 = vunpack.c.l.bf16 %v1463_v2 }
  0xbd   : > { %v1566_v59 = vpop.eup %1565  ;;  %vm891_vm1 = vcmp.gt.f32.partialorder %v890_v10, 0.0  ;;  %v1189_v29 = vunpack.c.l.bf16 %v1466_v63  ;;  %1579 = vpow2.f32 %v1242_v42  ;;  %v1258_v36 = vsub.f32 0.0, %v1257_v46  ;;  %v3041_v10 = vld [vmem:[#allocation26_spill] sm:$0xff] }
  0xbe   : > { %3025 = vst [vmem:[#allocation46_spill] sm:$0xff] %v2608_v23  ;;  %3026 = vst [vmem:[#allocation48_spill] sm:$0xff] %v2612_v53  ;;  %v958_v16 = vadd.f32 %v957_v45, %v950_v56  ;;  %v2619_v6 = vunpack.c.l.bf16 %v1462_v60  ;;  %v1195_v62 = vunpack.c.l.bf16 %v1467_v58  ;;  %v975_v31 = vadd.f32 %v974_v14, %v967_v30 }
  0xbf   : > { %v1568_v9 = vpop.eup %1567  ;;  %v1040_v3 = vmul.f32 4.0, %v1562_v33  ;;  %v1043_v57 = vmul.f32 2.0, %v1564_v44  ;;  %v1275_v21 = vsub.f32 0.0, %v1274_v61  ;;  %v895_v55 = vsel %vm891_vm1, 0.0, %v894_v22  ;;  %v3027_v61 = vld [vmem:[#allocation14_spill] sm:$0xff]  ;;  %v3028_v44 = vld [vmem:[#allocation19_spill] sm:$0xff] }
  0xc0   : > { %v1570_v8 = vpop.eup %1569  ;;  %v1006_v35 = vadd.f32 1.0, %v1566_v59  ;;  %v1178_v5 = vunpack.c.l.bf16 %v1464_v38  ;;  %v1183_v34 = vunpack.c.l.bf16 %v2616_v15  ;;  %v2628_v11 = vsub.f32 2.0, %v1173_v54  ;;  %v1597_v15 = vld [vmem:[%s2840_s5] sm:$0x3] }
  0xc1   : > { %v1572_v26 = vpop.eup %1571  ;;  %v2626_v27 = vmul.f32 %v1043_v57, %v1040_v3  ;;  %v2631_v39 = vsub.f32 %v2530_v24, %v1189_v29  ;;  %v1259_v63 = vmul.f32 1.442695, %v1258_v36  ;;  %v2633_v42 = vmul.f32 0.6931472, %v1568_v9  ;;  %v3029_v36 = vld [vmem:[#allocation36_spill] sm:$0xff] }
  0xc2   : > { %v1574_v2 = vpop.eup %1573  ;;  %v2636_v46 = vsub.f32 %v2534_v48, %v1195_v62  ;;  %v2641_v56 = vadd.f32 %v2305_v37, %v895_v55  ;;  %v2643_v45 = vadd.f32 %v975_v31, %v958_v16  ;;  %v1044_v60 = vmul.f32 0.5, %v1040_v3  ;;  %v3030_v62 = vld [vmem:[#allocation37_spill] sm:$0xff]  ;;  %v1598_v3 = vld [vmem:[%s2840_s5 + $0x2] sm:$0x3] }
  0xc3   : > { %v1276_v58 = vmul.f32 1.442695, %v1275_v21  ;;  %v991_v24 = vmul.f32 0.6931472, %v1570_v8  ;;  %1581 = vlog2.f32 %v1006_v35  ;;  %v1047_v33 = vmul.f32 0.5, %v1043_v57 }
  0xc4   : > { %v1209_v30 = vadd.f32 1.0, %v1572_v26  ;;  %v2647_v48 = vadd.f32 %v2626_v27, %v3027_v61  ;;  %v2651_v54 = vadd.f32 %v2626_v27, %v3028_v44  ;;  %v1227_v59 = vadd.f32 1.0, %v1574_v2 }
  0xc5   : > { %v1576_v14 = vpop.eup %1575  ;;  %1583 = vpow2.f32 %v1259_v63  ;;  %v2658_v16 = vadd.f32 %v2626_v27, %v3029_v36  ;;  %v2662_v9 = vadd.f32 %v2626_v27, %v3030_v62  ;;  %v2666_v31 = vadd.f32 %v2626_v27, %v3008_v52 }
  0xc6   : > { %v1578_v38 = vpop.eup %1577  ;;  %v1036_v29 = vadd.f32 %v1597_v15, %v1576_v14  ;;  %v2673_v21 = vadd.f32 %v2626_v27, %v3014_v0  ;;  %v2677_v8 = vadd.f32 %v2626_v27, %v2293_v25  ;;  %1585 = vpow2.f32 %v1276_v58  ;;  %v3031_v25 = vld [vmem:[#allocation15_spill] sm:$0xff]  ;;  %v3032_v58 = vld [vmem:[#allocation13_spill] sm:$0xff] }
  0xc7   : > { %v1037_v57 = vadd.f32 %v1598_v3, %v1578_v38  ;;  %v2680_v55 = vadd.f32 %v991_v24, %v2600_v7  ;;  %1587 = vlog2.f32 %v1209_v30  ;;  %v2690_v2 = vsub.f32 %v1576_v14, %v1178_v5  ;;  %v3033_v24 = vld [vmem:[#allocation20_spill] sm:$0xff]  ;;  %v3035_v15 = vld [vmem:[#allocation17_spill] sm:$0xff] }
  0xc8   : > { %v2682_v35 = vsub.f32 %v1036_v29, %v1044_v60  ;;  %v2684_v52 = vadd.f32 %v1044_v60, %v1036_v29  ;;  %1589 = vlog2.f32 %v1227_v59  ;;  %v3034_v60 = vld [vmem:[#allocation18_spill] sm:$0xff]  ;;  %v3036_v5 = vld [vmem:[#allocation16_spill] sm:$0xff]  ;;  %v3037_v59 = vld [vmem:[#allocation23_spill] sm:$0xff]  ;;  %v2706_v36 = vsub.f32 %v1578_v38, %v1183_v34 }
  0xc9   : > { %v2686_v26 = vsub.f32 %v1037_v57, %v1047_v33  ;;  %v2688_v63 = vadd.f32 %v1047_v33, %v1037_v57  ;;  %v3038_v57 = vld [vmem:[#allocation22_spill] sm:$0xff] }
  0xca   : > { %v1580_v0 = vpop.eup %1579  ;;  %v1051_v61 = vmin.f32 %v3031_v25, %v2684_v52  ;;  %v1052_v7 = vmax.f32 %v3032_v58, %v2682_v35  ;;  %v1065_v44 = vmin.f32 %v3033_v24, %v2684_v52  ;;  %v1066_v30 = vmax.f32 %v3034_v60, %v2682_v35  ;;  %v3039_v58 = vld [vmem:[#allocation25_spill] sm:$0xff] }
  0xcb   : > { %v1055_v33 = vmin.f32 %v3035_v15, %v2688_v63  ;;  %v1056_v14 = vmax.f32 %v3036_v5, %v2686_v26  ;;  %v1069_v29 = vmin.f32 %v3037_v59, %v2688_v63  ;;  %v1070_v25 = vmax.f32 %v3038_v57, %v2686_v26  ;;  %v3043_v57 = vld [vmem:[#allocation28_spill] sm:$0xff] }
  0xcc   : > { %v1053_v62 = vsub.f32 %v1051_v61, %v1052_v7  ;;  %v1067_v3 = vsub.f32 %v1065_v44, %v1066_v30  ;;  %v1079_v24 = vmin.f32 %v3039_v58, %v2684_v52  ;;  %v1080_v15 = vmax.f32 %v3040_v20, %v2682_v35  ;;  %v3042_v61 = vld [vmem:[#allocation27_spill] sm:$0xff] }
  0xcd   : > { %v1057_v60 = vsub.f32 %v1055_v33, %v1056_v14  ;;  %v1083_v5 = vmin.f32 %v3041_v10, %v2688_v63  ;;  %v2716_v22 = vadd.f32 1.0, %v1580_v0  ;;  %v1071_v38 = vsub.f32 %v1069_v29, %v1070_v25  ;;  %v3044_v33 = vld [vmem:[#allocation29_spill] sm:$0xff]  ;;  %v3045_v10 = vld [vmem:[#allocation30_spill] sm:$0xff] }
  0xce   : > { %v1054_v59 = vmax.f32 %v1053_v62, 0.0  ;;  %v1068_v34 = vmax.f32 %v1067_v3, 0.0  ;;  %v1084_v7 = vmax.f32 %v3042_v61, %v2686_v26  ;;  %v1081_v30 = vsub.f32 %v1079_v24, %v1080_v15  ;;  %v3046_v62 = vld [vmem:[#allocation31_spill] sm:$0xff]  ;;  %v3047_v24 = vld [vmem:[#allocation33_spill] sm:$0xff] }
  0xcf   : > { %v1058_v44 = vmax.f32 %v1057_v60, 0.0  ;;  %v1093_v58 = vmin.f32 %v3043_v57, %v2684_v52  ;;  %v1094_v14 = vmax.f32 %v3044_v33, %v2682_v35  ;;  %v1072_v20 = vmax.f32 %v1071_v38, 0.0 }
  0xd0   : > { %v1085_v28 = vsub.f32 %v1083_v5, %v1084_v7  ;;  %v1097_v0 = vmin.f32 %v3045_v10, %v2688_v63  ;;  %v1098_v3 = vmax.f32 %v3046_v62, %v2686_v26  ;;  %v2728_v29 = vpop.eup %1581  ;;  %v1082_v61 = vmax.f32 %v1081_v30, 0.0  ;;  %v3048_v5 = vld [vmem:[#allocation32_spill] sm:$0xff]  ;;  %v3049_v62 = vld [vmem:[#allocation34_spill] sm:$0xff] }
  0xd1   : > { %v1059_v25 = vmul.f32 %v1058_v44, %v1054_v59  ;;  %v1095_v60 = vsub.f32 %v1093_v58, %v1094_v14  ;;  %v1107_v15 = vmin.f32 %v3047_v24, %v2684_v52  ;;  %v1073_v4 = vmul.f32 %v1072_v20, %v1068_v34  ;;  %v3050_v59 = vld [vmem:[#allocation35_spill] sm:$0xff] }
  0xd2   : > { %v2732_v57 = vpop.eup %1583  ;;  %v1086_v33 = vmax.f32 %v1085_v28, 0.0  ;;  %v1099_v38 = vsub.f32 %v1097_v0, %v1098_v3  ;;  %v1108_v7 = vmax.f32 %v3048_v5, %v2682_v35  ;;  %v1111_v37 = vmin.f32 %v3049_v62, %v2688_v63  ;;  %v3053_v24 = vld [vmem:[#allocation39_spill] sm:$0xff] }
  0xd3   : > { %v1061_v10 = vsub.f32 %v2647_v48, %v1059_v25  ;;  %v1096_v53 = vmax.f32 %v1095_v60, 0.0  ;;  %v1112_v44 = vmax.f32 %v3050_v59, %v2686_v26  ;;  %v2741_v30 = vpop.eup %1585  ;;  %v1075_v58 = vsub.f32 %v2651_v54, %v1073_v4  ;;  %v3052_v48 = vld [vmem:[#allocation38_spill] sm:$0xff] }
  0xd4   : > { %v1087_v14 = vmul.f32 %v1086_v33, %v1082_v61  ;;  %v1100_v34 = vmax.f32 %v1099_v38, 0.0  ;;  %v1109_v28 = vsub.f32 %v1107_v15, %v1108_v7  ;;  %v2744_v20 = vpop.eup %1587  ;;  %v1121_v60 = vmin.f32 %v3052_v48, %v2684_v52  ;;  %v3055_v38 = vld [vmem:[#allocation40_spill] sm:$0xff]  ;;  %v3056_v48 = vld [vmem:[#allocation41_spill] sm:$0xff] }
  0xd5   : > { %3051 = vst [vmem:[#allocation49_spill] sm:$0xff] %v2744_v20  ;;  %v1062_v0 = vmul.f32 0.5, %v1061_v10  ;;  %v1113_v3 = vsub.f32 %v1111_v37, %v1112_v44  ;;  %v1122_v5 = vmax.f32 %v3053_v24, %v2682_v35  ;;  %v2750_v62 = vpop.eup %1589  ;;  %v1076_v59 = vmul.f32 0.5, %v1075_v58 }
  0xd6   : > { %3054 = vst [vmem:[#allocation12_spill] sm:$0xff] %v2750_v62  ;;  %v1089_v1 = vsub.f32 %v2658_v16, %v1087_v14  ;;  %v1101_v23 = vmul.f32 %v1100_v34, %v1096_v53  ;;  %v1110_v54 = vmax.f32 %v1109_v28, 0.0  ;;  %v1125_v7 = vmin.f32 %v3055_v38, %v2688_v63  ;;  %v3057_v28 = vld [vmem:[#allocation44_spill] sm:$0xff] }
  0xd7   : > { %v1063_v61 = vsub.f32 %v1059_v25, %v1062_v0  ;;  %v1114_v33 = vmax.f32 %v1113_v3, 0.0  ;;  %v1123_v15 = vsub.f32 %v1121_v60, %v1122_v5  ;;  %v1077_v37 = vsub.f32 %v1073_v4, %v1076_v59  ;;  %v3058_v4 = vld [vmem:[#allocation45_spill] sm:$0xff] }
  0xd8   : > { %v1090_v10 = vmul.f32 0.5, %v1089_v1  ;;  %v1103_v44 = vsub.f32 %v2662_v9, %v1101_v23  ;;  %v1126_v24 = vmax.f32 %v3056_v48, %v2686_v26  ;;  %v1135_v53 = vmin.f32 %v3005_v40, %v2684_v52 }
  0xd9   : > { %v1064_v20 = vmax.f32 %v1063_v61, 0.0  ;;  %v1115_v62 = vmul.f32 %v1114_v33, %v1110_v54  ;;  %v1124_v58 = vmax.f32 %v1123_v15, 0.0  ;;  %v1136_v0 = vmax.f32 %v3057_v28, %v2682_v35  ;;  %v1476_v28 = vld [vmem:[%s1731_s18 + $0x1a] sm:$0x1] }
  0xda   : > { %v1091_v16 = vsub.f32 %v1087_v14, %v1090_v10  ;;  %v1104_v25 = vmul.f32 0.5, %v1103_v44  ;;  %v1127_v34 = vsub.f32 %v1125_v7, %v1126_v24  ;;  %v1139_v9 = vmin.f32 %v3058_v4, %v2688_v63 }
  0xdb   : > { %v1078_v3 = vmax.f32 %v1064_v20, %v1077_v37  ;;  %v1117_v1 = vsub.f32 %v2666_v31, %v1115_v62  ;;  %v1140_v60 = vmax.f32 %v3010_v51, %v2686_v26  ;;  %v1137_v54 = vsub.f32 %v1135_v53, %v1136_v0  ;;  %v1474_v53 = vld [vmem:[%s1731_s18 + $0x19] sm:$0x1] }
  0xdc   : > { %v1105_v5 = vsub.f32 %v1101_v23, %v1104_v25  ;;  %v1128_v59 = vmax.f32 %v1127_v34, 0.0  ;;  %v1149_v40 = vmin.f32 %v2269_v43, %v2684_v52  ;;  %v1150_v20 = vmax.f32 %v3011_v50, %v2682_v35 }
  0xdd   : > { %v1092_v14 = vmax.f32 %v1078_v3, %v1091_v16  ;;  %v1118_v61 = vmul.f32 0.5, %v1117_v1  ;;  %v1141_v33 = vsub.f32 %v1139_v9, %v1140_v60  ;;  %v1138_v31 = vmax.f32 %v1137_v54, 0.0 }
  0xde   : > { %v1129_v15 = vmul.f32 %v1128_v59, %v1124_v58  ;;  %v1153_v38 = vmin.f32 %v3012_v41, %v2688_v63  ;;  %v1154_v51 = vmax.f32 %v2273_v32, %v2686_v26  ;;  %v1151_v10 = vsub.f32 %v1149_v40, %v1150_v20 }
  0xdf   : > { %v1106_v23 = vmax.f32 %v1092_v14, %v1105_v5  ;;  %v1119_v7 = vsub.f32 %v1115_v62, %v1118_v61  ;;  %v1142_v37 = vmax.f32 %v1141_v33, 0.0  ;;  %v940_v43 = vadd.f32 %v2633_v42, %v2596_v18  ;;  %v3061_v61 = vld [vmem:[#allocation46_spill] sm:$0xff] }
  0xe0   : > { %v1008_v52 = vmul.f32 0.6931472, %v2728_v29  ;;  %v1131_v44 = vsub.f32 %v2673_v21, %v1129_v15  ;;  %v1155_v50 = vsub.f32 %v1153_v38, %v1154_v51  ;;  %v1152_v48 = vmax.f32 %v1151_v10, 0.0  ;;  %v3064_v51 = vld [vmem:[#allocation49_spill] sm:$0xff]  ;;  %v3066_v10 = vld [vmem:[#allocation12_spill] sm:$0xff] }
  0xe1   : > { %v1143_v35 = vmul.f32 %v1142_v37, %v1138_v31  ;;  %v1180_v41 = vmul.f32 %v2690_v2, %v2690_v2  ;;  %v1185_v32 = vmul.f32 %v2706_v36, %v2706_v36  ;;  %v1120_v26 = vmax.f32 %v1106_v23, %v1119_v7  ;;  %v1472_v36 = vld [vmem:[%s1731_s18 + $0x18] sm:$0x1]  ;;  %v3063_v31 = vld [vmem:[#allocation50_spill] sm:$0xff]  ;;  %v3065_v23 = vld [vmem:[#allocation48_spill] sm:$0xff]  ;;  %s3070_s18 = sld [smem:[#allocation6_spill]] }
  0xe2   : > { %v1132_v63 = vmul.f32 0.5, %v1131_v44  ;;  %v1156_v62 = vmax.f32 %v1155_v50, 0.0  ;;  %v1158_v18 = vadd.f32 %v2626_v27, %v2327_v19  ;;  %v993_v42 = vadd.f32 %v2680_v55, %v2643_v45  ;;  %v3068_v50 = vld [vmem:[#allocation42_spill] sm:$0xff] }
  0xe3   : > { %v1145_v21 = vsub.f32 %v2677_v8, %v1143_v35  ;;  %1591 = vlog2.f32 %v2716_v22  ;;  %v1261_v29 = vadd.f32 1.0, %v2732_v57  ;;  %v1009_v2 = vadd.f32 %v1008_v52, %v2606_v49  ;;  %v3067_v52 = vld [vmem:[#allocation21_spill] sm:$0xff] }
  0xe4   : > { %v1133_v24 = vsub.f32 %v1129_v15, %v1132_v63  ;;  %v1157_v58 = vmul.f32 %v1156_v62, %v1152_v48  ;;  %v1278_v16 = vadd.f32 1.0, %v2741_v30  ;;  %v1186_v19 = vadd.f32 %v1185_v32, %v1180_v41 }
  0xe5   : > { %v1146_v25 = vmul.f32 0.5, %v1145_v21  ;;  %v1191_v27 = vmul.f32 %v2631_v39, %v2631_v39  ;;  %1593 = vlog2.f32 %v1261_v29  ;;  %v1203_v22 = vmul.f32 %v2540_v12, %v2619_v6 }
  0xe6   : > { %v1134_v45 = vmax.f32 %v1120_v26, %v1133_v24  ;;  %v1159_v8 = vsub.f32 %v1158_v18, %v1157_v58  ;;  %1595 = vlog2.f32 %v1278_v16  ;;  %v942_v49 = vmul.f32 %v2641_v56, %v940_v43 }
  0xe7   : > { %v1147_v55 = vsub.f32 %v1143_v35, %v1146_v25  ;;  %v1236_v57 = vunpack.c.l.bf16 %v1472_v36  ;;  %v1253_v34 = vunpack.c.l.bf16 %v1474_v53  ;;  %v1010_v0 = vadd.f32 %v1009_v2, %v993_v42  ;;  %s1415_s1 = sshll.u32 %s3070_s18, 1 }
  0xe8   : > { %v1160_v30 = vmul.f32 0.5, %v1159_v8  ;;  %v1175_v3 = vmul.f32 %v2628_v11, %v2619_v6  ;;  %v1197_v39 = vmul.f32 %v2636_v46, %v2636_v46  ;;  %v1192_v4 = vadd.f32 %v1191_v27, %v1186_v19  ;;  %v3062_v46 = vld [vmem:[#allocation43_spill] sm:$0xff]  ;;  %s314_s15 = scalar_lea.vmem %s3071_s17, %s1415_s1 }
  0xe9   : > { %v1148_v1 = vmax.f32 %v1134_v45, %v1147_v55  ;;  %v1220_v9 = vmax.f32 %v2550_v47, 0.0  ;;  %v3059_v60 = vunpack.c.l.bf16 %v2622_v13  ;;  %v3060_v59 = vmax.f32 %v2540_v12, 0.0 }
  0xea   : > { %v1161_v5 = vsub.f32 %v1157_v58, %v1160_v30  ;;  %v1237_v40 = vmax.f32 %v2563_v17, 0.0  ;;  %v1270_v14 = vunpack.c.l.bf16 %v1476_v28  ;;  %v1012_v11 = vadd.f32 %v3061_v61, %v942_v49 }
  0xeb   : > { %v1221_v56 = vmul.f32 %v2550_v47, %v3059_v60  ;;  %v1204_v54 = vsub.f32 %v3060_v59, %v1203_v22  ;;  %v1238_v33 = vmul.f32 %v2563_v17, %v1236_v57  ;;  %v1254_v20 = vmax.f32 %v3062_v46, 0.0 }
  0xec   : > { %v1255_v15 = vmul.f32 %v3062_v46, %v1253_v34  ;;  %v1013_v38 = vmul.f32 %v1010_v0, %v3063_v31  ;;  %v1162_v13 = vmax.f32 %v1148_v1, %v1161_v5  ;;  %v1211_v47 = vmul.f32 0.6931472, %v3064_v51 }
  0xed   : > { %v1287_v12 = vadd.f32 %v2619_v6, %v3065_v23  ;;  %v1198_v7 = vadd.f32 %v1197_v39, %v1192_v4  ;;  %v1222_v37 = vsub.f32 %v1220_v9, %v1221_v56  ;;  %v1229_v43 = vmul.f32 0.6931472, %v3066_v10 }
  0xee   : > { %vm1163_vm3 = vcmp.gt.f32.partialorder %v1162_v13, 0.0  ;;  %v1271_v17 = vmax.f32 %v3067_v52, 0.0  ;;  %v1272_v44 = vmul.f32 %v3067_v52, %v1270_v14  ;;  %v3069_v35 = vunpack.c.l.bf16 %v3068_v50 }
  0xef   : > { %v1239_v41 = vsub.f32 %v1237_v40, %v1238_v33  ;;  %v1014_v26 = vadd.f32 %v1013_v38, %v1012_v11  ;;  %v1212_v63 = vadd.f32 %v1211_v47, %v1204_v54  ;;  %v1256_v62 = vsub.f32 %v1254_v20, %v1255_v15 }
  0xf0   : > { %v1167_v48 = vsel %vm1163_vm3, 0.0, %v3069_v35  ;;  %v1592_v32 = vpop.eup %1591  ;;  %v1296_v18 = vsel %vm1288_vm2, %v1287_v12, 0.0  ;;  %v1199_v42 = vmul.f32 %v1198_v7, %v1175_v3  ;;  %v1230_v29 = vadd.f32 %v1229_v43, %v1222_v37 }
  0xf1   : > { %v1213_v21 = vadd.f32 %v2619_v6, %v1167_v48  ;;  %v1246_v2 = vmul.f32 0.6931472, %v1592_v32  ;;  %v1273_v58 = vsub.f32 %v1271_v17, %v1272_v44  ;;  %v1297_v19 = vrot.slane %v1296_v18, 4 }
  0xf2   : > { %v1594_v24 = vpop.eup %1593  ;;  %v1283_v22 = vadd.f32 %v1199_v42, %v1014_v26 }
  0xf3   : > { %v1596_v36 = vpop.eup %1595  ;;  %v1247_v53 = vadd.f32 %v1246_v2, %v1239_v41  ;;  %v1263_v16 = vmul.f32 0.6931472, %v1594_v24  ;;  %v1214_v27 = vmul.f32 %v1213_v21, %v1212_v63  ;;  %v1298_v57 = vadd.f32 %v1297_v19, %v1296_v18 }
  0xf4   : > { %v1280_v25 = vmul.f32 0.6931472, %v1596_v36 }
  0xf5   : > { %v1248_v45 = vadd.f32 %v1247_v53, %v1230_v29  ;;  %v1264_v8 = vadd.f32 %v1263_v16, %v1256_v62  ;;  %v1284_v28 = vadd.f32 %v1283_v22, %v1214_v27  ;;  %v1299_v30 = vrot.slane %v1298_v57, 2 }
  0xf6   : > { %v1281_v49 = vadd.f32 %v1280_v25, %v1273_v58 }
  0xf7   : > { %v1265_v55 = vadd.f32 %v1264_v8, %v1248_v45  ;;  %v1300_v4 = vadd.f32 %v1299_v30, %v1298_v57 }
  0xf9   : > { %v1282_v34 = vadd.f32 %v1281_v49, %v1265_v55  ;;  %v1301_v56 = vrot.slane %v1300_v4, 1 }
  0xfb   : > { %v1285_v0 = vmul.f32 %v1282_v34, %v2619_v6  ;;  %v1302_v54 = vadd.f32 %v1301_v56, %v1300_v4 }
  0xfd   : > { %v1286_v3 = vadd.f32 %v1285_v0, %v1284_v28 }
  0xff   : > { %v1289_v39 = vsel %vm1288_vm2, %v1286_v3, 0.0 }
 0x100   : > { %v1290_v1 = vrot.slane %v1289_v39, 4 }
 0x102   : > { %v1291_v9 = vadd.f32 %v1290_v1, %v1289_v39 }
 0x104   : > { %v1292_v60 = vrot.slane %v1291_v9, 2 }
 0x106   : > { %v1293_v5 = vadd.f32 %v1292_v60, %v1291_v9 }
 0x108   : > { %v1294_v59 = vrot.slane %v1293_v5, 1 }
 0x10a   : > { %v1295_v40 = vadd.f32 %v1294_v59, %v1293_v5 }
 0x10c   : > { %v1304_v6 = vsel %vm1303_vm4, %v1295_v40, %v1302_v54 }
 0x10d   : > { %1305 = vst [vmem:[%s314_s15] sm:$0x3] %v1304_v6 }
 0x10e PF: > { %s3072_s30 = sld [smem:[#allocation5_spill]] }
 0x114   : > { %s17_s21 = sadd.s32 1, %s3072_s30  }
 0x115   : > { %p14_p1 = scmp.ge.s32.totalorder %s17_s21, 4  }
 0x117   :  { %16 = sbr.rel (!%p14_p1) target bundleno = 8 (0x8), region = 145 }
 0x11c   :  { %1325 = vsyncpa [#allocation3], 1 }
 0x11d   :  { %1327 = vsyncpa [#allocation3 + $0x1], 1 }

</bundles_post_ra>
